<compile_context>
chip_gen: v5e
topology: v5e:2x2
jax: 0.10.0
libtpu: 0.0.40
codegen_flags: <defaults>
</compile_context>

<pallas_src>
import functools
import numpy as np
import jax
import jax.numpy as jnp
from jax.experimental import pallas as pl
from jax.experimental.pallas import tpu as pltpu

# ---- small config (scaled-down analogue of d_model=512, d_k=d_v=64, h=8, d_ff=2048) ----
VOCAB   = 64
MAX_LEN = 20
PAD_IDX = 0
N_DEC   = 2
D_MODEL = 32
D_K     = 8
D_V     = 8
H       = 4
D_FF    = 64
LN_EPS  = 1e-5
NEG_INF = -1e30          # finite "minus infinity" -> no NaN on fully-masked rows

B     = 2
SEQ   = 8
N_ENC = 16

# ---- packed weight-slab layout: one (N_DEC, W_ROWS, 128) f32 slab ----
W_LANES  = 128
R_SA_QKV = 0      # (D_MODEL, 3*H*D_K)  self-attn fused QKV (Q pre-scaled)
R_SA_O   = 32     # (H*D_V, D_MODEL)    self-attn output proj
R_EA_Q   = 64     # (D_MODEL, H*D_K)    cross-attn Q (pre-scaled)
R_EA_KV  = 96     # (D_MODEL, 2*H*D_K)  cross-attn fused KV
R_EA_O   = 128    # (H*D_V, D_MODEL)    cross-attn output proj
R_FF1    = 160    # (D_MODEL, D_FF)
R_FF2    = 192    # (D_FF, D_MODEL)
R_CONST  = 256    # biases + LN rows (see C_* below)
W_ROWS   = 272
# const-row offsets inside the R_CONST block
C_B_SA_QKV = 0
C_B_SA_O   = 1
C_B_EA_Q   = 2
C_B_EA_KV  = 3
C_B_EA_O   = 4
C_B_FF1    = 5
C_B_FF2    = 6
C_LN1      = 8    # gamma, beta on consecutive rows
C_LN2      = 10
C_LN3      = 12


# ----------------------------- fused Pallas kernel -----------------------------
def fused_decoder_kernel(bb, x_ref, enc_ref, mpad_ref, mself_ref, menc_ref,
                         w_ref, fc_ref, logp_ref, att_ref):
    x     = x_ref[...]                 # (bb*SEQ, D_MODEL)
    mpad  = mpad_ref[...]              # (bb*SEQ, 1)       1 = real token, 0 = pad
    enc2  = enc_ref[...]               # (bb*N_ENC, D_MODEL)
    mself = mself_ref[...]             # (bb, SEQ, SEQ)    additive mask (0 / NEG_INF)
    menc  = menc_ref[...]              # (bb, 1, N_ENC)    additive mask

    def wmat(li, r, rows, cols):       # 8-aligned static weight view
        return w_ref[li, r:r + rows, 0:cols]

    def wrow(li, r, cols):             # (1, cols) bias / LN row
        rr = R_CONST + r
        return w_ref[li, rr:rr + 1, 0:cols]

    def layer_norm(y, li, c_ln):
        gamma = wrow(li, c_ln, D_MODEL)
        beta = wrow(li, c_ln + 1, D_MODEL)
        mu = jnp.mean(y, axis=-1, keepdims=True)
        ms = jnp.mean(y * y, axis=-1, keepdims=True)      # independent 2nd reduction
        return (y - mu) * jax.lax.rsqrt(ms - mu * mu + LN_EPS) * gamma + beta

    def attn_block(qd, kd, vd, mask_add):
        # qd: (SEQ, H*D_K)  kd: (nk, H*D_K)  vd: (nk, H*D_V)
        # scale is already folded into the Q weights; mask is additive.
        ctx_heads, p_heads = [], []
        for h in range(H):
            qh = qd[:, h * D_K:(h + 1) * D_K]
            kh = kd[:, h * D_K:(h + 1) * D_K]
            vh = vd[:, h * D_V:(h + 1) * D_V]
            s = jnp.dot(qh, kh.T, preferred_element_type=jnp.float32) + mask_add
            m = jnp.max(s, axis=-1, keepdims=True)
            e = jnp.exp(s - m)
            p = e * pl.reciprocal(jnp.sum(e, axis=-1, keepdims=True), approx=True)
            ctx_heads.append(jnp.dot(p, vh, preferred_element_type=jnp.float32))
            p_heads.append(p)
        return jnp.concatenate(ctx_heads, axis=1), p_heads     # (SEQ, H*D_V)

    for li in range(N_DEC):
        # ---------------- self attention ----------------
        qkv = (jnp.dot(x, wmat(li, R_SA_QKV, D_MODEL, 3 * H * D_K),
                       preferred_element_type=jnp.float32)
               + wrow(li, C_B_SA_QKV, 3 * H * D_K))             # (P, 3*H*D_K)
        ctx_all = []
        for b in range(bb):
            r0 = b * SEQ
            ctx, _ = attn_block(qkv[r0:r0 + SEQ, 0:H * D_K],
                                qkv[r0:r0 + SEQ, H * D_K:2 * H * D_K],
                                qkv[r0:r0 + SEQ, 2 * H * D_K:3 * H * D_K],
                                mself[b])
            ctx_all.append(ctx)
        ctx2 = ctx_all[0] if bb == 1 else jnp.concatenate(ctx_all, axis=0)
        sa_out = (jnp.dot(ctx2, wmat(li, R_SA_O, H * D_V, D_MODEL),
                          preferred_element_type=jnp.float32)
                  + wrow(li, C_B_SA_O, D_MODEL))
        x = layer_norm(x + sa_out, li, C_LN1) * mpad

        # ---------------- cross attention ----------------
        qp = (jnp.dot(x, wmat(li, R_EA_Q, D_MODEL, H * D_K),
                      preferred_element_type=jnp.float32)
              + wrow(li, C_B_EA_Q, H * D_K))                    # (P, H*D_K)
        kvp = (jnp.dot(enc2, wmat(li, R_EA_KV, D_MODEL, 2 * H * D_K),
                       preferred_element_type=jnp.float32)
               + wrow(li, C_B_EA_KV, 2 * H * D_K))              # (bb*N_ENC, 2*H*D_K)
        ctx_all = []
        for b in range(bb):
            r0 = b * SEQ
            e0 = b * N_ENC
            ctx, p_heads = attn_block(qp[r0:r0 + SEQ, :],
                                      kvp[e0:e0 + N_ENC, 0:H * D_K],
                                      kvp[e0:e0 + N_ENC, H * D_K:2 * H * D_K],
                                      menc[b])
            ctx_all.append(ctx)
            if li == N_DEC - 1:
                for h in range(H):
                    att_ref[b, h, :, :] = p_heads[h]            # exported att map
        ctx2 = ctx_all[0] if bb == 1 else jnp.concatenate(ctx_all, axis=0)
        ea_out = (jnp.dot(ctx2, wmat(li, R_EA_O, H * D_V, D_MODEL),
                          preferred_element_type=jnp.float32)
                  + wrow(li, C_B_EA_O, D_MODEL))
        x = layer_norm(x + ea_out, li, C_LN2) * mpad

        # ---------------- position-wise feed-forward ----------------
        h1 = jnp.maximum(
            jnp.dot(x, wmat(li, R_FF1, D_MODEL, D_FF),
                    preferred_element_type=jnp.float32) + wrow(li, C_B_FF1, D_FF),
            0.0)
        h2 = (jnp.dot(h1, wmat(li, R_FF2, D_FF, D_MODEL),
                      preferred_element_type=jnp.float32)
              + wrow(li, C_B_FF2, D_MODEL))
        x = layer_norm(x + h2, li, C_LN3) * mpad

    # ---------------- vocab projection + log_softmax ----------------
    logits = jnp.dot(x, fc_ref[...], preferred_element_type=jnp.float32)
    m = jnp.max(logits, axis=-1, keepdims=True)
    lse = jnp.log(jnp.sum(jnp.exp(logits - m), axis=-1, keepdims=True)) + m
    logp_ref[...] = logits - lse


# ----------------------------- Pallas wrapper -----------------------------
def _select_grid(bsz):
    """Batch handling per generation: fold batch on single-TC chips (v5e/v6e),
    shard it across TensorCores on multi-TC chips (v7x)."""
    kind = ""
    try:
        kind = jax.devices()[0].device_kind.lower()
    except Exception:
        pass
    if "7" in kind:                 # v7x: 2 TensorCores per chip
        return bsz, 1               # (grid steps, batch-block per step)
    return 1, bsz                   # v5e/v6e: one TC -> one grid step


def fused_forward_pallas(x, enc, mask_pad, mself_add, menc_add, packed):
    bsz = x.shape[0]
    grid_n, bb = _select_grid(bsz)

    # flatten positions so every projection / FF / FC is one lane-dense matmul
    x2 = x.reshape(bsz * SEQ, D_MODEL)
    enc2 = enc.reshape(bsz * N_ENC, D_MODEL)
    mpad2 = mask_pad.reshape(bsz * SEQ, 1)

    kernel = functools.partial(fused_decoder_kernel, bb)
    in_specs = [
        pl.BlockSpec((bb * SEQ, D_MODEL),      lambda i: (i, 0)),
        pl.BlockSpec((bb * N_ENC, D_MODEL),    lambda i: (i, 0)),
        pl.BlockSpec((bb * SEQ, 1),            lambda i: (i, 0)),
        pl.BlockSpec((bb, SEQ, SEQ),           lambda i: (i, 0, 0)),
        pl.BlockSpec((bb, 1, N_ENC),           lambda i: (i, 0, 0)),
        pl.BlockSpec((N_DEC, W_ROWS, W_LANES), lambda i: (0, 0, 0)),   # weight slab
        pl.BlockSpec((D_MODEL, VOCAB),         lambda i: (0, 0)),      # fc weight
    ]
    out_specs = [
        pl.BlockSpec((bb * SEQ, VOCAB),        lambda i: (i, 0)),
        pl.BlockSpec((bb, H, SEQ, N_ENC),      lambda i: (i, 0, 0, 0)),
    ]
    out_shape = (
        jax.ShapeDtypeStruct((bsz * SEQ, VOCAB), jnp.float32),
        jax.ShapeDtypeStruct((bsz, H, SEQ, N_ENC), jnp.float32),
    )
    logp2, att = pl.pallas_call(
        kernel,
        out_shape=out_shape,
        grid_spec=pltpu.PrefetchScalarGridSpec(
            num_scalar_prefetch=0, grid=(grid_n,),
            in_specs=in_specs, out_specs=out_specs),
        compiler_params=pltpu.CompilerParams(
            dimension_semantics=("parallel",)),
    )(x2, enc2, mpad2, mself_add, menc_add, packed["w_slab"], packed["fc_w"])
    return logp2.reshape(bsz, SEQ, VOCAB), att


def pack_params_for_kernel(params):
    """Pack every per-layer tensor into one lane-dense (N_DEC, W_ROWS, 128)
    slab (8-aligned row ranges); fold the 1/sqrt(d_k) score scale into the Q
    weights/biases.  Call once and reuse (hoisted out of the forward path)."""
    scale = 1.0 / np.sqrt(D_K)
    slabs = []
    for lp in params["layers"]:
        s = np.zeros((W_ROWS, W_LANES), np.float32)

        def put(r, mat):
            mat = np.asarray(mat, np.float32)
            if mat.ndim == 1:
                mat = mat[None, :]
            s[r:r + mat.shape[0], :mat.shape[1]] = mat

        w_q, w_k, w_v = (np.asarray(lp["sa_w_in"][i]) for i in range(3))
        b_q, b_k, b_v = (np.asarray(lp["sa_b_in"][i]) for i in range(3))
        put(R_SA_QKV, np.concatenate([w_q * scale, w_k, w_v], axis=1))
        put(R_CONST + C_B_SA_QKV, np.concatenate([b_q * scale, b_k, b_v]))
        put(R_SA_O, lp["sa_w_o"])
        put(R_CONST + C_B_SA_O, np.asarray(lp["sa_b_o"])[0])

        ew_q, ew_k, ew_v = (np.asarray(lp["ea_w_in"][i]) for i in range(3))
        eb_q, eb_k, eb_v = (np.asarray(lp["ea_b_in"][i]) for i in range(3))
        put(R_EA_Q, ew_q * scale)
        put(R_CONST + C_B_EA_Q, eb_q * scale)
        put(R_EA_KV, np.concatenate([ew_k, ew_v], axis=1))
        put(R_CONST + C_B_EA_KV, np.concatenate([eb_k, eb_v]))
        put(R_EA_O, lp["ea_w_o"])
        put(R_CONST + C_B_EA_O, np.asarray(lp["ea_b_o"])[0])

        put(R_FF1, lp["ff_w1"])
        put(R_CONST + C_B_FF1, np.asarray(lp["ff_b1"])[0])
        put(R_FF2, lp["ff_w2"])
        put(R_CONST + C_B_FF2, np.asarray(lp["ff_b2"])[0])

        put(R_CONST + C_LN1, lp["ln1"])   # gamma, beta rows
        put(R_CONST + C_LN2, lp["ln2"])
        put(R_CONST + C_LN3, lp["ln3"])
        slabs.append(s)
    return {"w_slab": jnp.asarray(np.stack(slabs, axis=0)),
            "fc_w": params["fc_w"]}


# ----------------------------- glue (plain JAX) -----------------------------
def sinusoid_encoding_table(n_position, d_hid, padding_idx=None):
    pos = np.arange(n_position, dtype=np.float64)[:, None]
    hid = np.arange(d_hid, dtype=np.float64)[None, :]
    table = pos / np.power(10000.0, 2.0 * np.floor(hid / 2.0) / d_hid)
    table[:, 0::2] = np.sin(table[:, 0::2])
    table[:, 1::2] = np.cos(table[:, 1::2])
    if padding_idx is not None:
        table[padding_idx] = 0.0
    return jnp.asarray(table, dtype=jnp.float32)


def build_masks(tokens):
    b_s, seq_len = tokens.shape
    mask_queries = (tokens != PAD_IDX).astype(jnp.float32)[..., None]       # (b, seq, 1)
    causal = jnp.triu(jnp.ones((seq_len, seq_len), jnp.float32), k=1)       # (seq, seq)
    pad_k = (tokens == PAD_IDX).astype(jnp.float32)[:, None, :]             # (b, 1, seq)
    mask_self = causal[None, :, :] + pad_k                                  # >0 == masked
    seq_pos = (jnp.arange(1, seq_len + 1, dtype=jnp.int32)[None, :]
               * (tokens != PAD_IDX).astype(jnp.int32))                     # (b, seq)
    return mask_queries, mask_self, seq_pos


def forward_pallas(tokens, enc_output, mask_encoder, params, packed=None):
    mask_queries, mask_self, seq_pos = build_masks(tokens)
    # additive masks precomputed outside the kernel (no compare/select inside)
    mself_add = jnp.where(mask_self > 0, NEG_INF, 0.0).astype(jnp.float32)
    menc_add = jnp.where(mask_encoder > 0, NEG_INF, 0.0).astype(jnp.float32)
    x = params["word_emb"][tokens] + params["pos_emb"][seq_pos]
    if packed is None:
        packed = pack_params_for_kernel(params)
    return fused_forward_pallas(x, enc_output, mask_queries,
                                mself_add, menc_add, packed)


# ----------------------------- pure-JAX reference -----------------------------
def _ref_mha(xq, xkv, mask, w_in, b_in, w_o, b_o):
    q = xq @ w_in[0] + b_in[0]
    k = xkv @ w_in[1] + b_in[1]
    v = xkv @ w_in[2] + b_in[2]
    nq, nk = q.shape[0], k.shape[0]
    qh = q.reshape(nq, H, D_K).transpose(1, 0, 2)
    kh = k.reshape(nk, H, D_K).transpose(1, 0, 2)
    vh = v.reshape(nk, H, D_V).transpose(1, 0, 2)
    s = jnp.einsum("hqd,hkd->hqk", qh, kh) / np.sqrt(D_K)
    s = jnp.where(mask[None] > 0, NEG_INF, s)
    p = jax.nn.softmax(s, axis=-1)
    o = jnp.einsum("hqk,hkd->hqd", p, vh).transpose(1, 0, 2).reshape(nq, H * D_V)
    return o @ w_o + b_o[0], p


def _ref_ln(x, ln):
    mu = x.mean(-1, keepdims=True)
    var = ((x - mu) ** 2).mean(-1, keepdims=True)
    return (x - mu) / jnp.sqrt(var + LN_EPS) * ln[0] + ln[1]


def _ref_layer_single(x, enc, mpad, mself, menc, lp):
    sa, _ = _ref_mha(x, x, mself, lp["sa_w_in"], lp["sa_b_in"], lp["sa_w_o"], lp["sa_b_o"])
    sa = _ref_ln(x + sa, lp["ln1"]) * mpad
    ea, att = _ref_mha(sa, enc, menc, lp["ea_w_in"], lp["ea_b_in"], lp["ea_w_o"], lp["ea_b_o"])
    ea = _ref_ln(sa + ea, lp["ln2"]) * mpad
    h1 = jnp.maximum(ea @ lp["ff_w1"] + lp["ff_b1"][0], 0.0)
    ff = _ref_ln(ea + h1 @ lp["ff_w2"] + lp["ff_b2"][0], lp["ln3"]) * mpad
    return ff, att


def forward_ref(tokens, enc_output, mask_encoder, params):
    mask_queries, mask_self, seq_pos = build_masks(tokens)
    x = params["word_emb"][tokens] + params["pos_emb"][seq_pos]
    att = None
    layer_fn = jax.vmap(_ref_layer_single, in_axes=(0, 0, 0, 0, 0, None))
    for lp in params["layers"]:
        x, att = layer_fn(x, enc_output, mask_queries, mask_self, mask_encoder, lp)
    logits = x @ params["fc_w"]
    return jax.nn.log_softmax(logits, axis=-1), att


# ----------------------------- params -----------------------------
def init_params(key):
    def normal(k, shape, scale=0.05):
        return scale * jax.random.normal(k, shape, dtype=jnp.float32)

    keys = iter(jax.random.split(key, 64))
    word_emb = normal(next(keys), (VOCAB, D_MODEL)).at[PAD_IDX].set(0.0)
    pos_emb = sinusoid_encoding_table(MAX_LEN + 1, D_MODEL, padding_idx=0)
    ln_init = jnp.stack([jnp.ones((D_MODEL,), jnp.float32),
                         jnp.zeros((D_MODEL,), jnp.float32)])
    layers = []
    for _ in range(N_DEC):
        lp = dict(
            sa_w_in=normal(next(keys), (3, D_MODEL, H * D_K)),
            sa_b_in=normal(next(keys), (3, H * D_K)),
            sa_w_o=normal(next(keys), (H * D_V, D_MODEL)),
            sa_b_o=normal(next(keys), (1, D_MODEL)),
            ln1=ln_init,
            ea_w_in=normal(next(keys), (3, D_MODEL, H * D_K)),
            ea_b_in=normal(next(keys), (3, H * D_K)),
            ea_w_o=normal(next(keys), (H * D_V, D_MODEL)),
            ea_b_o=normal(next(keys), (1, D_MODEL)),
            ln2=ln_init,
            ff_w1=normal(next(keys), (D_MODEL, D_FF)),
            ff_b1=normal(next(keys), (1, D_FF)),
            ff_w2=normal(next(keys), (D_FF, D_MODEL)),
            ff_b2=normal(next(keys), (1, D_MODEL)),
            ln3=ln_init,
        )
        layers.append(lp)
    fc_w = normal(next(keys), (D_MODEL, VOCAB))
    return dict(word_emb=word_emb, pos_emb=pos_emb, layers=layers, fc_w=fc_w)


# ----------------------------- main -----------------------------
if __name__ == "__main__":
    key = jax.random.PRNGKey(0)
    k_tok, k_enc, k_par = jax.random.split(key, 3)

    tokens = jax.random.randint(k_tok, (B, SEQ), 1, VOCAB, dtype=jnp.int32)
    tokens = tokens.at[:, -1].set(PAD_IDX)                       # one padded position
    enc_output = 0.5 * jax.random.normal(k_enc, (B, N_ENC, D_MODEL), dtype=jnp.float32)
    mask_encoder = jnp.zeros((B, 1, N_ENC), jnp.float32).at[1, 0, -2:].set(1.0)
    params = init_params(k_par)

    packed = pack_params_for_kernel(params)      # packed once, reused every call

    logp, att = forward_pallas(tokens, enc_output, mask_encoder, params, packed)
    logp = jax.block_until_ready(logp)
    att = jax.block_until_ready(att)

    logp_ref, att_ref = forward_ref(tokens, enc_output, mask_encoder, params)
    assert logp.shape == (B, SEQ, VOCAB) and att.shape == (B, H, SEQ, N_ENC)
    assert np.allclose(np.asarray(logp), np.asarray(logp_ref), atol=2e-2, rtol=2e-2)
    assert np.allclose(np.asarray(att), np.asarray(att_ref), atol=2e-2, rtol=2e-2)
    print("KERNEL_OK")
</pallas_src>

<mosaic_0001>
module attributes {stable_mosaic.version = 11 : i64} {
  func.func @fused_decoder_kernel(%arg0: i32, %arg1: memref<16x32xf32, #tpu.memory_space<vmem>>, %arg2: memref<32x32xf32, #tpu.memory_space<vmem>>, %arg3: memref<16x1xf32, #tpu.memory_space<vmem>>, %arg4: memref<2x8x8xf32, #tpu.memory_space<vmem>>, %arg5: memref<2x1x16xf32, #tpu.memory_space<vmem>>, %arg6: memref<2x272x128xf32, #tpu.memory_space<vmem>>, %arg7: memref<32x64xf32, #tpu.memory_space<vmem>>, %arg8: memref<16x64xf32, #tpu.memory_space<vmem>>, %arg9: memref<2x4x8x16xf32, #tpu.memory_space<vmem>>) attributes {dimension_semantics = [#tpu.dimension_semantics<parallel>], iteration_bounds = array<i64: 1>, scalar_prefetch = 0 : i64, scratch_operands = 0 : i64, tpu.core_type = #tpu.core_type<tc>, window_params = [{transform_indices = @transform_0, window_bounds = array<i64: 16, 32>}, {transform_indices = @transform_1, window_bounds = array<i64: 32, 32>}, {transform_indices = @transform_2, window_bounds = array<i64: 16, 1>}, {transform_indices = @transform_3, window_bounds = array<i64: 2, 8, 8>}, {transform_indices = @transform_4, window_bounds = array<i64: 2, 1, 16>}, {pipeline_mode = #tpu.pipeline_mode<synchronous>, transform_indices = @transform_5, window_bounds = array<i64: 2, 272, 128>}, {pipeline_mode = #tpu.pipeline_mode<synchronous>, transform_indices = @transform_6, window_bounds = array<i64: 32, 64>}, {transform_indices = @transform_7, window_bounds = array<i64: 16, 64>}, {transform_indices = @transform_8, window_bounds = array<i64: 2, 4, 8, 16>}]} {
    %c0 = arith.constant 0 : index
    %c0_0 = arith.constant 0 : index
    %0 = vector.load %arg1[%c0, %c0_0] : memref<16x32xf32, #tpu.memory_space<vmem>>, vector<16x32xf32>
    %c0_1 = arith.constant 0 : index
    %c0_2 = arith.constant 0 : index
    %1 = vector.load %arg3[%c0_1, %c0_2] : memref<16x1xf32, #tpu.memory_space<vmem>>, vector<16x1xf32>
    %c0_3 = arith.constant 0 : index
    %c0_4 = arith.constant 0 : index
    %2 = vector.load %arg2[%c0_3, %c0_4] : memref<32x32xf32, #tpu.memory_space<vmem>>, vector<32x32xf32>
    %c0_5 = arith.constant 0 : index
    %c0_6 = arith.constant 0 : index
    %c0_7 = arith.constant 0 : index
    %3 = vector.load %arg4[%c0_5, %c0_6, %c0_7] : memref<2x8x8xf32, #tpu.memory_space<vmem>>, vector<2x8x8xf32>
    %c0_8 = arith.constant 0 : index
    %c0_9 = arith.constant 0 : index
    %c0_10 = arith.constant 0 : index
    %4 = vector.load %arg5[%c0_8, %c0_9, %c0_10] : memref<2x1x16xf32, #tpu.memory_space<vmem>>, vector<2x1x16xf32>
    %c0_11 = arith.constant 0 : index
    %c0_12 = arith.constant 0 : index
    %c0_13 = arith.constant 0 : index
    %5 = vector.load %arg6[%c0_11, %c0_12, %c0_13] : memref<2x272x128xf32, #tpu.memory_space<vmem>>, vector<1x32x96xf32>
    %6 = vector.shape_cast %5 : vector<1x32x96xf32> to vector<32x96xf32>
    %cst = arith.constant dense<0.000000e+00> : vector<16x96xf32>
    %7 = tpu.matmul %0, %6, %cst {dimension_numbers = #tpu.dot_dimension_numbers<[1], [0], [0], [1], [0, 0, 1, 1], [], []>} : vector<16x32xf32>, vector<32x96xf32>, vector<16x96xf32> -> vector<16x96xf32>
    %c0_14 = arith.constant 0 : index
    %c256 = arith.constant 256 : index
    %c0_15 = arith.constant 0 : index
    %8 = vector.load %arg6[%c0_14, %c256, %c0_15] : memref<2x272x128xf32, #tpu.memory_space<vmem>>, vector<1x1x96xf32>
    %9 = vector.shape_cast %8 : vector<1x1x96xf32> to vector<1x96xf32>
    %10 = vector.broadcast %9 : vector<1x96xf32> to vector<16x96xf32>
    %11 = arith.addf %7, %10 : vector<16x96xf32>
    %12 = vector.extract_strided_slice %11 {offsets = [0, 0], sizes = [8, 32], strides = [1, 1]} : vector<16x96xf32> to vector<8x32xf32>
    %13 = vector.extract_strided_slice %11 {offsets = [0, 32], sizes = [8, 32], strides = [1, 1]} : vector<16x96xf32> to vector<8x32xf32>
    %14 = vector.extract_strided_slice %11 {offsets = [0, 64], sizes = [8, 32], strides = [1, 1]} : vector<16x96xf32> to vector<8x32xf32>
    %15 = vector.extract_strided_slice %3 {offsets = [0, 0, 0], sizes = [1, 8, 8], strides = [1, 1, 1]} : vector<2x8x8xf32> to vector<1x8x8xf32>
    %16 = vector.shape_cast %15 : vector<1x8x8xf32> to vector<8x8xf32>
    %17 = vector.extract_strided_slice %12 {offsets = [0, 0], sizes = [8, 8], strides = [1, 1]} : vector<8x32xf32> to vector<8x8xf32>
    %18 = vector.extract_strided_slice %13 {offsets = [0, 0], sizes = [8, 8], strides = [1, 1]} : vector<8x32xf32> to vector<8x8xf32>
    %19 = vector.extract_strided_slice %14 {offsets = [0, 0], sizes = [8, 8], strides = [1, 1]} : vector<8x32xf32> to vector<8x8xf32>
    %20 = tpu.transpose %18, [1, 0] : vector<8x8xf32> -> vector<8x8xf32>
    %cst_16 = arith.constant dense<0.000000e+00> : vector<8x8xf32>
    %21 = tpu.matmul %17, %20, %cst_16 {dimension_numbers = #tpu.dot_dimension_numbers<[1], [0], [0], [1], [0, 0, 1, 1], [], []>} : vector<8x8xf32>, vector<8x8xf32>, vector<8x8xf32> -> vector<8x8xf32>
    %22 = arith.addf %21, %16 : vector<8x8xf32>
    %cst_17 = arith.constant dense<0xFF800000> : vector<8xf32>
    %23 = vector.multi_reduction <maximumf>, %22, %cst_17 [1] : vector<8x8xf32> to vector<8xf32>
    %24 = vector.shape_cast %23 : vector<8xf32> to vector<8x1xf32>
    %25 = vector.broadcast %24 : vector<8x1xf32> to vector<8x8xf32>
    %26 = arith.subf %22, %25 : vector<8x8xf32>
    %27 = math.exp %26 : vector<8x8xf32>
    %cst_18 = arith.constant dense<0.000000e+00> : vector<8xf32>
    %28 = vector.multi_reduction <add>, %27, %cst_18 [1] : vector<8x8xf32> to vector<8xf32>
    %29 = vector.shape_cast %28 : vector<8xf32> to vector<8x1xf32>
    %30 = tpu.reciprocal %29 {approx = true} : vector<8x1xf32> -> vector<8x1xf32>
    %31 = vector.broadcast %30 : vector<8x1xf32> to vector<8x8xf32>
    %32 = arith.mulf %27, %31 : vector<8x8xf32>
    %cst_19 = arith.constant dense<0.000000e+00> : vector<8x8xf32>
    %33 = tpu.matmul %32, %19, %cst_19 {dimension_numbers = #tpu.dot_dimension_numbers<[1], [0], [0], [1], [0, 0, 1, 1], [], []>} : vector<8x8xf32>, vector<8x8xf32>, vector<8x8xf32> -> vector<8x8xf32>
    %34 = vector.extract_strided_slice %12 {offsets = [0, 8], sizes = [8, 8], strides = [1, 1]} : vector<8x32xf32> to vector<8x8xf32>
    %35 = vector.extract_strided_slice %13 {offsets = [0, 8], sizes = [8, 8], strides = [1, 1]} : vector<8x32xf32> to vector<8x8xf32>
    %36 = vector.extract_strided_slice %14 {offsets = [0, 8], sizes = [8, 8], strides = [1, 1]} : vector<8x32xf32> to vector<8x8xf32>
    %37 = tpu.transpose %35, [1, 0] : vector<8x8xf32> -> vector<8x8xf32>
    %cst_20 = arith.constant dense<0.000000e+00> : vector<8x8xf32>
    %38 = tpu.matmul %34, %37, %cst_20 {dimension_numbers = #tpu.dot_dimension_numbers<[1], [0], [0], [1], [0, 0, 1, 1], [], []>} : vector<8x8xf32>, vector<8x8xf32>, vector<8x8xf32> -> vector<8x8xf32>
    %39 = arith.addf %38, %16 : vector<8x8xf32>
    %cst_21 = arith.constant dense<0xFF800000> : vector<8xf32>
    %40 = vector.multi_reduction <maximumf>, %39, %cst_21 [1] : vector<8x8xf32> to vector<8xf32>
    %41 = vector.shape_cast %40 : vector<8xf32> to vector<8x1xf32>
    %42 = vector.broadcast %41 : vector<8x1xf32> to vector<8x8xf32>
    %43 = arith.subf %39, %42 : vector<8x8xf32>
    %44 = math.exp %43 : vector<8x8xf32>
    %cst_22 = arith.constant dense<0.000000e+00> : vector<8xf32>
    %45 = vector.multi_reduction <add>, %44, %cst_22 [1] : vector<8x8xf32> to vector<8xf32>
    %46 = vector.shape_cast %45 : vector<8xf32> to vector<8x1xf32>
    %47 = tpu.reciprocal %46 {approx = true} : vector<8x1xf32> -> vector<8x1xf32>
    %48 = vector.broadcast %47 : vector<8x1xf32> to vector<8x8xf32>
    %49 = arith.mulf %44, %48 : vector<8x8xf32>
    %cst_23 = arith.constant dense<0.000000e+00> : vector<8x8xf32>
    %50 = tpu.matmul %49, %36, %cst_23 {dimension_numbers = #tpu.dot_dimension_numbers<[1], [0], [0], [1], [0, 0, 1, 1], [], []>} : vector<8x8xf32>, vector<8x8xf32>, vector<8x8xf32> -> vector<8x8xf32>
    %51 = vector.extract_strided_slice %12 {offsets = [0, 16], sizes = [8, 8], strides = [1, 1]} : vector<8x32xf32> to vector<8x8xf32>
    %52 = vector.extract_strided_slice %13 {offsets = [0, 16], sizes = [8, 8], strides = [1, 1]} : vector<8x32xf32> to vector<8x8xf32>
    %53 = vector.extract_strided_slice %14 {offsets = [0, 16], sizes = [8, 8], strides = [1, 1]} : vector<8x32xf32> to vector<8x8xf32>
    %54 = tpu.transpose %52, [1, 0] : vector<8x8xf32> -> vector<8x8xf32>
    %cst_24 = arith.constant dense<0.000000e+00> : vector<8x8xf32>
    %55 = tpu.matmul %51, %54, %cst_24 {dimension_numbers = #tpu.dot_dimension_numbers<[1], [0], [0], [1], [0, 0, 1, 1], [], []>} : vector<8x8xf32>, vector<8x8xf32>, vector<8x8xf32> -> vector<8x8xf32>
    %56 = arith.addf %55, %16 : vector<8x8xf32>
    %cst_25 = arith.constant dense<0xFF800000> : vector<8xf32>
    %57 = vector.multi_reduction <maximumf>, %56, %cst_25 [1] : vector<8x8xf32> to vector<8xf32>
    %58 = vector.shape_cast %57 : vector<8xf32> to vector<8x1xf32>
    %59 = vector.broadcast %58 : vector<8x1xf32> to vector<8x8xf32>
    %60 = arith.subf %56, %59 : vector<8x8xf32>
    %61 = math.exp %60 : vector<8x8xf32>
    %cst_26 = arith.constant dense<0.000000e+00> : vector<8xf32>
    %62 = vector.multi_reduction <add>, %61, %cst_26 [1] : vector<8x8xf32> to vector<8xf32>
    %63 = vector.shape_cast %62 : vector<8xf32> to vector<8x1xf32>
    %64 = tpu.reciprocal %63 {approx = true} : vector<8x1xf32> -> vector<8x1xf32>
    %65 = vector.broadcast %64 : vector<8x1xf32> to vector<8x8xf32>
    %66 = arith.mulf %61, %65 : vector<8x8xf32>
    %cst_27 = arith.constant dense<0.000000e+00> : vector<8x8xf32>
    %67 = tpu.matmul %66, %53, %cst_27 {dimension_numbers = #tpu.dot_dimension_numbers<[1], [0], [0], [1], [0, 0, 1, 1], [], []>} : vector<8x8xf32>, vector<8x8xf32>, vector<8x8xf32> -> vector<8x8xf32>
    %68 = vector.extract_strided_slice %12 {offsets = [0, 24], sizes = [8, 8], strides = [1, 1]} : vector<8x32xf32> to vector<8x8xf32>
    %69 = vector.extract_strided_slice %13 {offsets = [0, 24], sizes = [8, 8], strides = [1, 1]} : vector<8x32xf32> to vector<8x8xf32>
    %70 = vector.extract_strided_slice %14 {offsets = [0, 24], sizes = [8, 8], strides = [1, 1]} : vector<8x32xf32> to vector<8x8xf32>
    %71 = tpu.transpose %69, [1, 0] : vector<8x8xf32> -> vector<8x8xf32>
    %cst_28 = arith.constant dense<0.000000e+00> : vector<8x8xf32>
    %72 = tpu.matmul %68, %71, %cst_28 {dimension_numbers = #tpu.dot_dimension_numbers<[1], [0], [0], [1], [0, 0, 1, 1], [], []>} : vector<8x8xf32>, vector<8x8xf32>, vector<8x8xf32> -> vector<8x8xf32>
    %73 = arith.addf %72, %16 : vector<8x8xf32>
    %cst_29 = arith.constant dense<0xFF800000> : vector<8xf32>
    %74 = vector.multi_reduction <maximumf>, %73, %cst_29 [1] : vector<8x8xf32> to vector<8xf32>
    %75 = vector.shape_cast %74 : vector<8xf32> to vector<8x1xf32>
    %76 = vector.broadcast %75 : vector<8x1xf32> to vector<8x8xf32>
    %77 = arith.subf %73, %76 : vector<8x8xf32>
    %78 = math.exp %77 : vector<8x8xf32>
    %cst_30 = arith.constant dense<0.000000e+00> : vector<8xf32>
    %79 = vector.multi_reduction <add>, %78, %cst_30 [1] : vector<8x8xf32> to vector<8xf32>
    %80 = vector.shape_cast %79 : vector<8xf32> to vector<8x1xf32>
    %81 = tpu.reciprocal %80 {approx = true} : vector<8x1xf32> -> vector<8x1xf32>
    %82 = vector.broadcast %81 : vector<8x1xf32> to vector<8x8xf32>
    %83 = arith.mulf %78, %82 : vector<8x8xf32>
    %cst_31 = arith.constant dense<0.000000e+00> : vector<8x8xf32>
    %84 = tpu.matmul %83, %70, %cst_31 {dimension_numbers = #tpu.dot_dimension_numbers<[1], [0], [0], [1], [0, 0, 1, 1], [], []>} : vector<8x8xf32>, vector<8x8xf32>, vector<8x8xf32> -> vector<8x8xf32>
    %85 = tpu.concatenate %33, %50, %67, %84 in 1 : vector<8x8xf32>, vector<8x8xf32>, vector<8x8xf32>, vector<8x8xf32> -> vector<8x32xf32>
    %86 = vector.extract_strided_slice %11 {offsets = [8, 0], sizes = [8, 32], strides = [1, 1]} : vector<16x96xf32> to vector<8x32xf32>
    %87 = vector.extract_strided_slice %11 {offsets = [8, 32], sizes = [8, 32], strides = [1, 1]} : vector<16x96xf32> to vector<8x32xf32>
    %88 = vector.extract_strided_slice %11 {offsets = [8, 64], sizes = [8, 32], strides = [1, 1]} : vector<16x96xf32> to vector<8x32xf32>
    %89 = vector.extract_strided_slice %3 {offsets = [1, 0, 0], sizes = [1, 8, 8], strides = [1, 1, 1]} : vector<2x8x8xf32> to vector<1x8x8xf32>
    %90 = vector.shape_cast %89 : vector<1x8x8xf32> to vector<8x8xf32>
    %91 = vector.extract_strided_slice %86 {offsets = [0, 0], sizes = [8, 8], strides = [1, 1]} : vector<8x32xf32> to vector<8x8xf32>
    %92 = vector.extract_strided_slice %87 {offsets = [0, 0], sizes = [8, 8], strides = [1, 1]} : vector<8x32xf32> to vector<8x8xf32>
    %93 = vector.extract_strided_slice %88 {offsets = [0, 0], sizes = [8, 8], strides = [1, 1]} : vector<8x32xf32> to vector<8x8xf32>
    %94 = tpu.transpose %92, [1, 0] : vector<8x8xf32> -> vector<8x8xf32>
    %cst_32 = arith.constant dense<0.000000e+00> : vector<8x8xf32>
    %95 = tpu.matmul %91, %94, %cst_32 {dimension_numbers = #tpu.dot_dimension_numbers<[1], [0], [0], [1], [0, 0, 1, 1], [], []>} : vector<8x8xf32>, vector<8x8xf32>, vector<8x8xf32> -> vector<8x8xf32>
    %96 = arith.addf %95, %90 : vector<8x8xf32>
    %cst_33 = arith.constant dense<0xFF800000> : vector<8xf32>
    %97 = vector.multi_reduction <maximumf>, %96, %cst_33 [1] : vector<8x8xf32> to vector<8xf32>
    %98 = vector.shape_cast %97 : vector<8xf32> to vector<8x1xf32>
    %99 = vector.broadcast %98 : vector<8x1xf32> to vector<8x8xf32>
    %100 = arith.subf %96, %99 : vector<8x8xf32>
    %101 = math.exp %100 : vector<8x8xf32>
    %cst_34 = arith.constant dense<0.000000e+00> : vector<8xf32>
    %102 = vector.multi_reduction <add>, %101, %cst_34 [1] : vector<8x8xf32> to vector<8xf32>
    %103 = vector.shape_cast %102 : vector<8xf32> to vector<8x1xf32>
    %104 = tpu.reciprocal %103 {approx = true} : vector<8x1xf32> -> vector<8x1xf32>
    %105 = vector.broadcast %104 : vector<8x1xf32> to vector<8x8xf32>
    %106 = arith.mulf %101, %105 : vector<8x8xf32>
    %cst_35 = arith.constant dense<0.000000e+00> : vector<8x8xf32>
    %107 = tpu.matmul %106, %93, %cst_35 {dimension_numbers = #tpu.dot_dimension_numbers<[1], [0], [0], [1], [0, 0, 1, 1], [], []>} : vector<8x8xf32>, vector<8x8xf32>, vector<8x8xf32> -> vector<8x8xf32>
    %108 = vector.extract_strided_slice %86 {offsets = [0, 8], sizes = [8, 8], strides = [1, 1]} : vector<8x32xf32> to vector<8x8xf32>
    %109 = vector.extract_strided_slice %87 {offsets = [0, 8], sizes = [8, 8], strides = [1, 1]} : vector<8x32xf32> to vector<8x8xf32>
    %110 = vector.extract_strided_slice %88 {offsets = [0, 8], sizes = [8, 8], strides = [1, 1]} : vector<8x32xf32> to vector<8x8xf32>
    %111 = tpu.transpose %109, [1, 0] : vector<8x8xf32> -> vector<8x8xf32>
    %cst_36 = arith.constant dense<0.000000e+00> : vector<8x8xf32>
    %112 = tpu.matmul %108, %111, %cst_36 {dimension_numbers = #tpu.dot_dimension_numbers<[1], [0], [0], [1], [0, 0, 1, 1], [], []>} : vector<8x8xf32>, vector<8x8xf32>, vector<8x8xf32> -> vector<8x8xf32>
    %113 = arith.addf %112, %90 : vector<8x8xf32>
    %cst_37 = arith.constant dense<0xFF800000> : vector<8xf32>
    %114 = vector.multi_reduction <maximumf>, %113, %cst_37 [1] : vector<8x8xf32> to vector<8xf32>
    %115 = vector.shape_cast %114 : vector<8xf32> to vector<8x1xf32>
    %116 = vector.broadcast %115 : vector<8x1xf32> to vector<8x8xf32>
    %117 = arith.subf %113, %116 : vector<8x8xf32>
    %118 = math.exp %117 : vector<8x8xf32>
    %cst_38 = arith.constant dense<0.000000e+00> : vector<8xf32>
    %119 = vector.multi_reduction <add>, %118, %cst_38 [1] : vector<8x8xf32> to vector<8xf32>
    %120 = vector.shape_cast %119 : vector<8xf32> to vector<8x1xf32>
    %121 = tpu.reciprocal %120 {approx = true} : vector<8x1xf32> -> vector<8x1xf32>
    %122 = vector.broadcast %121 : vector<8x1xf32> to vector<8x8xf32>
    %123 = arith.mulf %118, %122 : vector<8x8xf32>
    %cst_39 = arith.constant dense<0.000000e+00> : vector<8x8xf32>
    %124 = tpu.matmul %123, %110, %cst_39 {dimension_numbers = #tpu.dot_dimension_numbers<[1], [0], [0], [1], [0, 0, 1, 1], [], []>} : vector<8x8xf32>, vector<8x8xf32>, vector<8x8xf32> -> vector<8x8xf32>
    %125 = vector.extract_strided_slice %86 {offsets = [0, 16], sizes = [8, 8], strides = [1, 1]} : vector<8x32xf32> to vector<8x8xf32>
    %126 = vector.extract_strided_slice %87 {offsets = [0, 16], sizes = [8, 8], strides = [1, 1]} : vector<8x32xf32> to vector<8x8xf32>
    %127 = vector.extract_strided_slice %88 {offsets = [0, 16], sizes = [8, 8], strides = [1, 1]} : vector<8x32xf32> to vector<8x8xf32>
    %128 = tpu.transpose %126, [1, 0] : vector<8x8xf32> -> vector<8x8xf32>
    %cst_40 = arith.constant dense<0.000000e+00> : vector<8x8xf32>
    %129 = tpu.matmul %125, %128, %cst_40 {dimension_numbers = #tpu.dot_dimension_numbers<[1], [0], [0], [1], [0, 0, 1, 1], [], []>} : vector<8x8xf32>, vector<8x8xf32>, vector<8x8xf32> -> vector<8x8xf32>
    %130 = arith.addf %129, %90 : vector<8x8xf32>
    %cst_41 = arith.constant dense<0xFF800000> : vector<8xf32>
    %131 = vector.multi_reduction <maximumf>, %130, %cst_41 [1] : vector<8x8xf32> to vector<8xf32>
    %132 = vector.shape_cast %131 : vector<8xf32> to vector<8x1xf32>
    %133 = vector.broadcast %132 : vector<8x1xf32> to vector<8x8xf32>
    %134 = arith.subf %130, %133 : vector<8x8xf32>
    %135 = math.exp %134 : vector<8x8xf32>
    %cst_42 = arith.constant dense<0.000000e+00> : vector<8xf32>
    %136 = vector.multi_reduction <add>, %135, %cst_42 [1] : vector<8x8xf32> to vector<8xf32>
    %137 = vector.shape_cast %136 : vector<8xf32> to vector<8x1xf32>
    %138 = tpu.reciprocal %137 {approx = true} : vector<8x1xf32> -> vector<8x1xf32>
    %139 = vector.broadcast %138 : vector<8x1xf32> to vector<8x8xf32>
    %140 = arith.mulf %135, %139 : vector<8x8xf32>
    %cst_43 = arith.constant dense<0.000000e+00> : vector<8x8xf32>
    %141 = tpu.matmul %140, %127, %cst_43 {dimension_numbers = #tpu.dot_dimension_numbers<[1], [0], [0], [1], [0, 0, 1, 1], [], []>} : vector<8x8xf32>, vector<8x8xf32>, vector<8x8xf32> -> vector<8x8xf32>
    %142 = vector.extract_strided_slice %86 {offsets = [0, 24], sizes = [8, 8], strides = [1, 1]} : vector<8x32xf32> to vector<8x8xf32>
    %143 = vector.extract_strided_slice %87 {offsets = [0, 24], sizes = [8, 8], strides = [1, 1]} : vector<8x32xf32> to vector<8x8xf32>
    %144 = vector.extract_strided_slice %88 {offsets = [0, 24], sizes = [8, 8], strides = [1, 1]} : vector<8x32xf32> to vector<8x8xf32>
    %145 = tpu.transpose %143, [1, 0] : vector<8x8xf32> -> vector<8x8xf32>
    %cst_44 = arith.constant dense<0.000000e+00> : vector<8x8xf32>
    %146 = tpu.matmul %142, %145, %cst_44 {dimension_numbers = #tpu.dot_dimension_numbers<[1], [0], [0], [1], [0, 0, 1, 1], [], []>} : vector<8x8xf32>, vector<8x8xf32>, vector<8x8xf32> -> vector<8x8xf32>
    %147 = arith.addf %146, %90 : vector<8x8xf32>
    %cst_45 = arith.constant dense<0xFF800000> : vector<8xf32>
    %148 = vector.multi_reduction <maximumf>, %147, %cst_45 [1] : vector<8x8xf32> to vector<8xf32>
    %149 = vector.shape_cast %148 : vector<8xf32> to vector<8x1xf32>
    %150 = vector.broadcast %149 : vector<8x1xf32> to vector<8x8xf32>
    %151 = arith.subf %147, %150 : vector<8x8xf32>
    %152 = math.exp %151 : vector<8x8xf32>
    %cst_46 = arith.constant dense<0.000000e+00> : vector<8xf32>
    %153 = vector.multi_reduction <add>, %152, %cst_46 [1] : vector<8x8xf32> to vector<8xf32>
    %154 = vector.shape_cast %153 : vector<8xf32> to vector<8x1xf32>
    %155 = tpu.reciprocal %154 {approx = true} : vector<8x1xf32> -> vector<8x1xf32>
    %156 = vector.broadcast %155 : vector<8x1xf32> to vector<8x8xf32>
    %157 = arith.mulf %152, %156 : vector<8x8xf32>
    %cst_47 = arith.constant dense<0.000000e+00> : vector<8x8xf32>
    %158 = tpu.matmul %157, %144, %cst_47 {dimension_numbers = #tpu.dot_dimension_numbers<[1], [0], [0], [1], [0, 0, 1, 1], [], []>} : vector<8x8xf32>, vector<8x8xf32>, vector<8x8xf32> -> vector<8x8xf32>
    %159 = tpu.concatenate %107, %124, %141, %158 in 1 : vector<8x8xf32>, vector<8x8xf32>, vector<8x8xf32>, vector<8x8xf32> -> vector<8x32xf32>
    %160 = tpu.concatenate %85, %159 in 0 : vector<8x32xf32>, vector<8x32xf32> -> vector<16x32xf32>
    %c0_48 = arith.constant 0 : index
    %c32 = arith.constant 32 : index
    %c0_49 = arith.constant 0 : index
    %161 = vector.load %arg6[%c0_48, %c32, %c0_49] : memref<2x272x128xf32, #tpu.memory_space<vmem>>, vector<1x32x32xf32>
    %162 = vector.shape_cast %161 : vector<1x32x32xf32> to vector<32x32xf32>
    %cst_50 = arith.constant dense<0.000000e+00> : vector<16x32xf32>
    %163 = tpu.matmul %160, %162, %cst_50 {dimension_numbers = #tpu.dot_dimension_numbers<[1], [0], [0], [1], [0, 0, 1, 1], [], []>} : vector<16x32xf32>, vector<32x32xf32>, vector<16x32xf32> -> vector<16x32xf32>
    %c0_51 = arith.constant 0 : index
    %c257 = arith.constant 257 : index
    %c0_52 = arith.constant 0 : index
    %164 = vector.load %arg6[%c0_51, %c257, %c0_52] : memref<2x272x128xf32, #tpu.memory_space<vmem>>, vector<1x1x32xf32>
    %165 = vector.shape_cast %164 : vector<1x1x32xf32> to vector<1x32xf32>
    %166 = vector.broadcast %165 : vector<1x32xf32> to vector<16x32xf32>
    %167 = arith.addf %163, %166 : vector<16x32xf32>
    %168 = arith.addf %0, %167 : vector<16x32xf32>
    %c0_53 = arith.constant 0 : index
    %c264 = arith.constant 264 : index
    %c0_54 = arith.constant 0 : index
    %169 = vector.load %arg6[%c0_53, %c264, %c0_54] : memref<2x272x128xf32, #tpu.memory_space<vmem>>, vector<1x1x32xf32>
    %170 = vector.shape_cast %169 : vector<1x1x32xf32> to vector<1x32xf32>
    %c0_55 = arith.constant 0 : index
    %c265 = arith.constant 265 : index
    %c0_56 = arith.constant 0 : index
    %171 = vector.load %arg6[%c0_55, %c265, %c0_56] : memref<2x272x128xf32, #tpu.memory_space<vmem>>, vector<1x1x32xf32>
    %172 = vector.shape_cast %171 : vector<1x1x32xf32> to vector<1x32xf32>
    %cst_57 = arith.constant dense<0.000000e+00> : vector<16xf32>
    %173 = vector.multi_reduction <add>, %168, %cst_57 [1] : vector<16x32xf32> to vector<16xf32>
    %174 = vector.shape_cast %173 : vector<16xf32> to vector<16x1xf32>
    %cst_58 = arith.constant 3.200000e+01 : f32
    %175 = vector.broadcast %cst_58 : f32 to vector<16x1xf32>
    %176 = arith.divf %174, %175 : vector<16x1xf32>
    %177 = arith.mulf %168, %168 : vector<16x32xf32>
    %cst_59 = arith.constant dense<0.000000e+00> : vector<16xf32>
    %178 = vector.multi_reduction <add>, %177, %cst_59 [1] : vector<16x32xf32> to vector<16xf32>
    %179 = vector.shape_cast %178 : vector<16xf32> to vector<16x1xf32>
    %cst_60 = arith.constant 3.200000e+01 : f32
    %180 = vector.broadcast %cst_60 : f32 to vector<16x1xf32>
    %181 = arith.divf %179, %180 : vector<16x1xf32>
    %182 = vector.broadcast %176 : vector<16x1xf32> to vector<16x32xf32>
    %183 = arith.subf %168, %182 : vector<16x32xf32>
    %184 = arith.mulf %176, %176 : vector<16x1xf32>
    %185 = arith.subf %181, %184 : vector<16x1xf32>
    %cst_61 = arith.constant 9.99999974E-6 : f32
    %186 = vector.broadcast %cst_61 : f32 to vector<16x1xf32>
    %187 = arith.addf %185, %186 : vector<16x1xf32>
    %188 = math.rsqrt %187 : vector<16x1xf32>
    %189 = vector.broadcast %188 : vector<16x1xf32> to vector<16x32xf32>
    %190 = arith.mulf %183, %189 : vector<16x32xf32>
    %191 = vector.broadcast %170 : vector<1x32xf32> to vector<16x32xf32>
    %192 = arith.mulf %190, %191 : vector<16x32xf32>
    %193 = vector.broadcast %172 : vector<1x32xf32> to vector<16x32xf32>
    %194 = arith.addf %192, %193 : vector<16x32xf32>
    %195 = vector.broadcast %1 : vector<16x1xf32> to vector<16x32xf32>
    %196 = arith.mulf %194, %195 : vector<16x32xf32>
    %c0_62 = arith.constant 0 : index
    %c64 = arith.constant 64 : index
    %c0_63 = arith.constant 0 : index
    %197 = vector.load %arg6[%c0_62, %c64, %c0_63] : memref<2x272x128xf32, #tpu.memory_space<vmem>>, vector<1x32x32xf32>
    %198 = vector.shape_cast %197 : vector<1x32x32xf32> to vector<32x32xf32>
    %cst_64 = arith.constant dense<0.000000e+00> : vector<16x32xf32>
    %199 = tpu.matmul %196, %198, %cst_64 {dimension_numbers = #tpu.dot_dimension_numbers<[1], [0], [0], [1], [0, 0, 1, 1], [], []>} : vector<16x32xf32>, vector<32x32xf32>, vector<16x32xf32> -> vector<16x32xf32>
    %c0_65 = arith.constant 0 : index
    %c258 = arith.constant 258 : index
    %c0_66 = arith.constant 0 : index
    %200 = vector.load %arg6[%c0_65, %c258, %c0_66] : memref<2x272x128xf32, #tpu.memory_space<vmem>>, vector<1x1x32xf32>
    %201 = vector.shape_cast %200 : vector<1x1x32xf32> to vector<1x32xf32>
    %202 = vector.broadcast %201 : vector<1x32xf32> to vector<16x32xf32>
    %203 = arith.addf %199, %202 : vector<16x32xf32>
    %c0_67 = arith.constant 0 : index
    %c96 = arith.constant 96 : index
    %c0_68 = arith.constant 0 : index
    %204 = vector.load %arg6[%c0_67, %c96, %c0_68] : memref<2x272x128xf32, #tpu.memory_space<vmem>>, vector<1x32x64xf32>
    %205 = vector.shape_cast %204 : vector<1x32x64xf32> to vector<32x64xf32>
    %cst_69 = arith.constant dense<0.000000e+00> : vector<32x64xf32>
    %206 = tpu.matmul %2, %205, %cst_69 {dimension_numbers = #tpu.dot_dimension_numbers<[1], [0], [0], [1], [0, 0, 1, 1], [], []>} : vector<32x32xf32>, vector<32x64xf32>, vector<32x64xf32> -> vector<32x64xf32>
    %c0_70 = arith.constant 0 : index
    %c259 = arith.constant 259 : index
    %c0_71 = arith.constant 0 : index
    %207 = vector.load %arg6[%c0_70, %c259, %c0_71] : memref<2x272x128xf32, #tpu.memory_space<vmem>>, vector<1x1x64xf32>
    %208 = vector.shape_cast %207 : vector<1x1x64xf32> to vector<1x64xf32>
    %209 = vector.broadcast %208 : vector<1x64xf32> to vector<32x64xf32>
    %210 = arith.addf %206, %209 : vector<32x64xf32>
    %211 = vector.extract_strided_slice %203 {offsets = [0, 0], sizes = [8, 32], strides = [1, 1]} : vector<16x32xf32> to vector<8x32xf32>
    %212 = vector.extract_strided_slice %210 {offsets = [0, 0], sizes = [16, 32], strides = [1, 1]} : vector<32x64xf32> to vector<16x32xf32>
    %213 = vector.extract_strided_slice %210 {offsets = [0, 32], sizes = [16, 32], strides = [1, 1]} : vector<32x64xf32> to vector<16x32xf32>
    %214 = vector.extract_strided_slice %4 {offsets = [0, 0, 0], sizes = [1, 1, 16], strides = [1, 1, 1]} : vector<2x1x16xf32> to vector<1x1x16xf32>
    %215 = vector.shape_cast %214 : vector<1x1x16xf32> to vector<1x16xf32>
    %216 = vector.extract_strided_slice %211 {offsets = [0, 0], sizes = [8, 8], strides = [1, 1]} : vector<8x32xf32> to vector<8x8xf32>
    %217 = vector.extract_strided_slice %212 {offsets = [0, 0], sizes = [16, 8], strides = [1, 1]} : vector<16x32xf32> to vector<16x8xf32>
    %218 = vector.extract_strided_slice %213 {offsets = [0, 0], sizes = [16, 8], strides = [1, 1]} : vector<16x32xf32> to vector<16x8xf32>
    %219 = tpu.transpose %217, [1, 0] : vector<16x8xf32> -> vector<8x16xf32>
    %cst_72 = arith.constant dense<0.000000e+00> : vector<8x16xf32>
    %220 = tpu.matmul %216, %219, %cst_72 {dimension_numbers = #tpu.dot_dimension_numbers<[1], [0], [0], [1], [0, 0, 1, 1], [], []>} : vector<8x8xf32>, vector<8x16xf32>, vector<8x16xf32> -> vector<8x16xf32>
    %221 = vector.broadcast %215 : vector<1x16xf32> to vector<8x16xf32>
    %222 = arith.addf %220, %221 : vector<8x16xf32>
    %cst_73 = arith.constant dense<0xFF800000> : vector<8xf32>
    %223 = vector.multi_reduction <maximumf>, %222, %cst_73 [1] : vector<8x16xf32> to vector<8xf32>
    %224 = vector.shape_cast %223 : vector<8xf32> to vector<8x1xf32>
    %225 = vector.broadcast %224 : vector<8x1xf32> to vector<8x16xf32>
    %226 = arith.subf %222, %225 : vector<8x16xf32>
    %227 = math.exp %226 : vector<8x16xf32>
    %cst_74 = arith.constant dense<0.000000e+00> : vector<8xf32>
    %228 = vector.multi_reduction <add>, %227, %cst_74 [1] : vector<8x16xf32> to vector<8xf32>
    %229 = vector.shape_cast %228 : vector<8xf32> to vector<8x1xf32>
    %230 = tpu.reciprocal %229 {approx = true} : vector<8x1xf32> -> vector<8x1xf32>
    %231 = vector.broadcast %230 : vector<8x1xf32> to vector<8x16xf32>
    %232 = arith.mulf %227, %231 : vector<8x16xf32>
    %cst_75 = arith.constant dense<0.000000e+00> : vector<8x8xf32>
    %233 = tpu.matmul %232, %218, %cst_75 {dimension_numbers = #tpu.dot_dimension_numbers<[1], [0], [0], [1], [0, 0, 1, 1], [], []>} : vector<8x16xf32>, vector<16x8xf32>, vector<8x8xf32> -> vector<8x8xf32>
    %234 = vector.extract_strided_slice %211 {offsets = [0, 8], sizes = [8, 8], strides = [1, 1]} : vector<8x32xf32> to vector<8x8xf32>
    %235 = vector.extract_strided_slice %212 {offsets = [0, 8], sizes = [16, 8], strides = [1, 1]} : vector<16x32xf32> to vector<16x8xf32>
    %236 = vector.extract_strided_slice %213 {offsets = [0, 8], sizes = [16, 8], strides = [1, 1]} : vector<16x32xf32> to vector<16x8xf32>
    %237 = tpu.transpose %235, [1, 0] : vector<16x8xf32> -> vector<8x16xf32>
    %cst_76 = arith.constant dense<0.000000e+00> : vector<8x16xf32>
    %238 = tpu.matmul %234, %237, %cst_76 {dimension_numbers = #tpu.dot_dimension_numbers<[1], [0], [0], [1], [0, 0, 1, 1], [], []>} : vector<8x8xf32>, vector<8x16xf32>, vector<8x16xf32> -> vector<8x16xf32>
    %239 = vector.broadcast %215 : vector<1x16xf32> to vector<8x16xf32>
    %240 = arith.addf %238, %239 : vector<8x16xf32>
    %cst_77 = arith.constant dense<0xFF800000> : vector<8xf32>
    %241 = vector.multi_reduction <maximumf>, %240, %cst_77 [1] : vector<8x16xf32> to vector<8xf32>
    %242 = vector.shape_cast %241 : vector<8xf32> to vector<8x1xf32>
    %243 = vector.broadcast %242 : vector<8x1xf32> to vector<8x16xf32>
    %244 = arith.subf %240, %243 : vector<8x16xf32>
    %245 = math.exp %244 : vector<8x16xf32>
    %cst_78 = arith.constant dense<0.000000e+00> : vector<8xf32>
    %246 = vector.multi_reduction <add>, %245, %cst_78 [1] : vector<8x16xf32> to vector<8xf32>
    %247 = vector.shape_cast %246 : vector<8xf32> to vector<8x1xf32>
    %248 = tpu.reciprocal %247 {approx = true} : vector<8x1xf32> -> vector<8x1xf32>
    %249 = vector.broadcast %248 : vector<8x1xf32> to vector<8x16xf32>
    %250 = arith.mulf %245, %249 : vector<8x16xf32>
    %cst_79 = arith.constant dense<0.000000e+00> : vector<8x8xf32>
    %251 = tpu.matmul %250, %236, %cst_79 {dimension_numbers = #tpu.dot_dimension_numbers<[1], [0], [0], [1], [0, 0, 1, 1], [], []>} : vector<8x16xf32>, vector<16x8xf32>, vector<8x8xf32> -> vector<8x8xf32>
    %252 = vector.extract_strided_slice %211 {offsets = [0, 16], sizes = [8, 8], strides = [1, 1]} : vector<8x32xf32> to vector<8x8xf32>
    %253 = vector.extract_strided_slice %212 {offsets = [0, 16], sizes = [16, 8], strides = [1, 1]} : vector<16x32xf32> to vector<16x8xf32>
    %254 = vector.extract_strided_slice %213 {offsets = [0, 16], sizes = [16, 8], strides = [1, 1]} : vector<16x32xf32> to vector<16x8xf32>
    %255 = tpu.transpose %253, [1, 0] : vector<16x8xf32> -> vector<8x16xf32>
    %cst_80 = arith.constant dense<0.000000e+00> : vector<8x16xf32>
    %256 = tpu.matmul %252, %255, %cst_80 {dimension_numbers = #tpu.dot_dimension_numbers<[1], [0], [0], [1], [0, 0, 1, 1], [], []>} : vector<8x8xf32>, vector<8x16xf32>, vector<8x16xf32> -> vector<8x16xf32>
    %257 = vector.broadcast %215 : vector<1x16xf32> to vector<8x16xf32>
    %258 = arith.addf %256, %257 : vector<8x16xf32>
    %cst_81 = arith.constant dense<0xFF800000> : vector<8xf32>
    %259 = vector.multi_reduction <maximumf>, %258, %cst_81 [1] : vector<8x16xf32> to vector<8xf32>
    %260 = vector.shape_cast %259 : vector<8xf32> to vector<8x1xf32>
    %261 = vector.broadcast %260 : vector<8x1xf32> to vector<8x16xf32>
    %262 = arith.subf %258, %261 : vector<8x16xf32>
    %263 = math.exp %262 : vector<8x16xf32>
    %cst_82 = arith.constant dense<0.000000e+00> : vector<8xf32>
    %264 = vector.multi_reduction <add>, %263, %cst_82 [1] : vector<8x16xf32> to vector<8xf32>
    %265 = vector.shape_cast %264 : vector<8xf32> to vector<8x1xf32>
    %266 = tpu.reciprocal %265 {approx = true} : vector<8x1xf32> -> vector<8x1xf32>
    %267 = vector.broadcast %266 : vector<8x1xf32> to vector<8x16xf32>
    %268 = arith.mulf %263, %267 : vector<8x16xf32>
    %cst_83 = arith.constant dense<0.000000e+00> : vector<8x8xf32>
    %269 = tpu.matmul %268, %254, %cst_83 {dimension_numbers = #tpu.dot_dimension_numbers<[1], [0], [0], [1], [0, 0, 1, 1], [], []>} : vector<8x16xf32>, vector<16x8xf32>, vector<8x8xf32> -> vector<8x8xf32>
    %270 = vector.extract_strided_slice %211 {offsets = [0, 24], sizes = [8, 8], strides = [1, 1]} : vector<8x32xf32> to vector<8x8xf32>
    %271 = vector.extract_strided_slice %212 {offsets = [0, 24], sizes = [16, 8], strides = [1, 1]} : vector<16x32xf32> to vector<16x8xf32>
    %272 = vector.extract_strided_slice %213 {offsets = [0, 24], sizes = [16, 8], strides = [1, 1]} : vector<16x32xf32> to vector<16x8xf32>
    %273 = tpu.transpose %271, [1, 0] : vector<16x8xf32> -> vector<8x16xf32>
    %cst_84 = arith.constant dense<0.000000e+00> : vector<8x16xf32>
    %274 = tpu.matmul %270, %273, %cst_84 {dimension_numbers = #tpu.dot_dimension_numbers<[1], [0], [0], [1], [0, 0, 1, 1], [], []>} : vector<8x8xf32>, vector<8x16xf32>, vector<8x16xf32> -> vector<8x16xf32>
    %275 = vector.broadcast %215 : vector<1x16xf32> to vector<8x16xf32>
    %276 = arith.addf %274, %275 : vector<8x16xf32>
    %cst_85 = arith.constant dense<0xFF800000> : vector<8xf32>
    %277 = vector.multi_reduction <maximumf>, %276, %cst_85 [1] : vector<8x16xf32> to vector<8xf32>
    %278 = vector.shape_cast %277 : vector<8xf32> to vector<8x1xf32>
    %279 = vector.broadcast %278 : vector<8x1xf32> to vector<8x16xf32>
    %280 = arith.subf %276, %279 : vector<8x16xf32>
    %281 = math.exp %280 : vector<8x16xf32>
    %cst_86 = arith.constant dense<0.000000e+00> : vector<8xf32>
    %282 = vector.multi_reduction <add>, %281, %cst_86 [1] : vector<8x16xf32> to vector<8xf32>
    %283 = vector.shape_cast %282 : vector<8xf32> to vector<8x1xf32>
    %284 = tpu.reciprocal %283 {approx = true} : vector<8x1xf32> -> vector<8x1xf32>
    %285 = vector.broadcast %284 : vector<8x1xf32> to vector<8x16xf32>
    %286 = arith.mulf %281, %285 : vector<8x16xf32>
    %cst_87 = arith.constant dense<0.000000e+00> : vector<8x8xf32>
    %287 = tpu.matmul %286, %272, %cst_87 {dimension_numbers = #tpu.dot_dimension_numbers<[1], [0], [0], [1], [0, 0, 1, 1], [], []>} : vector<8x16xf32>, vector<16x8xf32>, vector<8x8xf32> -> vector<8x8xf32>
    %288 = tpu.concatenate %233, %251, %269, %287 in 1 : vector<8x8xf32>, vector<8x8xf32>, vector<8x8xf32>, vector<8x8xf32> -> vector<8x32xf32>
    %289 = vector.extract_strided_slice %203 {offsets = [8, 0], sizes = [8, 32], strides = [1, 1]} : vector<16x32xf32> to vector<8x32xf32>
    %290 = vector.extract_strided_slice %210 {offsets = [16, 0], sizes = [16, 32], strides = [1, 1]} : vector<32x64xf32> to vector<16x32xf32>
    %291 = vector.extract_strided_slice %210 {offsets = [16, 32], sizes = [16, 32], strides = [1, 1]} : vector<32x64xf32> to vector<16x32xf32>
    %292 = vector.extract_strided_slice %4 {offsets = [1, 0, 0], sizes = [1, 1, 16], strides = [1, 1, 1]} : vector<2x1x16xf32> to vector<1x1x16xf32>
    %293 = vector.shape_cast %292 : vector<1x1x16xf32> to vector<1x16xf32>
    %294 = vector.extract_strided_slice %289 {offsets = [0, 0], sizes = [8, 8], strides = [1, 1]} : vector<8x32xf32> to vector<8x8xf32>
    %295 = vector.extract_strided_slice %290 {offsets = [0, 0], sizes = [16, 8], strides = [1, 1]} : vector<16x32xf32> to vector<16x8xf32>
    %296 = vector.extract_strided_slice %291 {offsets = [0, 0], sizes = [16, 8], strides = [1, 1]} : vector<16x32xf32> to vector<16x8xf32>
    %297 = tpu.transpose %295, [1, 0] : vector<16x8xf32> -> vector<8x16xf32>
    %cst_88 = arith.constant dense<0.000000e+00> : vector<8x16xf32>
    %298 = tpu.matmul %294, %297, %cst_88 {dimension_numbers = #tpu.dot_dimension_numbers<[1], [0], [0], [1], [0, 0, 1, 1], [], []>} : vector<8x8xf32>, vector<8x16xf32>, vector<8x16xf32> -> vector<8x16xf32>
    %299 = vector.broadcast %293 : vector<1x16xf32> to vector<8x16xf32>
    %300 = arith.addf %298, %299 : vector<8x16xf32>
    %cst_89 = arith.constant dense<0xFF800000> : vector<8xf32>
    %301 = vector.multi_reduction <maximumf>, %300, %cst_89 [1] : vector<8x16xf32> to vector<8xf32>
    %302 = vector.shape_cast %301 : vector<8xf32> to vector<8x1xf32>
    %303 = vector.broadcast %302 : vector<8x1xf32> to vector<8x16xf32>
    %304 = arith.subf %300, %303 : vector<8x16xf32>
    %305 = math.exp %304 : vector<8x16xf32>
    %cst_90 = arith.constant dense<0.000000e+00> : vector<8xf32>
    %306 = vector.multi_reduction <add>, %305, %cst_90 [1] : vector<8x16xf32> to vector<8xf32>
    %307 = vector.shape_cast %306 : vector<8xf32> to vector<8x1xf32>
    %308 = tpu.reciprocal %307 {approx = true} : vector<8x1xf32> -> vector<8x1xf32>
    %309 = vector.broadcast %308 : vector<8x1xf32> to vector<8x16xf32>
    %310 = arith.mulf %305, %309 : vector<8x16xf32>
    %cst_91 = arith.constant dense<0.000000e+00> : vector<8x8xf32>
    %311 = tpu.matmul %310, %296, %cst_91 {dimension_numbers = #tpu.dot_dimension_numbers<[1], [0], [0], [1], [0, 0, 1, 1], [], []>} : vector<8x16xf32>, vector<16x8xf32>, vector<8x8xf32> -> vector<8x8xf32>
    %312 = vector.extract_strided_slice %289 {offsets = [0, 8], sizes = [8, 8], strides = [1, 1]} : vector<8x32xf32> to vector<8x8xf32>
    %313 = vector.extract_strided_slice %290 {offsets = [0, 8], sizes = [16, 8], strides = [1, 1]} : vector<16x32xf32> to vector<16x8xf32>
    %314 = vector.extract_strided_slice %291 {offsets = [0, 8], sizes = [16, 8], strides = [1, 1]} : vector<16x32xf32> to vector<16x8xf32>
    %315 = tpu.transpose %313, [1, 0] : vector<16x8xf32> -> vector<8x16xf32>
    %cst_92 = arith.constant dense<0.000000e+00> : vector<8x16xf32>
    %316 = tpu.matmul %312, %315, %cst_92 {dimension_numbers = #tpu.dot_dimension_numbers<[1], [0], [0], [1], [0, 0, 1, 1], [], []>} : vector<8x8xf32>, vector<8x16xf32>, vector<8x16xf32> -> vector<8x16xf32>
    %317 = vector.broadcast %293 : vector<1x16xf32> to vector<8x16xf32>
    %318 = arith.addf %316, %317 : vector<8x16xf32>
    %cst_93 = arith.constant dense<0xFF800000> : vector<8xf32>
    %319 = vector.multi_reduction <maximumf>, %318, %cst_93 [1] : vector<8x16xf32> to vector<8xf32>
    %320 = vector.shape_cast %319 : vector<8xf32> to vector<8x1xf32>
    %321 = vector.broadcast %320 : vector<8x1xf32> to vector<8x16xf32>
    %322 = arith.subf %318, %321 : vector<8x16xf32>
    %323 = math.exp %322 : vector<8x16xf32>
    %cst_94 = arith.constant dense<0.000000e+00> : vector<8xf32>
    %324 = vector.multi_reduction <add>, %323, %cst_94 [1] : vector<8x16xf32> to vector<8xf32>
    %325 = vector.shape_cast %324 : vector<8xf32> to vector<8x1xf32>
    %326 = tpu.reciprocal %325 {approx = true} : vector<8x1xf32> -> vector<8x1xf32>
    %327 = vector.broadcast %326 : vector<8x1xf32> to vector<8x16xf32>
    %328 = arith.mulf %323, %327 : vector<8x16xf32>
    %cst_95 = arith.constant dense<0.000000e+00> : vector<8x8xf32>
    %329 = tpu.matmul %328, %314, %cst_95 {dimension_numbers = #tpu.dot_dimension_numbers<[1], [0], [0], [1], [0, 0, 1, 1], [], []>} : vector<8x16xf32>, vector<16x8xf32>, vector<8x8xf32> -> vector<8x8xf32>
    %330 = vector.extract_strided_slice %289 {offsets = [0, 16], sizes = [8, 8], strides = [1, 1]} : vector<8x32xf32> to vector<8x8xf32>
    %331 = vector.extract_strided_slice %290 {offsets = [0, 16], sizes = [16, 8], strides = [1, 1]} : vector<16x32xf32> to vector<16x8xf32>
    %332 = vector.extract_strided_slice %291 {offsets = [0, 16], sizes = [16, 8], strides = [1, 1]} : vector<16x32xf32> to vector<16x8xf32>
    %333 = tpu.transpose %331, [1, 0] : vector<16x8xf32> -> vector<8x16xf32>
    %cst_96 = arith.constant dense<0.000000e+00> : vector<8x16xf32>
    %334 = tpu.matmul %330, %333, %cst_96 {dimension_numbers = #tpu.dot_dimension_numbers<[1], [0], [0], [1], [0, 0, 1, 1], [], []>} : vector<8x8xf32>, vector<8x16xf32>, vector<8x16xf32> -> vector<8x16xf32>
    %335 = vector.broadcast %293 : vector<1x16xf32> to vector<8x16xf32>
    %336 = arith.addf %334, %335 : vector<8x16xf32>
    %cst_97 = arith.constant dense<0xFF800000> : vector<8xf32>
    %337 = vector.multi_reduction <maximumf>, %336, %cst_97 [1] : vector<8x16xf32> to vector<8xf32>
    %338 = vector.shape_cast %337 : vector<8xf32> to vector<8x1xf32>
    %339 = vector.broadcast %338 : vector<8x1xf32> to vector<8x16xf32>
    %340 = arith.subf %336, %339 : vector<8x16xf32>
    %341 = math.exp %340 : vector<8x16xf32>
    %cst_98 = arith.constant dense<0.000000e+00> : vector<8xf32>
    %342 = vector.multi_reduction <add>, %341, %cst_98 [1] : vector<8x16xf32> to vector<8xf32>
    %343 = vector.shape_cast %342 : vector<8xf32> to vector<8x1xf32>
    %344 = tpu.reciprocal %343 {approx = true} : vector<8x1xf32> -> vector<8x1xf32>
    %345 = vector.broadcast %344 : vector<8x1xf32> to vector<8x16xf32>
    %346 = arith.mulf %341, %345 : vector<8x16xf32>
    %cst_99 = arith.constant dense<0.000000e+00> : vector<8x8xf32>
    %347 = tpu.matmul %346, %332, %cst_99 {dimension_numbers = #tpu.dot_dimension_numbers<[1], [0], [0], [1], [0, 0, 1, 1], [], []>} : vector<8x16xf32>, vector<16x8xf32>, vector<8x8xf32> -> vector<8x8xf32>
    %348 = vector.extract_strided_slice %289 {offsets = [0, 24], sizes = [8, 8], strides = [1, 1]} : vector<8x32xf32> to vector<8x8xf32>
    %349 = vector.extract_strided_slice %290 {offsets = [0, 24], sizes = [16, 8], strides = [1, 1]} : vector<16x32xf32> to vector<16x8xf32>
    %350 = vector.extract_strided_slice %291 {offsets = [0, 24], sizes = [16, 8], strides = [1, 1]} : vector<16x32xf32> to vector<16x8xf32>
    %351 = tpu.transpose %349, [1, 0] : vector<16x8xf32> -> vector<8x16xf32>
    %cst_100 = arith.constant dense<0.000000e+00> : vector<8x16xf32>
    %352 = tpu.matmul %348, %351, %cst_100 {dimension_numbers = #tpu.dot_dimension_numbers<[1], [0], [0], [1], [0, 0, 1, 1], [], []>} : vector<8x8xf32>, vector<8x16xf32>, vector<8x16xf32> -> vector<8x16xf32>
    %353 = vector.broadcast %293 : vector<1x16xf32> to vector<8x16xf32>
    %354 = arith.addf %352, %353 : vector<8x16xf32>
    %cst_101 = arith.constant dense<0xFF800000> : vector<8xf32>
    %355 = vector.multi_reduction <maximumf>, %354, %cst_101 [1] : vector<8x16xf32> to vector<8xf32>
    %356 = vector.shape_cast %355 : vector<8xf32> to vector<8x1xf32>
    %357 = vector.broadcast %356 : vector<8x1xf32> to vector<8x16xf32>
    %358 = arith.subf %354, %357 : vector<8x16xf32>
    %359 = math.exp %358 : vector<8x16xf32>
    %cst_102 = arith.constant dense<0.000000e+00> : vector<8xf32>
    %360 = vector.multi_reduction <add>, %359, %cst_102 [1] : vector<8x16xf32> to vector<8xf32>
    %361 = vector.shape_cast %360 : vector<8xf32> to vector<8x1xf32>
    %362 = tpu.reciprocal %361 {approx = true} : vector<8x1xf32> -> vector<8x1xf32>
    %363 = vector.broadcast %362 : vector<8x1xf32> to vector<8x16xf32>
    %364 = arith.mulf %359, %363 : vector<8x16xf32>
    %cst_103 = arith.constant dense<0.000000e+00> : vector<8x8xf32>
    %365 = tpu.matmul %364, %350, %cst_103 {dimension_numbers = #tpu.dot_dimension_numbers<[1], [0], [0], [1], [0, 0, 1, 1], [], []>} : vector<8x16xf32>, vector<16x8xf32>, vector<8x8xf32> -> vector<8x8xf32>
    %366 = tpu.concatenate %311, %329, %347, %365 in 1 : vector<8x8xf32>, vector<8x8xf32>, vector<8x8xf32>, vector<8x8xf32> -> vector<8x32xf32>
    %367 = tpu.concatenate %288, %366 in 0 : vector<8x32xf32>, vector<8x32xf32> -> vector<16x32xf32>
    %c0_104 = arith.constant 0 : index
    %c128 = arith.constant 128 : index
    %c0_105 = arith.constant 0 : index
    %368 = vector.load %arg6[%c0_104, %c128, %c0_105] : memref<2x272x128xf32, #tpu.memory_space<vmem>>, vector<1x32x32xf32>
    %369 = vector.shape_cast %368 : vector<1x32x32xf32> to vector<32x32xf32>
    %cst_106 = arith.constant dense<0.000000e+00> : vector<16x32xf32>
    %370 = tpu.matmul %367, %369, %cst_106 {dimension_numbers = #tpu.dot_dimension_numbers<[1], [0], [0], [1], [0, 0, 1, 1], [], []>} : vector<16x32xf32>, vector<32x32xf32>, vector<16x32xf32> -> vector<16x32xf32>
    %c0_107 = arith.constant 0 : index
    %c260 = arith.constant 260 : index
    %c0_108 = arith.constant 0 : index
    %371 = vector.load %arg6[%c0_107, %c260, %c0_108] : memref<2x272x128xf32, #tpu.memory_space<vmem>>, vector<1x1x32xf32>
    %372 = vector.shape_cast %371 : vector<1x1x32xf32> to vector<1x32xf32>
    %373 = vector.broadcast %372 : vector<1x32xf32> to vector<16x32xf32>
    %374 = arith.addf %370, %373 : vector<16x32xf32>
    %375 = arith.addf %196, %374 : vector<16x32xf32>
    %c0_109 = arith.constant 0 : index
    %c266 = arith.constant 266 : index
    %c0_110 = arith.constant 0 : index
    %376 = vector.load %arg6[%c0_109, %c266, %c0_110] : memref<2x272x128xf32, #tpu.memory_space<vmem>>, vector<1x1x32xf32>
    %377 = vector.shape_cast %376 : vector<1x1x32xf32> to vector<1x32xf32>
    %c0_111 = arith.constant 0 : index
    %c267 = arith.constant 267 : index
    %c0_112 = arith.constant 0 : index
    %378 = vector.load %arg6[%c0_111, %c267, %c0_112] : memref<2x272x128xf32, #tpu.memory_space<vmem>>, vector<1x1x32xf32>
    %379 = vector.shape_cast %378 : vector<1x1x32xf32> to vector<1x32xf32>
    %cst_113 = arith.constant dense<0.000000e+00> : vector<16xf32>
    %380 = vector.multi_reduction <add>, %375, %cst_113 [1] : vector<16x32xf32> to vector<16xf32>
    %381 = vector.shape_cast %380 : vector<16xf32> to vector<16x1xf32>
    %cst_114 = arith.constant 3.200000e+01 : f32
    %382 = vector.broadcast %cst_114 : f32 to vector<16x1xf32>
    %383 = arith.divf %381, %382 : vector<16x1xf32>
    %384 = arith.mulf %375, %375 : vector<16x32xf32>
    %cst_115 = arith.constant dense<0.000000e+00> : vector<16xf32>
    %385 = vector.multi_reduction <add>, %384, %cst_115 [1] : vector<16x32xf32> to vector<16xf32>
    %386 = vector.shape_cast %385 : vector<16xf32> to vector<16x1xf32>
    %cst_116 = arith.constant 3.200000e+01 : f32
    %387 = vector.broadcast %cst_116 : f32 to vector<16x1xf32>
    %388 = arith.divf %386, %387 : vector<16x1xf32>
    %389 = vector.broadcast %383 : vector<16x1xf32> to vector<16x32xf32>
    %390 = arith.subf %375, %389 : vector<16x32xf32>
    %391 = arith.mulf %383, %383 : vector<16x1xf32>
    %392 = arith.subf %388, %391 : vector<16x1xf32>
    %cst_117 = arith.constant 9.99999974E-6 : f32
    %393 = vector.broadcast %cst_117 : f32 to vector<16x1xf32>
    %394 = arith.addf %392, %393 : vector<16x1xf32>
    %395 = math.rsqrt %394 : vector<16x1xf32>
    %396 = vector.broadcast %395 : vector<16x1xf32> to vector<16x32xf32>
    %397 = arith.mulf %390, %396 : vector<16x32xf32>
    %398 = vector.broadcast %377 : vector<1x32xf32> to vector<16x32xf32>
    %399 = arith.mulf %397, %398 : vector<16x32xf32>
    %400 = vector.broadcast %379 : vector<1x32xf32> to vector<16x32xf32>
    %401 = arith.addf %399, %400 : vector<16x32xf32>
    %402 = vector.broadcast %1 : vector<16x1xf32> to vector<16x32xf32>
    %403 = arith.mulf %401, %402 : vector<16x32xf32>
    %c0_118 = arith.constant 0 : index
    %c160 = arith.constant 160 : index
    %c0_119 = arith.constant 0 : index
    %404 = vector.load %arg6[%c0_118, %c160, %c0_119] : memref<2x272x128xf32, #tpu.memory_space<vmem>>, vector<1x32x64xf32>
    %405 = vector.shape_cast %404 : vector<1x32x64xf32> to vector<32x64xf32>
    %cst_120 = arith.constant dense<0.000000e+00> : vector<16x64xf32>
    %406 = tpu.matmul %403, %405, %cst_120 {dimension_numbers = #tpu.dot_dimension_numbers<[1], [0], [0], [1], [0, 0, 1, 1], [], []>} : vector<16x32xf32>, vector<32x64xf32>, vector<16x64xf32> -> vector<16x64xf32>
    %c0_121 = arith.constant 0 : index
    %c261 = arith.constant 261 : index
    %c0_122 = arith.constant 0 : index
    %407 = vector.load %arg6[%c0_121, %c261, %c0_122] : memref<2x272x128xf32, #tpu.memory_space<vmem>>, vector<1x1x64xf32>
    %408 = vector.shape_cast %407 : vector<1x1x64xf32> to vector<1x64xf32>
    %409 = vector.broadcast %408 : vector<1x64xf32> to vector<16x64xf32>
    %410 = arith.addf %406, %409 : vector<16x64xf32>
    %cst_123 = arith.constant 0.000000e+00 : f32
    %411 = vector.broadcast %cst_123 : f32 to vector<16x64xf32>
    %412 = arith.maximumf %410, %411 : vector<16x64xf32>
    %c0_124 = arith.constant 0 : index
    %c192 = arith.constant 192 : index
    %c0_125 = arith.constant 0 : index
    %413 = vector.load %arg6[%c0_124, %c192, %c0_125] : memref<2x272x128xf32, #tpu.memory_space<vmem>>, vector<1x64x32xf32>
    %414 = vector.shape_cast %413 : vector<1x64x32xf32> to vector<64x32xf32>
    %cst_126 = arith.constant dense<0.000000e+00> : vector<16x32xf32>
    %415 = tpu.matmul %412, %414, %cst_126 {dimension_numbers = #tpu.dot_dimension_numbers<[1], [0], [0], [1], [0, 0, 1, 1], [], []>} : vector<16x64xf32>, vector<64x32xf32>, vector<16x32xf32> -> vector<16x32xf32>
    %c0_127 = arith.constant 0 : index
    %c262 = arith.constant 262 : index
    %c0_128 = arith.constant 0 : index
    %416 = vector.load %arg6[%c0_127, %c262, %c0_128] : memref<2x272x128xf32, #tpu.memory_space<vmem>>, vector<1x1x32xf32>
    %417 = vector.shape_cast %416 : vector<1x1x32xf32> to vector<1x32xf32>
    %418 = vector.broadcast %417 : vector<1x32xf32> to vector<16x32xf32>
    %419 = arith.addf %415, %418 : vector<16x32xf32>
    %420 = arith.addf %403, %419 : vector<16x32xf32>
    %c0_129 = arith.constant 0 : index
    %c268 = arith.constant 268 : index
    %c0_130 = arith.constant 0 : index
    %421 = vector.load %arg6[%c0_129, %c268, %c0_130] : memref<2x272x128xf32, #tpu.memory_space<vmem>>, vector<1x1x32xf32>
    %422 = vector.shape_cast %421 : vector<1x1x32xf32> to vector<1x32xf32>
    %c0_131 = arith.constant 0 : index
    %c269 = arith.constant 269 : index
    %c0_132 = arith.constant 0 : index
    %423 = vector.load %arg6[%c0_131, %c269, %c0_132] : memref<2x272x128xf32, #tpu.memory_space<vmem>>, vector<1x1x32xf32>
    %424 = vector.shape_cast %423 : vector<1x1x32xf32> to vector<1x32xf32>
    %cst_133 = arith.constant dense<0.000000e+00> : vector<16xf32>
    %425 = vector.multi_reduction <add>, %420, %cst_133 [1] : vector<16x32xf32> to vector<16xf32>
    %426 = vector.shape_cast %425 : vector<16xf32> to vector<16x1xf32>
    %cst_134 = arith.constant 3.200000e+01 : f32
    %427 = vector.broadcast %cst_134 : f32 to vector<16x1xf32>
    %428 = arith.divf %426, %427 : vector<16x1xf32>
    %429 = arith.mulf %420, %420 : vector<16x32xf32>
    %cst_135 = arith.constant dense<0.000000e+00> : vector<16xf32>
    %430 = vector.multi_reduction <add>, %429, %cst_135 [1] : vector<16x32xf32> to vector<16xf32>
    %431 = vector.shape_cast %430 : vector<16xf32> to vector<16x1xf32>
    %cst_136 = arith.constant 3.200000e+01 : f32
    %432 = vector.broadcast %cst_136 : f32 to vector<16x1xf32>
    %433 = arith.divf %431, %432 : vector<16x1xf32>
    %434 = vector.broadcast %428 : vector<16x1xf32> to vector<16x32xf32>
    %435 = arith.subf %420, %434 : vector<16x32xf32>
    %436 = arith.mulf %428, %428 : vector<16x1xf32>
    %437 = arith.subf %433, %436 : vector<16x1xf32>
    %cst_137 = arith.constant 9.99999974E-6 : f32
    %438 = vector.broadcast %cst_137 : f32 to vector<16x1xf32>
    %439 = arith.addf %437, %438 : vector<16x1xf32>
    %440 = math.rsqrt %439 : vector<16x1xf32>
    %441 = vector.broadcast %440 : vector<16x1xf32> to vector<16x32xf32>
    %442 = arith.mulf %435, %441 : vector<16x32xf32>
    %443 = vector.broadcast %422 : vector<1x32xf32> to vector<16x32xf32>
    %444 = arith.mulf %442, %443 : vector<16x32xf32>
    %445 = vector.broadcast %424 : vector<1x32xf32> to vector<16x32xf32>
    %446 = arith.addf %444, %445 : vector<16x32xf32>
    %447 = vector.broadcast %1 : vector<16x1xf32> to vector<16x32xf32>
    %448 = arith.mulf %446, %447 : vector<16x32xf32>
    %c1 = arith.constant 1 : index
    %c0_138 = arith.constant 0 : index
    %c0_139 = arith.constant 0 : index
    %449 = vector.load %arg6[%c1, %c0_138, %c0_139] : memref<2x272x128xf32, #tpu.memory_space<vmem>>, vector<1x32x96xf32>
    %450 = vector.shape_cast %449 : vector<1x32x96xf32> to vector<32x96xf32>
    %cst_140 = arith.constant dense<0.000000e+00> : vector<16x96xf32>
    %451 = tpu.matmul %448, %450, %cst_140 {dimension_numbers = #tpu.dot_dimension_numbers<[1], [0], [0], [1], [0, 0, 1, 1], [], []>} : vector<16x32xf32>, vector<32x96xf32>, vector<16x96xf32> -> vector<16x96xf32>
    %c1_141 = arith.constant 1 : index
    %c256_142 = arith.constant 256 : index
    %c0_143 = arith.constant 0 : index
    %452 = vector.load %arg6[%c1_141, %c256_142, %c0_143] : memref<2x272x128xf32, #tpu.memory_space<vmem>>, vector<1x1x96xf32>
    %453 = vector.shape_cast %452 : vector<1x1x96xf32> to vector<1x96xf32>
    %454 = vector.broadcast %453 : vector<1x96xf32> to vector<16x96xf32>
    %455 = arith.addf %451, %454 : vector<16x96xf32>
    %456 = vector.extract_strided_slice %455 {offsets = [0, 0], sizes = [8, 32], strides = [1, 1]} : vector<16x96xf32> to vector<8x32xf32>
    %457 = vector.extract_strided_slice %455 {offsets = [0, 32], sizes = [8, 32], strides = [1, 1]} : vector<16x96xf32> to vector<8x32xf32>
    %458 = vector.extract_strided_slice %455 {offsets = [0, 64], sizes = [8, 32], strides = [1, 1]} : vector<16x96xf32> to vector<8x32xf32>
    %459 = vector.extract_strided_slice %3 {offsets = [0, 0, 0], sizes = [1, 8, 8], strides = [1, 1, 1]} : vector<2x8x8xf32> to vector<1x8x8xf32>
    %460 = vector.shape_cast %459 : vector<1x8x8xf32> to vector<8x8xf32>
    %461 = vector.extract_strided_slice %456 {offsets = [0, 0], sizes = [8, 8], strides = [1, 1]} : vector<8x32xf32> to vector<8x8xf32>
    %462 = vector.extract_strided_slice %457 {offsets = [0, 0], sizes = [8, 8], strides = [1, 1]} : vector<8x32xf32> to vector<8x8xf32>
    %463 = vector.extract_strided_slice %458 {offsets = [0, 0], sizes = [8, 8], strides = [1, 1]} : vector<8x32xf32> to vector<8x8xf32>
    %464 = tpu.transpose %462, [1, 0] : vector<8x8xf32> -> vector<8x8xf32>
    %cst_144 = arith.constant dense<0.000000e+00> : vector<8x8xf32>
    %465 = tpu.matmul %461, %464, %cst_144 {dimension_numbers = #tpu.dot_dimension_numbers<[1], [0], [0], [1], [0, 0, 1, 1], [], []>} : vector<8x8xf32>, vector<8x8xf32>, vector<8x8xf32> -> vector<8x8xf32>
    %466 = arith.addf %465, %460 : vector<8x8xf32>
    %cst_145 = arith.constant dense<0xFF800000> : vector<8xf32>
    %467 = vector.multi_reduction <maximumf>, %466, %cst_145 [1] : vector<8x8xf32> to vector<8xf32>
    %468 = vector.shape_cast %467 : vector<8xf32> to vector<8x1xf32>
    %469 = vector.broadcast %468 : vector<8x1xf32> to vector<8x8xf32>
    %470 = arith.subf %466, %469 : vector<8x8xf32>
    %471 = math.exp %470 : vector<8x8xf32>
    %cst_146 = arith.constant dense<0.000000e+00> : vector<8xf32>
    %472 = vector.multi_reduction <add>, %471, %cst_146 [1] : vector<8x8xf32> to vector<8xf32>
    %473 = vector.shape_cast %472 : vector<8xf32> to vector<8x1xf32>
    %474 = tpu.reciprocal %473 {approx = true} : vector<8x1xf32> -> vector<8x1xf32>
    %475 = vector.broadcast %474 : vector<8x1xf32> to vector<8x8xf32>
    %476 = arith.mulf %471, %475 : vector<8x8xf32>
    %cst_147 = arith.constant dense<0.000000e+00> : vector<8x8xf32>
    %477 = tpu.matmul %476, %463, %cst_147 {dimension_numbers = #tpu.dot_dimension_numbers<[1], [0], [0], [1], [0, 0, 1, 1], [], []>} : vector<8x8xf32>, vector<8x8xf32>, vector<8x8xf32> -> vector<8x8xf32>
    %478 = vector.extract_strided_slice %456 {offsets = [0, 8], sizes = [8, 8], strides = [1, 1]} : vector<8x32xf32> to vector<8x8xf32>
    %479 = vector.extract_strided_slice %457 {offsets = [0, 8], sizes = [8, 8], strides = [1, 1]} : vector<8x32xf32> to vector<8x8xf32>
    %480 = vector.extract_strided_slice %458 {offsets = [0, 8], sizes = [8, 8], strides = [1, 1]} : vector<8x32xf32> to vector<8x8xf32>
    %481 = tpu.transpose %479, [1, 0] : vector<8x8xf32> -> vector<8x8xf32>
    %cst_148 = arith.constant dense<0.000000e+00> : vector<8x8xf32>
    %482 = tpu.matmul %478, %481, %cst_148 {dimension_numbers = #tpu.dot_dimension_numbers<[1], [0], [0], [1], [0, 0, 1, 1], [], []>} : vector<8x8xf32>, vector<8x8xf32>, vector<8x8xf32> -> vector<8x8xf32>
    %483 = arith.addf %482, %460 : vector<8x8xf32>
    %cst_149 = arith.constant dense<0xFF800000> : vector<8xf32>
    %484 = vector.multi_reduction <maximumf>, %483, %cst_149 [1] : vector<8x8xf32> to vector<8xf32>
    %485 = vector.shape_cast %484 : vector<8xf32> to vector<8x1xf32>
    %486 = vector.broadcast %485 : vector<8x1xf32> to vector<8x8xf32>
    %487 = arith.subf %483, %486 : vector<8x8xf32>
    %488 = math.exp %487 : vector<8x8xf32>
    %cst_150 = arith.constant dense<0.000000e+00> : vector<8xf32>
    %489 = vector.multi_reduction <add>, %488, %cst_150 [1] : vector<8x8xf32> to vector<8xf32>
    %490 = vector.shape_cast %489 : vector<8xf32> to vector<8x1xf32>
    %491 = tpu.reciprocal %490 {approx = true} : vector<8x1xf32> -> vector<8x1xf32>
    %492 = vector.broadcast %491 : vector<8x1xf32> to vector<8x8xf32>
    %493 = arith.mulf %488, %492 : vector<8x8xf32>
    %cst_151 = arith.constant dense<0.000000e+00> : vector<8x8xf32>
    %494 = tpu.matmul %493, %480, %cst_151 {dimension_numbers = #tpu.dot_dimension_numbers<[1], [0], [0], [1], [0, 0, 1, 1], [], []>} : vector<8x8xf32>, vector<8x8xf32>, vector<8x8xf32> -> vector<8x8xf32>
    %495 = vector.extract_strided_slice %456 {offsets = [0, 16], sizes = [8, 8], strides = [1, 1]} : vector<8x32xf32> to vector<8x8xf32>
    %496 = vector.extract_strided_slice %457 {offsets = [0, 16], sizes = [8, 8], strides = [1, 1]} : vector<8x32xf32> to vector<8x8xf32>
    %497 = vector.extract_strided_slice %458 {offsets = [0, 16], sizes = [8, 8], strides = [1, 1]} : vector<8x32xf32> to vector<8x8xf32>
    %498 = tpu.transpose %496, [1, 0] : vector<8x8xf32> -> vector<8x8xf32>
    %cst_152 = arith.constant dense<0.000000e+00> : vector<8x8xf32>
    %499 = tpu.matmul %495, %498, %cst_152 {dimension_numbers = #tpu.dot_dimension_numbers<[1], [0], [0], [1], [0, 0, 1, 1], [], []>} : vector<8x8xf32>, vector<8x8xf32>, vector<8x8xf32> -> vector<8x8xf32>
    %500 = arith.addf %499, %460 : vector<8x8xf32>
    %cst_153 = arith.constant dense<0xFF800000> : vector<8xf32>
    %501 = vector.multi_reduction <maximumf>, %500, %cst_153 [1] : vector<8x8xf32> to vector<8xf32>
    %502 = vector.shape_cast %501 : vector<8xf32> to vector<8x1xf32>
    %503 = vector.broadcast %502 : vector<8x1xf32> to vector<8x8xf32>
    %504 = arith.subf %500, %503 : vector<8x8xf32>
    %505 = math.exp %504 : vector<8x8xf32>
    %cst_154 = arith.constant dense<0.000000e+00> : vector<8xf32>
    %506 = vector.multi_reduction <add>, %505, %cst_154 [1] : vector<8x8xf32> to vector<8xf32>
    %507 = vector.shape_cast %506 : vector<8xf32> to vector<8x1xf32>
    %508 = tpu.reciprocal %507 {approx = true} : vector<8x1xf32> -> vector<8x1xf32>
    %509 = vector.broadcast %508 : vector<8x1xf32> to vector<8x8xf32>
    %510 = arith.mulf %505, %509 : vector<8x8xf32>
    %cst_155 = arith.constant dense<0.000000e+00> : vector<8x8xf32>
    %511 = tpu.matmul %510, %497, %cst_155 {dimension_numbers = #tpu.dot_dimension_numbers<[1], [0], [0], [1], [0, 0, 1, 1], [], []>} : vector<8x8xf32>, vector<8x8xf32>, vector<8x8xf32> -> vector<8x8xf32>
    %512 = vector.extract_strided_slice %456 {offsets = [0, 24], sizes = [8, 8], strides = [1, 1]} : vector<8x32xf32> to vector<8x8xf32>
    %513 = vector.extract_strided_slice %457 {offsets = [0, 24], sizes = [8, 8], strides = [1, 1]} : vector<8x32xf32> to vector<8x8xf32>
    %514 = vector.extract_strided_slice %458 {offsets = [0, 24], sizes = [8, 8], strides = [1, 1]} : vector<8x32xf32> to vector<8x8xf32>
    %515 = tpu.transpose %513, [1, 0] : vector<8x8xf32> -> vector<8x8xf32>
    %cst_156 = arith.constant dense<0.000000e+00> : vector<8x8xf32>
    %516 = tpu.matmul %512, %515, %cst_156 {dimension_numbers = #tpu.dot_dimension_numbers<[1], [0], [0], [1], [0, 0, 1, 1], [], []>} : vector<8x8xf32>, vector<8x8xf32>, vector<8x8xf32> -> vector<8x8xf32>
    %517 = arith.addf %516, %460 : vector<8x8xf32>
    %cst_157 = arith.constant dense<0xFF800000> : vector<8xf32>
    %518 = vector.multi_reduction <maximumf>, %517, %cst_157 [1] : vector<8x8xf32> to vector<8xf32>
    %519 = vector.shape_cast %518 : vector<8xf32> to vector<8x1xf32>
    %520 = vector.broadcast %519 : vector<8x1xf32> to vector<8x8xf32>
    %521 = arith.subf %517, %520 : vector<8x8xf32>
    %522 = math.exp %521 : vector<8x8xf32>
    %cst_158 = arith.constant dense<0.000000e+00> : vector<8xf32>
    %523 = vector.multi_reduction <add>, %522, %cst_158 [1] : vector<8x8xf32> to vector<8xf32>
    %524 = vector.shape_cast %523 : vector<8xf32> to vector<8x1xf32>
    %525 = tpu.reciprocal %524 {approx = true} : vector<8x1xf32> -> vector<8x1xf32>
    %526 = vector.broadcast %525 : vector<8x1xf32> to vector<8x8xf32>
    %527 = arith.mulf %522, %526 : vector<8x8xf32>
    %cst_159 = arith.constant dense<0.000000e+00> : vector<8x8xf32>
    %528 = tpu.matmul %527, %514, %cst_159 {dimension_numbers = #tpu.dot_dimension_numbers<[1], [0], [0], [1], [0, 0, 1, 1], [], []>} : vector<8x8xf32>, vector<8x8xf32>, vector<8x8xf32> -> vector<8x8xf32>
    %529 = tpu.concatenate %477, %494, %511, %528 in 1 : vector<8x8xf32>, vector<8x8xf32>, vector<8x8xf32>, vector<8x8xf32> -> vector<8x32xf32>
    %530 = vector.extract_strided_slice %455 {offsets = [8, 0], sizes = [8, 32], strides = [1, 1]} : vector<16x96xf32> to vector<8x32xf32>
    %531 = vector.extract_strided_slice %455 {offsets = [8, 32], sizes = [8, 32], strides = [1, 1]} : vector<16x96xf32> to vector<8x32xf32>
    %532 = vector.extract_strided_slice %455 {offsets = [8, 64], sizes = [8, 32], strides = [1, 1]} : vector<16x96xf32> to vector<8x32xf32>
    %533 = vector.extract_strided_slice %3 {offsets = [1, 0, 0], sizes = [1, 8, 8], strides = [1, 1, 1]} : vector<2x8x8xf32> to vector<1x8x8xf32>
    %534 = vector.shape_cast %533 : vector<1x8x8xf32> to vector<8x8xf32>
    %535 = vector.extract_strided_slice %530 {offsets = [0, 0], sizes = [8, 8], strides = [1, 1]} : vector<8x32xf32> to vector<8x8xf32>
    %536 = vector.extract_strided_slice %531 {offsets = [0, 0], sizes = [8, 8], strides = [1, 1]} : vector<8x32xf32> to vector<8x8xf32>
    %537 = vector.extract_strided_slice %532 {offsets = [0, 0], sizes = [8, 8], strides = [1, 1]} : vector<8x32xf32> to vector<8x8xf32>
    %538 = tpu.transpose %536, [1, 0] : vector<8x8xf32> -> vector<8x8xf32>
    %cst_160 = arith.constant dense<0.000000e+00> : vector<8x8xf32>
    %539 = tpu.matmul %535, %538, %cst_160 {dimension_numbers = #tpu.dot_dimension_numbers<[1], [0], [0], [1], [0, 0, 1, 1], [], []>} : vector<8x8xf32>, vector<8x8xf32>, vector<8x8xf32> -> vector<8x8xf32>
    %540 = arith.addf %539, %534 : vector<8x8xf32>
    %cst_161 = arith.constant dense<0xFF800000> : vector<8xf32>
    %541 = vector.multi_reduction <maximumf>, %540, %cst_161 [1] : vector<8x8xf32> to vector<8xf32>
    %542 = vector.shape_cast %541 : vector<8xf32> to vector<8x1xf32>
    %543 = vector.broadcast %542 : vector<8x1xf32> to vector<8x8xf32>
    %544 = arith.subf %540, %543 : vector<8x8xf32>
    %545 = math.exp %544 : vector<8x8xf32>
    %cst_162 = arith.constant dense<0.000000e+00> : vector<8xf32>
    %546 = vector.multi_reduction <add>, %545, %cst_162 [1] : vector<8x8xf32> to vector<8xf32>
    %547 = vector.shape_cast %546 : vector<8xf32> to vector<8x1xf32>
    %548 = tpu.reciprocal %547 {approx = true} : vector<8x1xf32> -> vector<8x1xf32>
    %549 = vector.broadcast %548 : vector<8x1xf32> to vector<8x8xf32>
    %550 = arith.mulf %545, %549 : vector<8x8xf32>
    %cst_163 = arith.constant dense<0.000000e+00> : vector<8x8xf32>
    %551 = tpu.matmul %550, %537, %cst_163 {dimension_numbers = #tpu.dot_dimension_numbers<[1], [0], [0], [1], [0, 0, 1, 1], [], []>} : vector<8x8xf32>, vector<8x8xf32>, vector<8x8xf32> -> vector<8x8xf32>
    %552 = vector.extract_strided_slice %530 {offsets = [0, 8], sizes = [8, 8], strides = [1, 1]} : vector<8x32xf32> to vector<8x8xf32>
    %553 = vector.extract_strided_slice %531 {offsets = [0, 8], sizes = [8, 8], strides = [1, 1]} : vector<8x32xf32> to vector<8x8xf32>
    %554 = vector.extract_strided_slice %532 {offsets = [0, 8], sizes = [8, 8], strides = [1, 1]} : vector<8x32xf32> to vector<8x8xf32>
    %555 = tpu.transpose %553, [1, 0] : vector<8x8xf32> -> vector<8x8xf32>
    %cst_164 = arith.constant dense<0.000000e+00> : vector<8x8xf32>
    %556 = tpu.matmul %552, %555, %cst_164 {dimension_numbers = #tpu.dot_dimension_numbers<[1], [0], [0], [1], [0, 0, 1, 1], [], []>} : vector<8x8xf32>, vector<8x8xf32>, vector<8x8xf32> -> vector<8x8xf32>
    %557 = arith.addf %556, %534 : vector<8x8xf32>
    %cst_165 = arith.constant dense<0xFF800000> : vector<8xf32>
    %558 = vector.multi_reduction <maximumf>, %557, %cst_165 [1] : vector<8x8xf32> to vector<8xf32>
    %559 = vector.shape_cast %558 : vector<8xf32> to vector<8x1xf32>
    %560 = vector.broadcast %559 : vector<8x1xf32> to vector<8x8xf32>
    %561 = arith.subf %557, %560 : vector<8x8xf32>
    %562 = math.exp %561 : vector<8x8xf32>
    %cst_166 = arith.constant dense<0.000000e+00> : vector<8xf32>
    %563 = vector.multi_reduction <add>, %562, %cst_166 [1] : vector<8x8xf32> to vector<8xf32>
    %564 = vector.shape_cast %563 : vector<8xf32> to vector<8x1xf32>
    %565 = tpu.reciprocal %564 {approx = true} : vector<8x1xf32> -> vector<8x1xf32>
    %566 = vector.broadcast %565 : vector<8x1xf32> to vector<8x8xf32>
    %567 = arith.mulf %562, %566 : vector<8x8xf32>
    %cst_167 = arith.constant dense<0.000000e+00> : vector<8x8xf32>
    %568 = tpu.matmul %567, %554, %cst_167 {dimension_numbers = #tpu.dot_dimension_numbers<[1], [0], [0], [1], [0, 0, 1, 1], [], []>} : vector<8x8xf32>, vector<8x8xf32>, vector<8x8xf32> -> vector<8x8xf32>
    %569 = vector.extract_strided_slice %530 {offsets = [0, 16], sizes = [8, 8], strides = [1, 1]} : vector<8x32xf32> to vector<8x8xf32>
    %570 = vector.extract_strided_slice %531 {offsets = [0, 16], sizes = [8, 8], strides = [1, 1]} : vector<8x32xf32> to vector<8x8xf32>
    %571 = vector.extract_strided_slice %532 {offsets = [0, 16], sizes = [8, 8], strides = [1, 1]} : vector<8x32xf32> to vector<8x8xf32>
    %572 = tpu.transpose %570, [1, 0] : vector<8x8xf32> -> vector<8x8xf32>
    %cst_168 = arith.constant dense<0.000000e+00> : vector<8x8xf32>
    %573 = tpu.matmul %569, %572, %cst_168 {dimension_numbers = #tpu.dot_dimension_numbers<[1], [0], [0], [1], [0, 0, 1, 1], [], []>} : vector<8x8xf32>, vector<8x8xf32>, vector<8x8xf32> -> vector<8x8xf32>
    %574 = arith.addf %573, %534 : vector<8x8xf32>
    %cst_169 = arith.constant dense<0xFF800000> : vector<8xf32>
    %575 = vector.multi_reduction <maximumf>, %574, %cst_169 [1] : vector<8x8xf32> to vector<8xf32>
    %576 = vector.shape_cast %575 : vector<8xf32> to vector<8x1xf32>
    %577 = vector.broadcast %576 : vector<8x1xf32> to vector<8x8xf32>
    %578 = arith.subf %574, %577 : vector<8x8xf32>
    %579 = math.exp %578 : vector<8x8xf32>
    %cst_170 = arith.constant dense<0.000000e+00> : vector<8xf32>
    %580 = vector.multi_reduction <add>, %579, %cst_170 [1] : vector<8x8xf32> to vector<8xf32>
    %581 = vector.shape_cast %580 : vector<8xf32> to vector<8x1xf32>
    %582 = tpu.reciprocal %581 {approx = true} : vector<8x1xf32> -> vector<8x1xf32>
    %583 = vector.broadcast %582 : vector<8x1xf32> to vector<8x8xf32>
    %584 = arith.mulf %579, %583 : vector<8x8xf32>
    %cst_171 = arith.constant dense<0.000000e+00> : vector<8x8xf32>
    %585 = tpu.matmul %584, %571, %cst_171 {dimension_numbers = #tpu.dot_dimension_numbers<[1], [0], [0], [1], [0, 0, 1, 1], [], []>} : vector<8x8xf32>, vector<8x8xf32>, vector<8x8xf32> -> vector<8x8xf32>
    %586 = vector.extract_strided_slice %530 {offsets = [0, 24], sizes = [8, 8], strides = [1, 1]} : vector<8x32xf32> to vector<8x8xf32>
    %587 = vector.extract_strided_slice %531 {offsets = [0, 24], sizes = [8, 8], strides = [1, 1]} : vector<8x32xf32> to vector<8x8xf32>
    %588 = vector.extract_strided_slice %532 {offsets = [0, 24], sizes = [8, 8], strides = [1, 1]} : vector<8x32xf32> to vector<8x8xf32>
    %589 = tpu.transpose %587, [1, 0] : vector<8x8xf32> -> vector<8x8xf32>
    %cst_172 = arith.constant dense<0.000000e+00> : vector<8x8xf32>
    %590 = tpu.matmul %586, %589, %cst_172 {dimension_numbers = #tpu.dot_dimension_numbers<[1], [0], [0], [1], [0, 0, 1, 1], [], []>} : vector<8x8xf32>, vector<8x8xf32>, vector<8x8xf32> -> vector<8x8xf32>
    %591 = arith.addf %590, %534 : vector<8x8xf32>
    %cst_173 = arith.constant dense<0xFF800000> : vector<8xf32>
    %592 = vector.multi_reduction <maximumf>, %591, %cst_173 [1] : vector<8x8xf32> to vector<8xf32>
    %593 = vector.shape_cast %592 : vector<8xf32> to vector<8x1xf32>
    %594 = vector.broadcast %593 : vector<8x1xf32> to vector<8x8xf32>
    %595 = arith.subf %591, %594 : vector<8x8xf32>
    %596 = math.exp %595 : vector<8x8xf32>
    %cst_174 = arith.constant dense<0.000000e+00> : vector<8xf32>
    %597 = vector.multi_reduction <add>, %596, %cst_174 [1] : vector<8x8xf32> to vector<8xf32>
    %598 = vector.shape_cast %597 : vector<8xf32> to vector<8x1xf32>
    %599 = tpu.reciprocal %598 {approx = true} : vector<8x1xf32> -> vector<8x1xf32>
    %600 = vector.broadcast %599 : vector<8x1xf32> to vector<8x8xf32>
    %601 = arith.mulf %596, %600 : vector<8x8xf32>
    %cst_175 = arith.constant dense<0.000000e+00> : vector<8x8xf32>
    %602 = tpu.matmul %601, %588, %cst_175 {dimension_numbers = #tpu.dot_dimension_numbers<[1], [0], [0], [1], [0, 0, 1, 1], [], []>} : vector<8x8xf32>, vector<8x8xf32>, vector<8x8xf32> -> vector<8x8xf32>
    %603 = tpu.concatenate %551, %568, %585, %602 in 1 : vector<8x8xf32>, vector<8x8xf32>, vector<8x8xf32>, vector<8x8xf32> -> vector<8x32xf32>
    %604 = tpu.concatenate %529, %603 in 0 : vector<8x32xf32>, vector<8x32xf32> -> vector<16x32xf32>
    %c1_176 = arith.constant 1 : index
    %c32_177 = arith.constant 32 : index
    %c0_178 = arith.constant 0 : index
    %605 = vector.load %arg6[%c1_176, %c32_177, %c0_178] : memref<2x272x128xf32, #tpu.memory_space<vmem>>, vector<1x32x32xf32>
    %606 = vector.shape_cast %605 : vector<1x32x32xf32> to vector<32x32xf32>
    %cst_179 = arith.constant dense<0.000000e+00> : vector<16x32xf32>
    %607 = tpu.matmul %604, %606, %cst_179 {dimension_numbers = #tpu.dot_dimension_numbers<[1], [0], [0], [1], [0, 0, 1, 1], [], []>} : vector<16x32xf32>, vector<32x32xf32>, vector<16x32xf32> -> vector<16x32xf32>
    %c1_180 = arith.constant 1 : index
    %c257_181 = arith.constant 257 : index
    %c0_182 = arith.constant 0 : index
    %608 = vector.load %arg6[%c1_180, %c257_181, %c0_182] : memref<2x272x128xf32, #tpu.memory_space<vmem>>, vector<1x1x32xf32>
    %609 = vector.shape_cast %608 : vector<1x1x32xf32> to vector<1x32xf32>
    %610 = vector.broadcast %609 : vector<1x32xf32> to vector<16x32xf32>
    %611 = arith.addf %607, %610 : vector<16x32xf32>
    %612 = arith.addf %448, %611 : vector<16x32xf32>
    %c1_183 = arith.constant 1 : index
    %c264_184 = arith.constant 264 : index
    %c0_185 = arith.constant 0 : index
    %613 = vector.load %arg6[%c1_183, %c264_184, %c0_185] : memref<2x272x128xf32, #tpu.memory_space<vmem>>, vector<1x1x32xf32>
    %614 = vector.shape_cast %613 : vector<1x1x32xf32> to vector<1x32xf32>
    %c1_186 = arith.constant 1 : index
    %c265_187 = arith.constant 265 : index
    %c0_188 = arith.constant 0 : index
    %615 = vector.load %arg6[%c1_186, %c265_187, %c0_188] : memref<2x272x128xf32, #tpu.memory_space<vmem>>, vector<1x1x32xf32>
    %616 = vector.shape_cast %615 : vector<1x1x32xf32> to vector<1x32xf32>
    %cst_189 = arith.constant dense<0.000000e+00> : vector<16xf32>
    %617 = vector.multi_reduction <add>, %612, %cst_189 [1] : vector<16x32xf32> to vector<16xf32>
    %618 = vector.shape_cast %617 : vector<16xf32> to vector<16x1xf32>
    %cst_190 = arith.constant 3.200000e+01 : f32
    %619 = vector.broadcast %cst_190 : f32 to vector<16x1xf32>
    %620 = arith.divf %618, %619 : vector<16x1xf32>
    %621 = arith.mulf %612, %612 : vector<16x32xf32>
    %cst_191 = arith.constant dense<0.000000e+00> : vector<16xf32>
    %622 = vector.multi_reduction <add>, %621, %cst_191 [1] : vector<16x32xf32> to vector<16xf32>
    %623 = vector.shape_cast %622 : vector<16xf32> to vector<16x1xf32>
    %cst_192 = arith.constant 3.200000e+01 : f32
    %624 = vector.broadcast %cst_192 : f32 to vector<16x1xf32>
    %625 = arith.divf %623, %624 : vector<16x1xf32>
    %626 = vector.broadcast %620 : vector<16x1xf32> to vector<16x32xf32>
    %627 = arith.subf %612, %626 : vector<16x32xf32>
    %628 = arith.mulf %620, %620 : vector<16x1xf32>
    %629 = arith.subf %625, %628 : vector<16x1xf32>
    %cst_193 = arith.constant 9.99999974E-6 : f32
    %630 = vector.broadcast %cst_193 : f32 to vector<16x1xf32>
    %631 = arith.addf %629, %630 : vector<16x1xf32>
    %632 = math.rsqrt %631 : vector<16x1xf32>
    %633 = vector.broadcast %632 : vector<16x1xf32> to vector<16x32xf32>
    %634 = arith.mulf %627, %633 : vector<16x32xf32>
    %635 = vector.broadcast %614 : vector<1x32xf32> to vector<16x32xf32>
    %636 = arith.mulf %634, %635 : vector<16x32xf32>
    %637 = vector.broadcast %616 : vector<1x32xf32> to vector<16x32xf32>
    %638 = arith.addf %636, %637 : vector<16x32xf32>
    %639 = vector.broadcast %1 : vector<16x1xf32> to vector<16x32xf32>
    %640 = arith.mulf %638, %639 : vector<16x32xf32>
    %c1_194 = arith.constant 1 : index
    %c64_195 = arith.constant 64 : index
    %c0_196 = arith.constant 0 : index
    %641 = vector.load %arg6[%c1_194, %c64_195, %c0_196] : memref<2x272x128xf32, #tpu.memory_space<vmem>>, vector<1x32x32xf32>
    %642 = vector.shape_cast %641 : vector<1x32x32xf32> to vector<32x32xf32>
    %cst_197 = arith.constant dense<0.000000e+00> : vector<16x32xf32>
    %643 = tpu.matmul %640, %642, %cst_197 {dimension_numbers = #tpu.dot_dimension_numbers<[1], [0], [0], [1], [0, 0, 1, 1], [], []>} : vector<16x32xf32>, vector<32x32xf32>, vector<16x32xf32> -> vector<16x32xf32>
    %c1_198 = arith.constant 1 : index
    %c258_199 = arith.constant 258 : index
    %c0_200 = arith.constant 0 : index
    %644 = vector.load %arg6[%c1_198, %c258_199, %c0_200] : memref<2x272x128xf32, #tpu.memory_space<vmem>>, vector<1x1x32xf32>
    %645 = vector.shape_cast %644 : vector<1x1x32xf32> to vector<1x32xf32>
    %646 = vector.broadcast %645 : vector<1x32xf32> to vector<16x32xf32>
    %647 = arith.addf %643, %646 : vector<16x32xf32>
    %c1_201 = arith.constant 1 : index
    %c96_202 = arith.constant 96 : index
    %c0_203 = arith.constant 0 : index
    %648 = vector.load %arg6[%c1_201, %c96_202, %c0_203] : memref<2x272x128xf32, #tpu.memory_space<vmem>>, vector<1x32x64xf32>
    %649 = vector.shape_cast %648 : vector<1x32x64xf32> to vector<32x64xf32>
    %cst_204 = arith.constant dense<0.000000e+00> : vector<32x64xf32>
    %650 = tpu.matmul %2, %649, %cst_204 {dimension_numbers = #tpu.dot_dimension_numbers<[1], [0], [0], [1], [0, 0, 1, 1], [], []>} : vector<32x32xf32>, vector<32x64xf32>, vector<32x64xf32> -> vector<32x64xf32>
    %c1_205 = arith.constant 1 : index
    %c259_206 = arith.constant 259 : index
    %c0_207 = arith.constant 0 : index
    %651 = vector.load %arg6[%c1_205, %c259_206, %c0_207] : memref<2x272x128xf32, #tpu.memory_space<vmem>>, vector<1x1x64xf32>
    %652 = vector.shape_cast %651 : vector<1x1x64xf32> to vector<1x64xf32>
    %653 = vector.broadcast %652 : vector<1x64xf32> to vector<32x64xf32>
    %654 = arith.addf %650, %653 : vector<32x64xf32>
    %655 = vector.extract_strided_slice %647 {offsets = [0, 0], sizes = [8, 32], strides = [1, 1]} : vector<16x32xf32> to vector<8x32xf32>
    %656 = vector.extract_strided_slice %654 {offsets = [0, 0], sizes = [16, 32], strides = [1, 1]} : vector<32x64xf32> to vector<16x32xf32>
    %657 = vector.extract_strided_slice %654 {offsets = [0, 32], sizes = [16, 32], strides = [1, 1]} : vector<32x64xf32> to vector<16x32xf32>
    %658 = vector.extract_strided_slice %4 {offsets = [0, 0, 0], sizes = [1, 1, 16], strides = [1, 1, 1]} : vector<2x1x16xf32> to vector<1x1x16xf32>
    %659 = vector.shape_cast %658 : vector<1x1x16xf32> to vector<1x16xf32>
    %660 = vector.extract_strided_slice %655 {offsets = [0, 0], sizes = [8, 8], strides = [1, 1]} : vector<8x32xf32> to vector<8x8xf32>
    %661 = vector.extract_strided_slice %656 {offsets = [0, 0], sizes = [16, 8], strides = [1, 1]} : vector<16x32xf32> to vector<16x8xf32>
    %662 = vector.extract_strided_slice %657 {offsets = [0, 0], sizes = [16, 8], strides = [1, 1]} : vector<16x32xf32> to vector<16x8xf32>
    %663 = tpu.transpose %661, [1, 0] : vector<16x8xf32> -> vector<8x16xf32>
    %cst_208 = arith.constant dense<0.000000e+00> : vector<8x16xf32>
    %664 = tpu.matmul %660, %663, %cst_208 {dimension_numbers = #tpu.dot_dimension_numbers<[1], [0], [0], [1], [0, 0, 1, 1], [], []>} : vector<8x8xf32>, vector<8x16xf32>, vector<8x16xf32> -> vector<8x16xf32>
    %665 = vector.broadcast %659 : vector<1x16xf32> to vector<8x16xf32>
    %666 = arith.addf %664, %665 : vector<8x16xf32>
    %cst_209 = arith.constant dense<0xFF800000> : vector<8xf32>
    %667 = vector.multi_reduction <maximumf>, %666, %cst_209 [1] : vector<8x16xf32> to vector<8xf32>
    %668 = vector.shape_cast %667 : vector<8xf32> to vector<8x1xf32>
    %669 = vector.broadcast %668 : vector<8x1xf32> to vector<8x16xf32>
    %670 = arith.subf %666, %669 : vector<8x16xf32>
    %671 = math.exp %670 : vector<8x16xf32>
    %cst_210 = arith.constant dense<0.000000e+00> : vector<8xf32>
    %672 = vector.multi_reduction <add>, %671, %cst_210 [1] : vector<8x16xf32> to vector<8xf32>
    %673 = vector.shape_cast %672 : vector<8xf32> to vector<8x1xf32>
    %674 = tpu.reciprocal %673 {approx = true} : vector<8x1xf32> -> vector<8x1xf32>
    %675 = vector.broadcast %674 : vector<8x1xf32> to vector<8x16xf32>
    %676 = arith.mulf %671, %675 : vector<8x16xf32>
    %cst_211 = arith.constant dense<0.000000e+00> : vector<8x8xf32>
    %677 = tpu.matmul %676, %662, %cst_211 {dimension_numbers = #tpu.dot_dimension_numbers<[1], [0], [0], [1], [0, 0, 1, 1], [], []>} : vector<8x16xf32>, vector<16x8xf32>, vector<8x8xf32> -> vector<8x8xf32>
    %678 = vector.extract_strided_slice %655 {offsets = [0, 8], sizes = [8, 8], strides = [1, 1]} : vector<8x32xf32> to vector<8x8xf32>
    %679 = vector.extract_strided_slice %656 {offsets = [0, 8], sizes = [16, 8], strides = [1, 1]} : vector<16x32xf32> to vector<16x8xf32>
    %680 = vector.extract_strided_slice %657 {offsets = [0, 8], sizes = [16, 8], strides = [1, 1]} : vector<16x32xf32> to vector<16x8xf32>
    %681 = tpu.transpose %679, [1, 0] : vector<16x8xf32> -> vector<8x16xf32>
    %cst_212 = arith.constant dense<0.000000e+00> : vector<8x16xf32>
    %682 = tpu.matmul %678, %681, %cst_212 {dimension_numbers = #tpu.dot_dimension_numbers<[1], [0], [0], [1], [0, 0, 1, 1], [], []>} : vector<8x8xf32>, vector<8x16xf32>, vector<8x16xf32> -> vector<8x16xf32>
    %683 = vector.broadcast %659 : vector<1x16xf32> to vector<8x16xf32>
    %684 = arith.addf %682, %683 : vector<8x16xf32>
    %cst_213 = arith.constant dense<0xFF800000> : vector<8xf32>
    %685 = vector.multi_reduction <maximumf>, %684, %cst_213 [1] : vector<8x16xf32> to vector<8xf32>
    %686 = vector.shape_cast %685 : vector<8xf32> to vector<8x1xf32>
    %687 = vector.broadcast %686 : vector<8x1xf32> to vector<8x16xf32>
    %688 = arith.subf %684, %687 : vector<8x16xf32>
    %689 = math.exp %688 : vector<8x16xf32>
    %cst_214 = arith.constant dense<0.000000e+00> : vector<8xf32>
    %690 = vector.multi_reduction <add>, %689, %cst_214 [1] : vector<8x16xf32> to vector<8xf32>
    %691 = vector.shape_cast %690 : vector<8xf32> to vector<8x1xf32>
    %692 = tpu.reciprocal %691 {approx = true} : vector<8x1xf32> -> vector<8x1xf32>
    %693 = vector.broadcast %692 : vector<8x1xf32> to vector<8x16xf32>
    %694 = arith.mulf %689, %693 : vector<8x16xf32>
    %cst_215 = arith.constant dense<0.000000e+00> : vector<8x8xf32>
    %695 = tpu.matmul %694, %680, %cst_215 {dimension_numbers = #tpu.dot_dimension_numbers<[1], [0], [0], [1], [0, 0, 1, 1], [], []>} : vector<8x16xf32>, vector<16x8xf32>, vector<8x8xf32> -> vector<8x8xf32>
    %696 = vector.extract_strided_slice %655 {offsets = [0, 16], sizes = [8, 8], strides = [1, 1]} : vector<8x32xf32> to vector<8x8xf32>
    %697 = vector.extract_strided_slice %656 {offsets = [0, 16], sizes = [16, 8], strides = [1, 1]} : vector<16x32xf32> to vector<16x8xf32>
    %698 = vector.extract_strided_slice %657 {offsets = [0, 16], sizes = [16, 8], strides = [1, 1]} : vector<16x32xf32> to vector<16x8xf32>
    %699 = tpu.transpose %697, [1, 0] : vector<16x8xf32> -> vector<8x16xf32>
    %cst_216 = arith.constant dense<0.000000e+00> : vector<8x16xf32>
    %700 = tpu.matmul %696, %699, %cst_216 {dimension_numbers = #tpu.dot_dimension_numbers<[1], [0], [0], [1], [0, 0, 1, 1], [], []>} : vector<8x8xf32>, vector<8x16xf32>, vector<8x16xf32> -> vector<8x16xf32>
    %701 = vector.broadcast %659 : vector<1x16xf32> to vector<8x16xf32>
    %702 = arith.addf %700, %701 : vector<8x16xf32>
    %cst_217 = arith.constant dense<0xFF800000> : vector<8xf32>
    %703 = vector.multi_reduction <maximumf>, %702, %cst_217 [1] : vector<8x16xf32> to vector<8xf32>
    %704 = vector.shape_cast %703 : vector<8xf32> to vector<8x1xf32>
    %705 = vector.broadcast %704 : vector<8x1xf32> to vector<8x16xf32>
    %706 = arith.subf %702, %705 : vector<8x16xf32>
    %707 = math.exp %706 : vector<8x16xf32>
    %cst_218 = arith.constant dense<0.000000e+00> : vector<8xf32>
    %708 = vector.multi_reduction <add>, %707, %cst_218 [1] : vector<8x16xf32> to vector<8xf32>
    %709 = vector.shape_cast %708 : vector<8xf32> to vector<8x1xf32>
    %710 = tpu.reciprocal %709 {approx = true} : vector<8x1xf32> -> vector<8x1xf32>
    %711 = vector.broadcast %710 : vector<8x1xf32> to vector<8x16xf32>
    %712 = arith.mulf %707, %711 : vector<8x16xf32>
    %cst_219 = arith.constant dense<0.000000e+00> : vector<8x8xf32>
    %713 = tpu.matmul %712, %698, %cst_219 {dimension_numbers = #tpu.dot_dimension_numbers<[1], [0], [0], [1], [0, 0, 1, 1], [], []>} : vector<8x16xf32>, vector<16x8xf32>, vector<8x8xf32> -> vector<8x8xf32>
    %714 = vector.extract_strided_slice %655 {offsets = [0, 24], sizes = [8, 8], strides = [1, 1]} : vector<8x32xf32> to vector<8x8xf32>
    %715 = vector.extract_strided_slice %656 {offsets = [0, 24], sizes = [16, 8], strides = [1, 1]} : vector<16x32xf32> to vector<16x8xf32>
    %716 = vector.extract_strided_slice %657 {offsets = [0, 24], sizes = [16, 8], strides = [1, 1]} : vector<16x32xf32> to vector<16x8xf32>
    %717 = tpu.transpose %715, [1, 0] : vector<16x8xf32> -> vector<8x16xf32>
    %cst_220 = arith.constant dense<0.000000e+00> : vector<8x16xf32>
    %718 = tpu.matmul %714, %717, %cst_220 {dimension_numbers = #tpu.dot_dimension_numbers<[1], [0], [0], [1], [0, 0, 1, 1], [], []>} : vector<8x8xf32>, vector<8x16xf32>, vector<8x16xf32> -> vector<8x16xf32>
    %719 = vector.broadcast %659 : vector<1x16xf32> to vector<8x16xf32>
    %720 = arith.addf %718, %719 : vector<8x16xf32>
    %cst_221 = arith.constant dense<0xFF800000> : vector<8xf32>
    %721 = vector.multi_reduction <maximumf>, %720, %cst_221 [1] : vector<8x16xf32> to vector<8xf32>
    %722 = vector.shape_cast %721 : vector<8xf32> to vector<8x1xf32>
    %723 = vector.broadcast %722 : vector<8x1xf32> to vector<8x16xf32>
    %724 = arith.subf %720, %723 : vector<8x16xf32>
    %725 = math.exp %724 : vector<8x16xf32>
    %cst_222 = arith.constant dense<0.000000e+00> : vector<8xf32>
    %726 = vector.multi_reduction <add>, %725, %cst_222 [1] : vector<8x16xf32> to vector<8xf32>
    %727 = vector.shape_cast %726 : vector<8xf32> to vector<8x1xf32>
    %728 = tpu.reciprocal %727 {approx = true} : vector<8x1xf32> -> vector<8x1xf32>
    %729 = vector.broadcast %728 : vector<8x1xf32> to vector<8x16xf32>
    %730 = arith.mulf %725, %729 : vector<8x16xf32>
    %cst_223 = arith.constant dense<0.000000e+00> : vector<8x8xf32>
    %731 = tpu.matmul %730, %716, %cst_223 {dimension_numbers = #tpu.dot_dimension_numbers<[1], [0], [0], [1], [0, 0, 1, 1], [], []>} : vector<8x16xf32>, vector<16x8xf32>, vector<8x8xf32> -> vector<8x8xf32>
    %732 = tpu.concatenate %677, %695, %713, %731 in 1 : vector<8x8xf32>, vector<8x8xf32>, vector<8x8xf32>, vector<8x8xf32> -> vector<8x32xf32>
    %c0_224 = arith.constant 0 : index
    %c0_225 = arith.constant 0 : index
    %c0_226 = arith.constant 0 : index
    %c0_227 = arith.constant 0 : index
    %733 = vector.load %arg9[%c0_224, %c0_225, %c0_226, %c0_227] : memref<2x4x8x16xf32, #tpu.memory_space<vmem>>, vector<1x1x8x16xf32>
    %734 = vector.shape_cast %733 : vector<1x1x8x16xf32> to vector<8x16xf32>
    %735 = vector.shape_cast %676 : vector<8x16xf32> to vector<1x1x8x16xf32>
    tpu.vector_store %arg9[%c0_224, %c0_225, %c0_226, %c0_227], %735 {strides = array<i32>} : memref<2x4x8x16xf32, #tpu.memory_space<vmem>>, vector<1x1x8x16xf32>,
    %c0_228 = arith.constant 0 : index
    %c1_229 = arith.constant 1 : index
    %c0_230 = arith.constant 0 : index
    %c0_231 = arith.constant 0 : index
    %736 = vector.load %arg9[%c0_228, %c1_229, %c0_230, %c0_231] : memref<2x4x8x16xf32, #tpu.memory_space<vmem>>, vector<1x1x8x16xf32>
    %737 = vector.shape_cast %736 : vector<1x1x8x16xf32> to vector<8x16xf32>
    %738 = vector.shape_cast %694 : vector<8x16xf32> to vector<1x1x8x16xf32>
    tpu.vector_store %arg9[%c0_228, %c1_229, %c0_230, %c0_231], %738 {strides = array<i32>} : memref<2x4x8x16xf32, #tpu.memory_space<vmem>>, vector<1x1x8x16xf32>,
    %c0_232 = arith.constant 0 : index
    %c2 = arith.constant 2 : index
    %c0_233 = arith.constant 0 : index
    %c0_234 = arith.constant 0 : index
    %739 = vector.load %arg9[%c0_232, %c2, %c0_233, %c0_234] : memref<2x4x8x16xf32, #tpu.memory_space<vmem>>, vector<1x1x8x16xf32>
    %740 = vector.shape_cast %739 : vector<1x1x8x16xf32> to vector<8x16xf32>
    %741 = vector.shape_cast %712 : vector<8x16xf32> to vector<1x1x8x16xf32>
    tpu.vector_store %arg9[%c0_232, %c2, %c0_233, %c0_234], %741 {strides = array<i32>} : memref<2x4x8x16xf32, #tpu.memory_space<vmem>>, vector<1x1x8x16xf32>,
    %c0_235 = arith.constant 0 : index
    %c3 = arith.constant 3 : index
    %c0_236 = arith.constant 0 : index
    %c0_237 = arith.constant 0 : index
    %742 = vector.load %arg9[%c0_235, %c3, %c0_236, %c0_237] : memref<2x4x8x16xf32, #tpu.memory_space<vmem>>, vector<1x1x8x16xf32>
    %743 = vector.shape_cast %742 : vector<1x1x8x16xf32> to vector<8x16xf32>
    %744 = vector.shape_cast %730 : vector<8x16xf32> to vector<1x1x8x16xf32>
    tpu.vector_store %arg9[%c0_235, %c3, %c0_236, %c0_237], %744 {strides = array<i32>} : memref<2x4x8x16xf32, #tpu.memory_space<vmem>>, vector<1x1x8x16xf32>,
    %745 = vector.extract_strided_slice %647 {offsets = [8, 0], sizes = [8, 32], strides = [1, 1]} : vector<16x32xf32> to vector<8x32xf32>
    %746 = vector.extract_strided_slice %654 {offsets = [16, 0], sizes = [16, 32], strides = [1, 1]} : vector<32x64xf32> to vector<16x32xf32>
    %747 = vector.extract_strided_slice %654 {offsets = [16, 32], sizes = [16, 32], strides = [1, 1]} : vector<32x64xf32> to vector<16x32xf32>
    %748 = vector.extract_strided_slice %4 {offsets = [1, 0, 0], sizes = [1, 1, 16], strides = [1, 1, 1]} : vector<2x1x16xf32> to vector<1x1x16xf32>
    %749 = vector.shape_cast %748 : vector<1x1x16xf32> to vector<1x16xf32>
    %750 = vector.extract_strided_slice %745 {offsets = [0, 0], sizes = [8, 8], strides = [1, 1]} : vector<8x32xf32> to vector<8x8xf32>
    %751 = vector.extract_strided_slice %746 {offsets = [0, 0], sizes = [16, 8], strides = [1, 1]} : vector<16x32xf32> to vector<16x8xf32>
    %752 = vector.extract_strided_slice %747 {offsets = [0, 0], sizes = [16, 8], strides = [1, 1]} : vector<16x32xf32> to vector<16x8xf32>
    %753 = tpu.transpose %751, [1, 0] : vector<16x8xf32> -> vector<8x16xf32>
    %cst_238 = arith.constant dense<0.000000e+00> : vector<8x16xf32>
    %754 = tpu.matmul %750, %753, %cst_238 {dimension_numbers = #tpu.dot_dimension_numbers<[1], [0], [0], [1], [0, 0, 1, 1], [], []>} : vector<8x8xf32>, vector<8x16xf32>, vector<8x16xf32> -> vector<8x16xf32>
    %755 = vector.broadcast %749 : vector<1x16xf32> to vector<8x16xf32>
    %756 = arith.addf %754, %755 : vector<8x16xf32>
    %cst_239 = arith.constant dense<0xFF800000> : vector<8xf32>
    %757 = vector.multi_reduction <maximumf>, %756, %cst_239 [1] : vector<8x16xf32> to vector<8xf32>
    %758 = vector.shape_cast %757 : vector<8xf32> to vector<8x1xf32>
    %759 = vector.broadcast %758 : vector<8x1xf32> to vector<8x16xf32>
    %760 = arith.subf %756, %759 : vector<8x16xf32>
    %761 = math.exp %760 : vector<8x16xf32>
    %cst_240 = arith.constant dense<0.000000e+00> : vector<8xf32>
    %762 = vector.multi_reduction <add>, %761, %cst_240 [1] : vector<8x16xf32> to vector<8xf32>
    %763 = vector.shape_cast %762 : vector<8xf32> to vector<8x1xf32>
    %764 = tpu.reciprocal %763 {approx = true} : vector<8x1xf32> -> vector<8x1xf32>
    %765 = vector.broadcast %764 : vector<8x1xf32> to vector<8x16xf32>
    %766 = arith.mulf %761, %765 : vector<8x16xf32>
    %cst_241 = arith.constant dense<0.000000e+00> : vector<8x8xf32>
    %767 = tpu.matmul %766, %752, %cst_241 {dimension_numbers = #tpu.dot_dimension_numbers<[1], [0], [0], [1], [0, 0, 1, 1], [], []>} : vector<8x16xf32>, vector<16x8xf32>, vector<8x8xf32> -> vector<8x8xf32>
    %768 = vector.extract_strided_slice %745 {offsets = [0, 8], sizes = [8, 8], strides = [1, 1]} : vector<8x32xf32> to vector<8x8xf32>
    %769 = vector.extract_strided_slice %746 {offsets = [0, 8], sizes = [16, 8], strides = [1, 1]} : vector<16x32xf32> to vector<16x8xf32>
    %770 = vector.extract_strided_slice %747 {offsets = [0, 8], sizes = [16, 8], strides = [1, 1]} : vector<16x32xf32> to vector<16x8xf32>
    %771 = tpu.transpose %769, [1, 0] : vector<16x8xf32> -> vector<8x16xf32>
    %cst_242 = arith.constant dense<0.000000e+00> : vector<8x16xf32>
    %772 = tpu.matmul %768, %771, %cst_242 {dimension_numbers = #tpu.dot_dimension_numbers<[1], [0], [0], [1], [0, 0, 1, 1], [], []>} : vector<8x8xf32>, vector<8x16xf32>, vector<8x16xf32> -> vector<8x16xf32>
    %773 = vector.broadcast %749 : vector<1x16xf32> to vector<8x16xf32>
    %774 = arith.addf %772, %773 : vector<8x16xf32>
    %cst_243 = arith.constant dense<0xFF800000> : vector<8xf32>
    %775 = vector.multi_reduction <maximumf>, %774, %cst_243 [1] : vector<8x16xf32> to vector<8xf32>
    %776 = vector.shape_cast %775 : vector<8xf32> to vector<8x1xf32>
    %777 = vector.broadcast %776 : vector<8x1xf32> to vector<8x16xf32>
    %778 = arith.subf %774, %777 : vector<8x16xf32>
    %779 = math.exp %778 : vector<8x16xf32>
    %cst_244 = arith.constant dense<0.000000e+00> : vector<8xf32>
    %780 = vector.multi_reduction <add>, %779, %cst_244 [1] : vector<8x16xf32> to vector<8xf32>
    %781 = vector.shape_cast %780 : vector<8xf32> to vector<8x1xf32>
    %782 = tpu.reciprocal %781 {approx = true} : vector<8x1xf32> -> vector<8x1xf32>
    %783 = vector.broadcast %782 : vector<8x1xf32> to vector<8x16xf32>
    %784 = arith.mulf %779, %783 : vector<8x16xf32>
    %cst_245 = arith.constant dense<0.000000e+00> : vector<8x8xf32>
    %785 = tpu.matmul %784, %770, %cst_245 {dimension_numbers = #tpu.dot_dimension_numbers<[1], [0], [0], [1], [0, 0, 1, 1], [], []>} : vector<8x16xf32>, vector<16x8xf32>, vector<8x8xf32> -> vector<8x8xf32>
    %786 = vector.extract_strided_slice %745 {offsets = [0, 16], sizes = [8, 8], strides = [1, 1]} : vector<8x32xf32> to vector<8x8xf32>
    %787 = vector.extract_strided_slice %746 {offsets = [0, 16], sizes = [16, 8], strides = [1, 1]} : vector<16x32xf32> to vector<16x8xf32>
    %788 = vector.extract_strided_slice %747 {offsets = [0, 16], sizes = [16, 8], strides = [1, 1]} : vector<16x32xf32> to vector<16x8xf32>
    %789 = tpu.transpose %787, [1, 0] : vector<16x8xf32> -> vector<8x16xf32>
    %cst_246 = arith.constant dense<0.000000e+00> : vector<8x16xf32>
    %790 = tpu.matmul %786, %789, %cst_246 {dimension_numbers = #tpu.dot_dimension_numbers<[1], [0], [0], [1], [0, 0, 1, 1], [], []>} : vector<8x8xf32>, vector<8x16xf32>, vector<8x16xf32> -> vector<8x16xf32>
    %791 = vector.broadcast %749 : vector<1x16xf32> to vector<8x16xf32>
    %792 = arith.addf %790, %791 : vector<8x16xf32>
    %cst_247 = arith.constant dense<0xFF800000> : vector<8xf32>
    %793 = vector.multi_reduction <maximumf>, %792, %cst_247 [1] : vector<8x16xf32> to vector<8xf32>
    %794 = vector.shape_cast %793 : vector<8xf32> to vector<8x1xf32>
    %795 = vector.broadcast %794 : vector<8x1xf32> to vector<8x16xf32>
    %796 = arith.subf %792, %795 : vector<8x16xf32>
    %797 = math.exp %796 : vector<8x16xf32>
    %cst_248 = arith.constant dense<0.000000e+00> : vector<8xf32>
    %798 = vector.multi_reduction <add>, %797, %cst_248 [1] : vector<8x16xf32> to vector<8xf32>
    %799 = vector.shape_cast %798 : vector<8xf32> to vector<8x1xf32>
    %800 = tpu.reciprocal %799 {approx = true} : vector<8x1xf32> -> vector<8x1xf32>
    %801 = vector.broadcast %800 : vector<8x1xf32> to vector<8x16xf32>
    %802 = arith.mulf %797, %801 : vector<8x16xf32>
    %cst_249 = arith.constant dense<0.000000e+00> : vector<8x8xf32>
    %803 = tpu.matmul %802, %788, %cst_249 {dimension_numbers = #tpu.dot_dimension_numbers<[1], [0], [0], [1], [0, 0, 1, 1], [], []>} : vector<8x16xf32>, vector<16x8xf32>, vector<8x8xf32> -> vector<8x8xf32>
    %804 = vector.extract_strided_slice %745 {offsets = [0, 24], sizes = [8, 8], strides = [1, 1]} : vector<8x32xf32> to vector<8x8xf32>
    %805 = vector.extract_strided_slice %746 {offsets = [0, 24], sizes = [16, 8], strides = [1, 1]} : vector<16x32xf32> to vector<16x8xf32>
    %806 = vector.extract_strided_slice %747 {offsets = [0, 24], sizes = [16, 8], strides = [1, 1]} : vector<16x32xf32> to vector<16x8xf32>
    %807 = tpu.transpose %805, [1, 0] : vector<16x8xf32> -> vector<8x16xf32>
    %cst_250 = arith.constant dense<0.000000e+00> : vector<8x16xf32>
    %808 = tpu.matmul %804, %807, %cst_250 {dimension_numbers = #tpu.dot_dimension_numbers<[1], [0], [0], [1], [0, 0, 1, 1], [], []>} : vector<8x8xf32>, vector<8x16xf32>, vector<8x16xf32> -> vector<8x16xf32>
    %809 = vector.broadcast %749 : vector<1x16xf32> to vector<8x16xf32>
    %810 = arith.addf %808, %809 : vector<8x16xf32>
    %cst_251 = arith.constant dense<0xFF800000> : vector<8xf32>
    %811 = vector.multi_reduction <maximumf>, %810, %cst_251 [1] : vector<8x16xf32> to vector<8xf32>
    %812 = vector.shape_cast %811 : vector<8xf32> to vector<8x1xf32>
    %813 = vector.broadcast %812 : vector<8x1xf32> to vector<8x16xf32>
    %814 = arith.subf %810, %813 : vector<8x16xf32>
    %815 = math.exp %814 : vector<8x16xf32>
    %cst_252 = arith.constant dense<0.000000e+00> : vector<8xf32>
    %816 = vector.multi_reduction <add>, %815, %cst_252 [1] : vector<8x16xf32> to vector<8xf32>
    %817 = vector.shape_cast %816 : vector<8xf32> to vector<8x1xf32>
    %818 = tpu.reciprocal %817 {approx = true} : vector<8x1xf32> -> vector<8x1xf32>
    %819 = vector.broadcast %818 : vector<8x1xf32> to vector<8x16xf32>
    %820 = arith.mulf %815, %819 : vector<8x16xf32>
    %cst_253 = arith.constant dense<0.000000e+00> : vector<8x8xf32>
    %821 = tpu.matmul %820, %806, %cst_253 {dimension_numbers = #tpu.dot_dimension_numbers<[1], [0], [0], [1], [0, 0, 1, 1], [], []>} : vector<8x16xf32>, vector<16x8xf32>, vector<8x8xf32> -> vector<8x8xf32>
    %822 = tpu.concatenate %767, %785, %803, %821 in 1 : vector<8x8xf32>, vector<8x8xf32>, vector<8x8xf32>, vector<8x8xf32> -> vector<8x32xf32>
    %c1_254 = arith.constant 1 : index
    %c0_255 = arith.constant 0 : index
    %c0_256 = arith.constant 0 : index
    %c0_257 = arith.constant 0 : index
    %823 = vector.load %arg9[%c1_254, %c0_255, %c0_256, %c0_257] : memref<2x4x8x16xf32, #tpu.memory_space<vmem>>, vector<1x1x8x16xf32>
    %824 = vector.shape_cast %823 : vector<1x1x8x16xf32> to vector<8x16xf32>
    %825 = vector.shape_cast %766 : vector<8x16xf32> to vector<1x1x8x16xf32>
    tpu.vector_store %arg9[%c1_254, %c0_255, %c0_256, %c0_257], %825 {strides = array<i32>} : memref<2x4x8x16xf32, #tpu.memory_space<vmem>>, vector<1x1x8x16xf32>,
    %c1_258 = arith.constant 1 : index
    %c1_259 = arith.constant 1 : index
    %c0_260 = arith.constant 0 : index
    %c0_261 = arith.constant 0 : index
    %826 = vector.load %arg9[%c1_258, %c1_259, %c0_260, %c0_261] : memref<2x4x8x16xf32, #tpu.memory_space<vmem>>, vector<1x1x8x16xf32>
    %827 = vector.shape_cast %826 : vector<1x1x8x16xf32> to vector<8x16xf32>
    %828 = vector.shape_cast %784 : vector<8x16xf32> to vector<1x1x8x16xf32>
    tpu.vector_store %arg9[%c1_258, %c1_259, %c0_260, %c0_261], %828 {strides = array<i32>} : memref<2x4x8x16xf32, #tpu.memory_space<vmem>>, vector<1x1x8x16xf32>,
    %c1_262 = arith.constant 1 : index
    %c2_263 = arith.constant 2 : index
    %c0_264 = arith.constant 0 : index
    %c0_265 = arith.constant 0 : index
    %829 = vector.load %arg9[%c1_262, %c2_263, %c0_264, %c0_265] : memref<2x4x8x16xf32, #tpu.memory_space<vmem>>, vector<1x1x8x16xf32>
    %830 = vector.shape_cast %829 : vector<1x1x8x16xf32> to vector<8x16xf32>
    %831 = vector.shape_cast %802 : vector<8x16xf32> to vector<1x1x8x16xf32>
    tpu.vector_store %arg9[%c1_262, %c2_263, %c0_264, %c0_265], %831 {strides = array<i32>} : memref<2x4x8x16xf32, #tpu.memory_space<vmem>>, vector<1x1x8x16xf32>,
    %c1_266 = arith.constant 1 : index
    %c3_267 = arith.constant 3 : index
    %c0_268 = arith.constant 0 : index
    %c0_269 = arith.constant 0 : index
    %832 = vector.load %arg9[%c1_266, %c3_267, %c0_268, %c0_269] : memref<2x4x8x16xf32, #tpu.memory_space<vmem>>, vector<1x1x8x16xf32>
    %833 = vector.shape_cast %832 : vector<1x1x8x16xf32> to vector<8x16xf32>
    %834 = vector.shape_cast %820 : vector<8x16xf32> to vector<1x1x8x16xf32>
    tpu.vector_store %arg9[%c1_266, %c3_267, %c0_268, %c0_269], %834 {strides = array<i32>} : memref<2x4x8x16xf32, #tpu.memory_space<vmem>>, vector<1x1x8x16xf32>,
    %835 = tpu.concatenate %732, %822 in 0 : vector<8x32xf32>, vector<8x32xf32> -> vector<16x32xf32>
    %c1_270 = arith.constant 1 : index
    %c128_271 = arith.constant 128 : index
    %c0_272 = arith.constant 0 : index
    %836 = vector.load %arg6[%c1_270, %c128_271, %c0_272] : memref<2x272x128xf32, #tpu.memory_space<vmem>>, vector<1x32x32xf32>
    %837 = vector.shape_cast %836 : vector<1x32x32xf32> to vector<32x32xf32>
    %cst_273 = arith.constant dense<0.000000e+00> : vector<16x32xf32>
    %838 = tpu.matmul %835, %837, %cst_273 {dimension_numbers = #tpu.dot_dimension_numbers<[1], [0], [0], [1], [0, 0, 1, 1], [], []>} : vector<16x32xf32>, vector<32x32xf32>, vector<16x32xf32> -> vector<16x32xf32>
    %c1_274 = arith.constant 1 : index
    %c260_275 = arith.constant 260 : index
    %c0_276 = arith.constant 0 : index
    %839 = vector.load %arg6[%c1_274, %c260_275, %c0_276] : memref<2x272x128xf32, #tpu.memory_space<vmem>>, vector<1x1x32xf32>
    %840 = vector.shape_cast %839 : vector<1x1x32xf32> to vector<1x32xf32>
    %841 = vector.broadcast %840 : vector<1x32xf32> to vector<16x32xf32>
    %842 = arith.addf %838, %841 : vector<16x32xf32>
    %843 = arith.addf %640, %842 : vector<16x32xf32>
    %c1_277 = arith.constant 1 : index
    %c266_278 = arith.constant 266 : index
    %c0_279 = arith.constant 0 : index
    %844 = vector.load %arg6[%c1_277, %c266_278, %c0_279] : memref<2x272x128xf32, #tpu.memory_space<vmem>>, vector<1x1x32xf32>
    %845 = vector.shape_cast %844 : vector<1x1x32xf32> to vector<1x32xf32>
    %c1_280 = arith.constant 1 : index
    %c267_281 = arith.constant 267 : index
    %c0_282 = arith.constant 0 : index
    %846 = vector.load %arg6[%c1_280, %c267_281, %c0_282] : memref<2x272x128xf32, #tpu.memory_space<vmem>>, vector<1x1x32xf32>
    %847 = vector.shape_cast %846 : vector<1x1x32xf32> to vector<1x32xf32>
    %cst_283 = arith.constant dense<0.000000e+00> : vector<16xf32>
    %848 = vector.multi_reduction <add>, %843, %cst_283 [1] : vector<16x32xf32> to vector<16xf32>
    %849 = vector.shape_cast %848 : vector<16xf32> to vector<16x1xf32>
    %cst_284 = arith.constant 3.200000e+01 : f32
    %850 = vector.broadcast %cst_284 : f32 to vector<16x1xf32>
    %851 = arith.divf %849, %850 : vector<16x1xf32>
    %852 = arith.mulf %843, %843 : vector<16x32xf32>
    %cst_285 = arith.constant dense<0.000000e+00> : vector<16xf32>
    %853 = vector.multi_reduction <add>, %852, %cst_285 [1] : vector<16x32xf32> to vector<16xf32>
    %854 = vector.shape_cast %853 : vector<16xf32> to vector<16x1xf32>
    %cst_286 = arith.constant 3.200000e+01 : f32
    %855 = vector.broadcast %cst_286 : f32 to vector<16x1xf32>
    %856 = arith.divf %854, %855 : vector<16x1xf32>
    %857 = vector.broadcast %851 : vector<16x1xf32> to vector<16x32xf32>
    %858 = arith.subf %843, %857 : vector<16x32xf32>
    %859 = arith.mulf %851, %851 : vector<16x1xf32>
    %860 = arith.subf %856, %859 : vector<16x1xf32>
    %cst_287 = arith.constant 9.99999974E-6 : f32
    %861 = vector.broadcast %cst_287 : f32 to vector<16x1xf32>
    %862 = arith.addf %860, %861 : vector<16x1xf32>
    %863 = math.rsqrt %862 : vector<16x1xf32>
    %864 = vector.broadcast %863 : vector<16x1xf32> to vector<16x32xf32>
    %865 = arith.mulf %858, %864 : vector<16x32xf32>
    %866 = vector.broadcast %845 : vector<1x32xf32> to vector<16x32xf32>
    %867 = arith.mulf %865, %866 : vector<16x32xf32>
    %868 = vector.broadcast %847 : vector<1x32xf32> to vector<16x32xf32>
    %869 = arith.addf %867, %868 : vector<16x32xf32>
    %870 = vector.broadcast %1 : vector<16x1xf32> to vector<16x32xf32>
    %871 = arith.mulf %869, %870 : vector<16x32xf32>
    %c1_288 = arith.constant 1 : index
    %c160_289 = arith.constant 160 : index
    %c0_290 = arith.constant 0 : index
    %872 = vector.load %arg6[%c1_288, %c160_289, %c0_290] : memref<2x272x128xf32, #tpu.memory_space<vmem>>, vector<1x32x64xf32>
    %873 = vector.shape_cast %872 : vector<1x32x64xf32> to vector<32x64xf32>
    %cst_291 = arith.constant dense<0.000000e+00> : vector<16x64xf32>
    %874 = tpu.matmul %871, %873, %cst_291 {dimension_numbers = #tpu.dot_dimension_numbers<[1], [0], [0], [1], [0, 0, 1, 1], [], []>} : vector<16x32xf32>, vector<32x64xf32>, vector<16x64xf32> -> vector<16x64xf32>
    %c1_292 = arith.constant 1 : index
    %c261_293 = arith.constant 261 : index
    %c0_294 = arith.constant 0 : index
    %875 = vector.load %arg6[%c1_292, %c261_293, %c0_294] : memref<2x272x128xf32, #tpu.memory_space<vmem>>, vector<1x1x64xf32>
    %876 = vector.shape_cast %875 : vector<1x1x64xf32> to vector<1x64xf32>
    %877 = vector.broadcast %876 : vector<1x64xf32> to vector<16x64xf32>
    %878 = arith.addf %874, %877 : vector<16x64xf32>
    %cst_295 = arith.constant 0.000000e+00 : f32
    %879 = vector.broadcast %cst_295 : f32 to vector<16x64xf32>
    %880 = arith.maximumf %878, %879 : vector<16x64xf32>
    %c1_296 = arith.constant 1 : index
    %c192_297 = arith.constant 192 : index
    %c0_298 = arith.constant 0 : index
    %881 = vector.load %arg6[%c1_296, %c192_297, %c0_298] : memref<2x272x128xf32, #tpu.memory_space<vmem>>, vector<1x64x32xf32>
    %882 = vector.shape_cast %881 : vector<1x64x32xf32> to vector<64x32xf32>
    %cst_299 = arith.constant dense<0.000000e+00> : vector<16x32xf32>
    %883 = tpu.matmul %880, %882, %cst_299 {dimension_numbers = #tpu.dot_dimension_numbers<[1], [0], [0], [1], [0, 0, 1, 1], [], []>} : vector<16x64xf32>, vector<64x32xf32>, vector<16x32xf32> -> vector<16x32xf32>
    %c1_300 = arith.constant 1 : index
    %c262_301 = arith.constant 262 : index
    %c0_302 = arith.constant 0 : index
    %884 = vector.load %arg6[%c1_300, %c262_301, %c0_302] : memref<2x272x128xf32, #tpu.memory_space<vmem>>, vector<1x1x32xf32>
    %885 = vector.shape_cast %884 : vector<1x1x32xf32> to vector<1x32xf32>
    %886 = vector.broadcast %885 : vector<1x32xf32> to vector<16x32xf32>
    %887 = arith.addf %883, %886 : vector<16x32xf32>
    %888 = arith.addf %871, %887 : vector<16x32xf32>
    %c1_303 = arith.constant 1 : index
    %c268_304 = arith.constant 268 : index
    %c0_305 = arith.constant 0 : index
    %889 = vector.load %arg6[%c1_303, %c268_304, %c0_305] : memref<2x272x128xf32, #tpu.memory_space<vmem>>, vector<1x1x32xf32>
    %890 = vector.shape_cast %889 : vector<1x1x32xf32> to vector<1x32xf32>
    %c1_306 = arith.constant 1 : index
    %c269_307 = arith.constant 269 : index
    %c0_308 = arith.constant 0 : index
    %891 = vector.load %arg6[%c1_306, %c269_307, %c0_308] : memref<2x272x128xf32, #tpu.memory_space<vmem>>, vector<1x1x32xf32>
    %892 = vector.shape_cast %891 : vector<1x1x32xf32> to vector<1x32xf32>
    %cst_309 = arith.constant dense<0.000000e+00> : vector<16xf32>
    %893 = vector.multi_reduction <add>, %888, %cst_309 [1] : vector<16x32xf32> to vector<16xf32>
    %894 = vector.shape_cast %893 : vector<16xf32> to vector<16x1xf32>
    %cst_310 = arith.constant 3.200000e+01 : f32
    %895 = vector.broadcast %cst_310 : f32 to vector<16x1xf32>
    %896 = arith.divf %894, %895 : vector<16x1xf32>
    %897 = arith.mulf %888, %888 : vector<16x32xf32>
    %cst_311 = arith.constant dense<0.000000e+00> : vector<16xf32>
    %898 = vector.multi_reduction <add>, %897, %cst_311 [1] : vector<16x32xf32> to vector<16xf32>
    %899 = vector.shape_cast %898 : vector<16xf32> to vector<16x1xf32>
    %cst_312 = arith.constant 3.200000e+01 : f32
    %900 = vector.broadcast %cst_312 : f32 to vector<16x1xf32>
    %901 = arith.divf %899, %900 : vector<16x1xf32>
    %902 = vector.broadcast %896 : vector<16x1xf32> to vector<16x32xf32>
    %903 = arith.subf %888, %902 : vector<16x32xf32>
    %904 = arith.mulf %896, %896 : vector<16x1xf32>
    %905 = arith.subf %901, %904 : vector<16x1xf32>
    %cst_313 = arith.constant 9.99999974E-6 : f32
    %906 = vector.broadcast %cst_313 : f32 to vector<16x1xf32>
    %907 = arith.addf %905, %906 : vector<16x1xf32>
    %908 = math.rsqrt %907 : vector<16x1xf32>
    %909 = vector.broadcast %908 : vector<16x1xf32> to vector<16x32xf32>
    %910 = arith.mulf %903, %909 : vector<16x32xf32>
    %911 = vector.broadcast %890 : vector<1x32xf32> to vector<16x32xf32>
    %912 = arith.mulf %910, %911 : vector<16x32xf32>
    %913 = vector.broadcast %892 : vector<1x32xf32> to vector<16x32xf32>
    %914 = arith.addf %912, %913 : vector<16x32xf32>
    %915 = vector.broadcast %1 : vector<16x1xf32> to vector<16x32xf32>
    %916 = arith.mulf %914, %915 : vector<16x32xf32>
    %c0_314 = arith.constant 0 : index
    %c0_315 = arith.constant 0 : index
    %917 = vector.load %arg7[%c0_314, %c0_315] : memref<32x64xf32, #tpu.memory_space<vmem>>, vector<32x64xf32>
    %cst_316 = arith.constant dense<0.000000e+00> : vector<16x64xf32>
    %918 = tpu.matmul %916, %917, %cst_316 {dimension_numbers = #tpu.dot_dimension_numbers<[1], [0], [0], [1], [0, 0, 1, 1], [], []>} : vector<16x32xf32>, vector<32x64xf32>, vector<16x64xf32> -> vector<16x64xf32>
    %cst_317 = arith.constant dense<0xFF800000> : vector<16xf32>
    %919 = vector.multi_reduction <maximumf>, %918, %cst_317 [1] : vector<16x64xf32> to vector<16xf32>
    %920 = vector.shape_cast %919 : vector<16xf32> to vector<16x1xf32>
    %921 = vector.broadcast %920 : vector<16x1xf32> to vector<16x64xf32>
    %922 = arith.subf %918, %921 : vector<16x64xf32>
    %923 = math.exp %922 : vector<16x64xf32>
    %cst_318 = arith.constant dense<0.000000e+00> : vector<16xf32>
    %924 = vector.multi_reduction <add>, %923, %cst_318 [1] : vector<16x64xf32> to vector<16xf32>
    %925 = vector.shape_cast %924 : vector<16xf32> to vector<16x1xf32>
    %926 = math.log %925 : vector<16x1xf32>
    %927 = arith.addf %926, %920 : vector<16x1xf32>
    %928 = vector.broadcast %927 : vector<16x1xf32> to vector<16x64xf32>
    %929 = arith.subf %918, %928 : vector<16x64xf32>
    %c0_319 = arith.constant 0 : index
    %c0_320 = arith.constant 0 : index
    %930 = vector.load %arg8[%c0_319, %c0_320] : memref<16x64xf32, #tpu.memory_space<vmem>>, vector<16x64xf32>
    tpu.vector_store %arg8[%c0_319, %c0_320], %929 {strides = array<i32>} : memref<16x64xf32, #tpu.memory_space<vmem>>, vector<16x64xf32>,
    return
  }
  func.func @transform_0(%arg0: i32) -> (i32, i32) {
    %c0_i32 = arith.constant 0 : i32
    %c0_i32_0 = arith.constant 0 : i32
    return %arg0, %c0_i32 : i32, i32
  }
  func.func @transform_1(%arg0: i32) -> (i32, i32) {
    %c0_i32 = arith.constant 0 : i32
    %c0_i32_0 = arith.constant 0 : i32
    return %arg0, %c0_i32 : i32, i32
  }
  func.func @transform_2(%arg0: i32) -> (i32, i32) {
    %c0_i32 = arith.constant 0 : i32
    %c0_i32_0 = arith.constant 0 : i32
    return %arg0, %c0_i32 : i32, i32
  }
  func.func @transform_3(%arg0: i32) -> (i32, i32, i32) {
    %c0_i32 = arith.constant 0 : i32
    %c0_i32_0 = arith.constant 0 : i32
    %c0_i32_1 = arith.constant 0 : i32
    return %arg0, %c0_i32, %c0_i32_0 : i32, i32, i32
  }
  func.func @transform_4(%arg0: i32) -> (i32, i32, i32) {
    %c0_i32 = arith.constant 0 : i32
    %c0_i32_0 = arith.constant 0 : i32
    %c0_i32_1 = arith.constant 0 : i32
    return %arg0, %c0_i32, %c0_i32_0 : i32, i32, i32
  }
  func.func @transform_5(%arg0: i32) -> (i32, i32, i32) {
    %c0_i32 = arith.constant 0 : i32
    %c0_i32_0 = arith.constant 0 : i32
    %c0_i32_1 = arith.constant 0 : i32
    %c0_i32_2 = arith.constant 0 : i32
    return %c0_i32, %c0_i32_0, %c0_i32_1 : i32, i32, i32
  }
  func.func @transform_6(%arg0: i32) -> (i32, i32) {
    %c0_i32 = arith.constant 0 : i32
    %c0_i32_0 = arith.constant 0 : i32
    %c0_i32_1 = arith.constant 0 : i32
    return %c0_i32, %c0_i32_0 : i32, i32
  }
  func.func @transform_7(%arg0: i32) -> (i32, i32) {
    %c0_i32 = arith.constant 0 : i32
    %c0_i32_0 = arith.constant 0 : i32
    return %arg0, %c0_i32 : i32, i32
  }
  func.func @transform_8(%arg0: i32) -> (i32, i32, i32, i32) {
    %c0_i32 = arith.constant 0 : i32
    %c0_i32_0 = arith.constant 0 : i32
    %c0_i32_1 = arith.constant 0 : i32
    %c0_i32_2 = arith.constant 0 : i32
    return %arg0, %c0_i32, %c0_i32_0, %c0_i32_1 : i32, i32, i32, i32
  }
}

</mosaic_0001>

<bundles_post_ra>
// kernel: tpu_custom_call.1
= control target key start
LH: loop header
LB: loop body
LE: loop exit
PB: predicated region body
PF: predicated region fallthrough
CT: control target
= control target key end

     0   :  { %14 = vsyncpa [#allocation3], 0  ;;  %s4900_s0 = inlined_call_operand.vmem [shape: f32[16,32], index: 0, kind: input, shape index: {}]   ;;  %s4901_s1 = inlined_call_operand.hbm [shape: f32[32,32], index: 1, kind: input, shape index: {}]   ;;  %s4902_s2 = inlined_call_operand.vmem [shape: f32[16,1], index: 2, kind: input, shape index: {}]   ;;  %s4903_s3 = inlined_call_operand.hbm [shape: f32[2,8,8], index: 3, kind: input, shape index: {}]   ;;  %s4904_s4 = inlined_call_operand.vmem [shape: f32[2,1,16], index: 4, kind: input, shape index: {}]   ;;  %s4905_s5 = inlined_call_operand.hbm [shape: f32[2,272,128], index: 5, kind: input, shape index: {}]   ;;  %s4906_s6 = inlined_call_operand.hbm [shape: f32[32,64], index: 6, kind: input, shape index: {}]   ;;  %s4907_s7 = inlined_call_operand.hbm [shape: f32[16,64], index: 7, kind: output, shape index: {0}]   ;;  %s4908_s8 = inlined_call_operand.hbm [shape: f32[2,4,8,16], index: 8, kind: output, shape index: {1}]  }
   0x1   :  { %15 = vsyncpa [#allocation6], 0 }
   0x2   :  { %16 = vsyncpa [#allocation9], 0 }
   0x3   :  { %17 = vsyncpa [#allocation4], 0 }
   0x4   :  { %18 = vsyncpa [#allocation12], 0  ;;  %s40_s29 = sshll.u32 %s4903_s3, 4  ;;  %s4022_s30 = smov [#allocation5]   ;;  %s41_s29 = int_to_ptr.hbm [resolvable:$true] %s40_s29 }
   0x5   :  { %s42_s9 = sshll.u32 %s4022_s30, 4  ;;  %s25_s12 = sshll.u32 %s4901_s1, 4  ;;  %s43_s9 = int_to_ptr.vmem [resolvable:$true] %s42_s9  ;;  %s26_s12 = int_to_ptr.hbm [resolvable:$true] %s25_s12 }
   0x6   :  { %s4023_s13 = smov 128   ;;  %s4024_s14 = smov 8  }
   0x7   :  { %48 = dma.hbm_to_vmem [thread:$0]  %s41_s29, 256, %s43_s9, [#allocation6], %s4023_s13, %s4023_s13, %s4024_s14  }
   0x8   :  { %s4025_s15 = smov [#allocation2]   ;;  %s55_s3 = sshll.u32 %s4905_s5, 4  ;;  %s56_s3 = int_to_ptr.hbm [resolvable:$true] %s55_s3 }
   0x9   :  { %s27_s16 = sshll.u32 %s4025_s15, 4  ;;  %s68_s20 = sshll.u32 %s4906_s6, 4  ;;  %s28_s16 = int_to_ptr.vmem [resolvable:$true] %s27_s16  ;;  %s69_s20 = int_to_ptr.hbm [resolvable:$true] %s68_s20 }
   0xa   :  { %33 = dma.hbm_to_vmem [thread:$0]  %s26_s12, 512, %s28_s16, [#allocation3], %s4023_s13, %s4023_s13, %s4024_s14  }
   0xb   :  { %s4026_s21 = smov [#allocation7]   ;;  %s4027_s23 = smov [#allocation8]  }
   0xc   :  { %s57_s22 = sshll.u32 %s4026_s21, 4  ;;  %s70_s5 = sshll.u32 %s4027_s23, 4  ;;  %s58_s22 = int_to_ptr.vmem [resolvable:$true] %s57_s22  ;;  %s71_s5 = int_to_ptr.vmem [resolvable:$true] %s70_s5 }
   0xd   :  { %63 = dma.hbm_to_vmem [thread:$0]  %s56_s3, 8704, %s58_s22, [#allocation6], %s4023_s13, %s4023_s13, %s4024_s14  }
   0xe   :  { %76 = dma.hbm_to_vmem [thread:$0]  %s69_s20, 512, %s71_s5, [#allocation9], %s4023_s13, %s4023_s13, %s4024_s14  }
   0xf   :  { %4012 = dma.done.wait [#allocation3], 512  }
  0x10   :  { %4013 = vsyncadd [#allocation3], 4294966784 }
  0x11   :  { %4014 = dma.done.wait [#allocation6], 8960  }
  0x12   :  { %4015 = vsyncadd [#allocation6], 4294958336 }
  0x13   :  { %4016 = dma.done.wait [#allocation9], 512  }
  0x14   :  { %4017 = vsyncadd [#allocation9], 4294966784  ;;  %v108_v0 = vld [vmem:[#allocation7 + $0x18] sm:$0xff]  ;;  %v107_v1 = vld [vmem:[#allocation7 + $0x10] sm:$0xff]  ;;  %vm111_vm0 = vcmask 261120   ;;  %s4028_s25 = smov 64  }
  0x15   :  { %130 = vmatpush.msra.mxu0 %v108_v0  ;;  %v106_v2 = vld [vmem:[#allocation7 + $0x8] sm:$0xff]  ;;  %v105_v3 = vld [vmem:[#allocation7] sm:$0xff]  ;;  %v4117_v4 = vld [vmem:[%s4900_s0] sm:$0xff]  ;;  %s4029_s26 = smov 120   ;;  %s4030_s27 = smov 96   ;;  %vm144_vm1 = vcmask 64512  }
  0x16   :  { %v4121_v5 = vld [vmem:[#allocation7 + $0x100] ss:$0 sm:$0xff]  ;;  %s4031_s28 = smov 56   ;;  %s4032_s29 = smov 88   ;;  %v4139_v8 = vld [vmem:[%s4900_s0 + $0x8] sm:$0xff]  ;;  %v101_v15 = vld [vmem:[#allocation5] sm:$0xff] }
  0x17   :  { %131 = vmatpush.msra.mxu0 %v107_v1  ;;  %s4033_s0 = smov 72   ;;  %s4034_s10 = smov 80   ;;  %vm414_vm2 = vcmask 130048   ;;  %vm416_vm3 = vcmask 195584   ;;  %vm1634_vm14 = vcmask 523264  }
  0x18   :  { %s4035_s11 = smov 112   ;;  %s4036_s12 = smov 104  }
  0x19   :  { %132 = vmatpush.msra.mxu0 %v106_v2  ;;  %s4037_s15 = smov 40   ;;  %s4038_s16 = smov 48  }
  0x1a   :  { %s4039_s17 = smov 24   ;;  %s4040_s18 = smov 16  }
  0x1b   :  { %133 = vmatpush.msra.mxu0 %v105_v3  ;;  %s4044_s30 = smov [#allocation10]  }
  0x1c   :  { %3419 = vmatmul.msk.f32.vlgmr.msra.gmra.mxu0 %vm111_vm0, %v4117_v4  ;;  %s3384_s9 = sshll.u32 %s4044_s30, 4  ;;  %s3385_s9 = int_to_ptr.vmem [resolvable:$true] %s3384_s9 }
  0x24   :  { %3420 = vmatmul.msk.f32.gmra.mxu0 %vm111_vm0, %v4139_v8 }
  0x99   :  { %v135_v6 = vpop.f32.mrf.mxu0 }
  0x9a   :  { %v4124_v7 = vadd.f32 %v4121_v5, %v135_v6 }
  0x9c   :  { %180 = vrot.lane.b32.xlu2 %v4124_v7, %s4028_s25  ;;  %206 = vrot.lane.b32.xlu1 %v4124_v7, %s4029_s26 }
  0x9d   :  { %142 = vrot.lane.b32.xlu0 %v4124_v7, %s4030_s27 }
  0xa1   :  { %v138_v14 = vpop.f32.mrf.mxu0 }
  0xa2   :  { %v4173_v50 = vadd.f32 %v4121_v5, %v138_v14 }
  0xa4   :  { %245 = vrot.lane.b32.xlu2 %v4124_v7, %s4031_s28 }
  0xa5   :  { %208 = vrot.lane.b32.xlu0 %v4124_v7, %s4032_s29 }
  0xf6   :  { %v181_v9 = vpop.permute.xlu2 %180 }
  0xf7   :  { %201 = vmatpush.msra.mxu2 %v181_v9 }
  0xfe   :  { %v246_v10 = vpop.permute.xlu2 %245 }
  0xff   :  { %266 = vmatpush.msrb.mxu2 %v246_v10 }
 0x10e   :  { %v207_v13 = vpop.permute.xlu1 %206 }
 0x10f   :  { %v143_v11 = vpop.permute.xlu0 %142 }
 0x110   :  { %3421 = vmatpush.xpose.msk.msrb.mxu0 %vm144_vm1, %v143_v11 }
 0x113   :  { %3422 = vmatmul.msk.f32.vlgmr.msrb.gmra.mxu0 %vm144_vm1, %v4124_v7 }
 0x117   :  { %v209_v12 = vpop.permute.xlu0 %208 }
 0x118   :  { %3424 = vmatpush.xpose.msk.msra.mxu3 %vm144_vm1, %v209_v12 }
 0x11b   :  { %3425 = vmatmul.msk.f32.vlgmr.msra.gmra.mxu3 %vm144_vm1, %v207_v13 }
 0x190   :  { %v166_v16 = vpop.f32.mrf.mxu0 }
 0x191   :  { %v167_v17 = vadd.f32 %v166_v16, %v101_v15  ;;  %v102_v16 = vld [vmem:[#allocation5 + $0x8] sm:$0xff] }
 0x193   :  { %v169_v18 = vsel %vm144_vm1, %v167_v17, -inf }
 0x194   :  { %170 = vmax.xlane.f32.xlu1 %v169_v18 }
 0x19e   :  { %v231_v19 = vpop.f32.mrf.mxu3 }
 0x19f   :  { %v232_v20 = vadd.f32 %v231_v19, %v101_v15 }
 0x1a1   :  { %v234_v21 = vsel %vm144_vm1, %v232_v20, -inf }
 0x1a2   :  { %235 = vmax.xlane.f32.xlu2 %v234_v21 }
 0x1ad   :  { %338 = vrot.lane.b32.xlu1 %v4124_v7, %s4033_s0 }
 0x1ba   :  { %273 = vrot.lane.b32.xlu2 %v4124_v7, %s4034_s10 }
 0x207   :  { %v171_v22 = vpop.xlane.xlu1 %170 }
 0x208   :  { %v172_v23 = vsub.f32 %v167_v17, %v171_v22 }
 0x20a   :  { %v173_v24 = vmul.f32 1.442695, %v172_v23 }
 0x20c   :  { %3698 = vpow2.f32 %v173_v24 }
 0x212   :  { %v3699_v25 = vpop.eup %3698 }
 0x213   :  { %v175_v26 = vsel %vm144_vm1, %v3699_v25, 0.0 }
 0x214   :  { %176 = vadd.xlane.f32.xlu2 %v175_v26 }
 0x215   :  { %v236_v27 = vpop.xlane.xlu2 %235 }
 0x216   :  { %v237_v28 = vsub.f32 %v232_v20, %v236_v27 }
 0x218   :  { %v238_v29 = vmul.f32 1.442695, %v237_v28 }
 0x21a   :  { %3700 = vpow2.f32 %v238_v29  ;;  %v695_v29 = vld [vmem:[#allocation7 + $0x38] sm:$0xff] }
 0x21d   :  { %v274_v30 = vpop.permute.xlu2 %273 }
 0x21e   :  { %3427 = vmatpush.xpose.msk.msra.mxu1 %vm144_vm1, %v274_v30  ;;  %v694_v30 = vld [vmem:[#allocation7 + $0x30] sm:$0xff] }
 0x21f   :  { %v339_v37 = vpop.permute.xlu1 %338 }
 0x220   :  { %v3701_v31 = vpop.eup %3700 }
 0x221   :  { %v240_v32 = vsel %vm144_vm1, %v3701_v31, 0.0 }
 0x222   :  { %241 = vadd.xlane.f32.xlu0 %v240_v32  ;;  %v692_v32 = vld [vmem:[#allocation7 + $0x20] sm:$0xff] }
 0x22c   :  { %271 = vrot.lane.b32.xlu2 %v4124_v7, %s4035_s11 }
 0x236   :  { %336 = vrot.lane.b32.xlu0 %v4124_v7, %s4036_s12 }
 0x287   :  { %v177_v33 = vpop.xlane.xlu2 %176 }
 0x288   :  { %3702 = vrcp.f32 %v177_v33 }
 0x28e   :  { %v3703_v34 = vpop.eup %3702 }
 0x28f   :  { %v272_v35 = vpop.permute.xlu2 %271  ;;  %v179_v36 = vmul.f32 %v3703_v34, %v3699_v25 }
 0x290   :  { %3428 = vmatmul.msk.f32.vlgmr.msra.gmra.mxu1 %vm144_vm1, %v272_v35 }
 0x291   :  { %3423 = vmatmul.msk.f32.vlgmr.msra.gmra.mxu2 %vm144_vm1, %v179_v36 }
 0x292   :  { %3430 = vmatpush.xpose.msk.msra.mxu2 %vm144_vm1, %v339_v37 }
 0x295   :  { %v242_v38 = vpop.xlane.xlu0 %241 }
 0x296   :  { %3704 = vrcp.f32 %v242_v38 }
 0x29c   :  { %v3705_v39 = vpop.eup %3704 }
 0x29d   :  { %v244_v40 = vmul.f32 %v3705_v39, %v3701_v31  ;;  %v693_v31 = vld [vmem:[#allocation7 + $0x28] sm:$0xff] }
 0x29f   :  { %3426 = vmatmul.msk.f32.vlgmr.msrb.gmra.mxu2 %vm144_vm1, %v244_v40 }
 0x2a8   :  { %v337_v41 = vpop.permute.xlu0 %336 }
 0x2a9   :  { %3431 = vmatmul.msk.f32.vlgmr.msra.gmra.mxu2 %vm144_vm1, %v337_v41 }
 0x30d   :  { %v296_v42 = vpop.f32.mrf.mxu1 }
 0x30e   :  { %v297_v43 = vadd.f32 %v296_v42, %v101_v15 }
 0x310   :  { %v299_v44 = vsel %vm144_vm1, %v297_v43, -inf }
 0x311   :  { %300 = vmax.xlane.f32.xlu2 %v299_v44 }
 0x314   :  { %v4167_v45 = vpop.f32.mrf.mxu2 }
 0x322   :  { %v268_v46 = vpop.f32.mrf.mxu2 }
 0x32c   :  { %v361_v47 = vpop.f32.mrf.mxu2 }
 0x32d   :  { %v362_v48 = vadd.f32 %v361_v47, %v101_v15 }
 0x32f   :  { %v364_v49 = vsel %vm144_vm1, %v362_v48, -inf }
 0x330   :  { %365 = vmax.xlane.f32.xlu1 %v364_v49 }
 0x349   :  { %375 = vrot.lane.b32.xlu1 %v4124_v7, %s4037_s15 }
 0x351   :  { %549 = vrot.lane.b32.xlu1 %v4173_v50, %s4034_s10 }
 0x359   :  { %612 = vrot.lane.b32.xlu1 %v4173_v50, %s4036_s12 }
 0x384   :  { %v301_v51 = vpop.xlane.xlu2 %300 }
 0x385   :  { %v302_v52 = vsub.f32 %v297_v43, %v301_v51 }
 0x387   :  { %v303_v53 = vmul.f32 1.442695, %v302_v52 }
 0x389   :  { %3706 = vpow2.f32 %v303_v53 }
 0x38f   :  { %v3707_v54 = vpop.eup %3706 }
 0x390   :  { %v305_v55 = vsel %vm144_vm1, %v3707_v54, 0.0 }
 0x391   :  { %306 = vadd.xlane.f32.xlu0 %v305_v55 }
 0x3a3   :  { %v366_v56 = vpop.xlane.xlu1 %365 }
 0x3a4   :  { %v367_v57 = vsub.f32 %v362_v48, %v366_v56 }
 0x3a5   :  { %419 = vrot.lane.b32.xlu0 %v4173_v50, %s4030_s27 }
 0x3a6   :  { %v368_v58 = vmul.f32 1.442695, %v367_v57 }
 0x3a8   :  { %3708 = vpow2.f32 %v368_v58 }
 0x3ad   :  { %482 = vrot.lane.b32.xlu0 %v4173_v50, %s4029_s26 }
 0x3ae   :  { %v3709_v59 = vpop.eup %3708 }
 0x3af   :  { %v370_v60 = vsel %vm144_vm1, %v3709_v59, 0.0 }
 0x3b0   :  { %371 = vadd.xlane.f32.xlu2 %v370_v60  ;;  %v4229_v60 = vld [vmem:[#allocation7 + $0x101] ss:$0 sm:$0xff] }
 0x3b5   :  { %547 = vrot.lane.b32.xlu0 %v4173_v50, %s4035_s11 }
 0x3bb   :  { %v376_v61 = vpop.permute.xlu1 %375 }
 0x3bc   :  { %396 = vmatpush.msrb.mxu1 %v376_v61 }
 0x3c8   :  { %310 = vrot.lane.b32.xlu2 %v4124_v7, %s4038_s16  ;;  %v550_v7 = vpop.permute.xlu1 %549 }
 0x3d0   :  { %484 = vrot.lane.b32.xlu2 %v4173_v50, %s4032_s29  ;;  %v613_v13 = vpop.permute.xlu1 %612 }
 0x3d8   :  { %614 = vrot.lane.b32.xlu2 %v4173_v50, %s4033_s0 }
 0x3e0   :  { %402 = vrot.lane.b32.xlu2 %v268_v46, %s4024_s14 }
 0x404   :  { %v307_v62 = vpop.xlane.xlu0 %306 }
 0x405   :  { %3710 = vrcp.f32 %v307_v62 }
 0x40b   :  { %v3711_v0 = vpop.eup %3710 }
 0x40c   :  { %v309_v5 = vmul.f32 %v3711_v0, %v3707_v54 }
 0x417   :  { %v420_v1 = vpop.permute.xlu0 %419 }
 0x41f   :  { %v483_v9 = vpop.permute.xlu0 %482 }
 0x423   :  { %v372_v63 = vpop.xlane.xlu2 %371 }
 0x424   :  { %3712 = vrcp.f32 %v372_v63 }
 0x427   :  { %v548_v12 = vpop.permute.xlu0 %547 }
 0x42a   :  { %v3713_v2 = vpop.eup %3712 }
 0x42b   :  { %v311_v3 = vpop.permute.xlu2 %310  ;;  %v374_v6 = vmul.f32 %v3713_v2, %v3709_v59 }
 0x42c   :  { %331 = vmatpush.msrb.mxu3 %v311_v3 }
 0x42d   :  { %3429 = vmatmul.msk.f32.vlgmr.msrb.gmra.mxu3 %vm144_vm1, %v309_v5  ;;  %3432 = vmatmul.msk.f32.vlgmr.msrb.gmra.mxu1 %vm144_vm1, %v374_v6  ;;  %v4041_v5 = vmov 0  }
 0x42e   :  { %3433 = vmatpush.xpose.msk.msra.mxu3 %vm144_vm1, %v420_v1  ;;  %3588 = vset.pattern.permute.xlu1 %v4041_v5 }
 0x42f   :  { %3669 = vset.pattern.permute.xlu0 %v4041_v5 }
 0x432   :  { %3439 = vmatpush.xpose.msk.msrb.mxu3 %vm144_vm1, %v550_v7 }
 0x433   :  { %v485_v10 = vpop.permute.xlu2 %484 }
 0x434   :  { %3436 = vmatpush.xpose.msk.msrb.mxu2 %vm144_vm1, %v485_v10  ;;  %v842_v10 = vld [vmem:[#allocation7 + $0x78] sm:$0xff] }
 0x435   :  { %3434 = vmatmul.msk.f32.vlgmr.msra.gmra.mxu3 %vm144_vm1, %v4173_v50 }
 0x436   :  { %716 = vmatpush.msra.mxu3 %v695_v29 }
 0x437   :  { %3437 = vmatmul.msk.f32.vlgmr.msrb.gmra.mxu2 %vm144_vm1, %v483_v9 }
 0x438   :  { %717 = vmatpush.msra.mxu3 %v694_v30 }
 0x43a   :  { %718 = vmatpush.msra.mxu3 %v693_v31 }
 0x43b   :  { %v615_v11 = vpop.permute.xlu2 %614 }
 0x43c   :  { %3442 = vmatpush.xpose.msk.msra.mxu2 %vm144_vm1, %v615_v11  ;;  %719 = vmatpush.msra.mxu3 %v692_v32  ;;  %v841_v11 = vld [vmem:[#allocation7 + $0x70] sm:$0xff] }
 0x43d   :  { %3440 = vmatmul.msk.f32.vlgmr.msrb.gmra.mxu3 %vm144_vm1, %v548_v12  ;;  %v840_v12 = vld [vmem:[#allocation7 + $0x68] sm:$0xff] }
 0x43f   :  { %3443 = vmatmul.msk.f32.vlgmr.msra.gmra.mxu2 %vm144_vm1, %v613_v13  ;;  %v839_v13 = vld [vmem:[#allocation7 + $0x60] sm:$0xff] }
 0x440   :  { %869 = vmatpush.msrb.mxu2 %v842_v10 }
 0x442   :  { %870 = vmatpush.msrb.mxu2 %v841_v11 }
 0x443   :  { %v403_v33 = vpop.permute.xlu2 %402 }
 0x444   :  { %v413_v34 = vsel %vm144_vm1, %v4167_v45, %v403_v33  ;;  %871 = vmatpush.msrb.mxu2 %v840_v12 }
 0x446   :  { %872 = vmatpush.msrb.mxu2 %v839_v13 }
 0x4aa   :  { %v398_v14 = vpop.f32.mrf.mxu1 }
 0x4ab   :  { %410 = vrot.lane.b32.xlu1 %v398_v14, %s4039_s17  ;;  %v97_v14 = vld [vmem:[#allocation2] sm:$0xff] }
 0x4ac   :  { %3449 = vmatmul.msk.f32.vlgmr.msrb.gmra.mxu2 %vm111_vm0, %v97_v14 }
 0x4b0   :  { %v333_v15 = vpop.f32.mrf.mxu3 }
 0x4b1   :  { %406 = vrot.lane.b32.xlu0 %v333_v15, %s4040_s18 }
 0x4b8   :  { %v442_v17 = vpop.f32.mrf.mxu3 }
 0x4b9   :  { %v443_v18 = vadd.f32 %v442_v17, %v102_v16 }
 0x4ba   :  { %v507_v19 = vpop.f32.mrf.mxu2 }
 0x4bb   :  { %v445_v20 = vsel %vm144_vm1, %v443_v18, -inf  ;;  %v508_v27 = vadd.f32 %v507_v19, %v102_v16 }
 0x4bc   :  { %446 = vmax.xlane.f32.xlu2 %v445_v20 }
 0x4bd   :  { %v510_v28 = vsel %vm144_vm1, %v508_v27, -inf }
 0x4c0   :  { %v572_v24 = vpop.f32.mrf.mxu3 }
 0x4c1   :  { %v573_v25 = vadd.f32 %v572_v24, %v102_v16  ;;  %v4042_v24 = vmov 32.0  }
 0x4c2   :  { %v637_v21 = vpop.f32.mrf.mxu2 }
 0x4c3   :  { %v638_v22 = vadd.f32 %v637_v21, %v102_v16  ;;  %v575_v26 = vsel %vm144_vm1, %v573_v25, -inf  ;;  %v98_v16 = vld [vmem:[#allocation2 + $0x8] sm:$0xff] }
 0x4c4   :  { %3450 = vmatmul.msk.f32.gmra.mxu2 %vm111_vm0, %v98_v16 }
 0x4c5   :  { %v640_v23 = vsel %vm144_vm1, %v638_v22, -inf }
 0x4c6   :  { %641 = vmax.xlane.f32.xlu2 %v640_v23 }
 0x4d5   :  { %576 = vmax.xlane.f32.xlu1 %v575_v26 }
 0x4db   :  { %511 = vmax.xlane.f32.xlu0 %v510_v28 }
 0x51d   :  { %v411_v36 = vpop.permute.xlu1 %410 }
 0x523   :  { %v407_v35 = vpop.permute.xlu0 %406 }
 0x524   :  { %v415_v37 = vsel %vm414_vm2, %v413_v34, %v407_v35 }
 0x525   :  { %v417_v38 = vsel %vm416_vm3, %v415_v37, %v411_v36 }
 0x526   :  { %3445 = vmatmul.msk.f32.vlgmr.msra.gmra.mxu3 %vm111_vm0, %v417_v38 }
 0x52f   :  { %v447_v39 = vpop.xlane.xlu2 %446 }
 0x530   :  { %v448_v40 = vsub.f32 %v443_v18, %v447_v39 }
 0x532   :  { %v449_v41 = vmul.f32 1.442695, %v448_v40 }
 0x534   :  { %3714 = vpow2.f32 %v449_v41 }
 0x539   :  { %v642_v45 = vpop.xlane.xlu2 %641 }
 0x53a   :  { %v3715_v42 = vpop.eup %3714  ;;  %v643_v51 = vsub.f32 %v638_v22, %v642_v45 }
 0x53b   :  { %v451_v43 = vsel %vm144_vm1, %v3715_v42, 0.0 }
 0x53c   :  { %452 = vadd.xlane.f32.xlu2 %v451_v43  ;;  %v644_v55 = vmul.f32 1.442695, %v643_v51 }
 0x548   :  { %v577_v44 = vpop.xlane.xlu1 %576 }
 0x549   :  { %v578_v46 = vsub.f32 %v573_v25, %v577_v44  ;;  %v807_v44 = vld [vmem:[#allocation7 + $0x58] sm:$0xff] }
 0x54b   :  { %v579_v47 = vmul.f32 1.442695, %v578_v46 }
 0x54d   :  { %3716 = vpow2.f32 %v579_v47  ;;  %v806_v47 = vld [vmem:[#allocation7 + $0x50] sm:$0xff] }
 0x54e   :  { %v512_v48 = vpop.xlane.xlu0 %511 }
 0x54f   :  { %v513_v49 = vsub.f32 %v508_v27, %v512_v48  ;;  %v805_v48 = vld [vmem:[#allocation7 + $0x48] sm:$0xff] }
 0x551   :  { %v514_v52 = vmul.f32 1.442695, %v513_v49 }
 0x553   :  { %v4217_v53 = vpop.eup %3716  ;;  %3718 = vpow2.f32 %v514_v52  ;;  %v4257_v52 = vld [vmem:[#allocation7 + $0x108] ss:$0 sm:$0xff] }
 0x554   :  { %456 = vrot.lane.b32.xlu2 %v4173_v50, %s4028_s25  ;;  %v581_v54 = vsel %vm144_vm1, %v4217_v53, 0.0  ;;  %3720 = vpow2.f32 %v644_v55 }
 0x555   :  { %582 = vadd.xlane.f32.xlu1 %v581_v54 }
 0x559   :  { %v3719_v56 = vpop.eup %3718 }
 0x55a   :  { %v516_v57 = vsel %vm144_vm1, %v3719_v56, 0.0  ;;  %v3721_v58 = vpop.eup %3720 }
 0x55b   :  { %517 = vadd.xlane.f32.xlu0 %v516_v57  ;;  %v646_v59 = vsel %vm144_vm1, %v3721_v58, 0.0 }
 0x55c   :  { %651 = vrot.lane.b32.xlu2 %v4173_v50, %s4037_s15 }
 0x563   :  { %647 = vadd.xlane.f32.xlu0 %v646_v59 }
 0x56e   :  { %521 = vrot.lane.b32.xlu1 %v4173_v50, %s4031_s28 }
 0x5a9   :  { %v721_v61 = vpop.f32.mrf.mxu3 }
 0x5aa   :  { %v722_v62 = vadd.f32 %v4229_v60, %v721_v61 }
 0x5ac   :  { %v4233_v63 = vadd.f32 %v722_v62, %v4117_v4  ;;  %v95_v4 = vld [vmem:[%s4902_s2] sm:$0xff]  ;;  %v874_v62 = vpop.f32.mrf.mxu2 }
 0x5ae   :  { %v731_v0 = vsel %vm111_vm0, %v4233_v63, 0.0  ;;  %v746_v1 = vmul.f32 %v4233_v63, %v4233_v63 }
 0x5af   :  { %732 = vadd.xlane.f32.xlu0 %v731_v0  ;;  %v453_v2 = vpop.xlane.xlu2 %452 }
 0x5b0   :  { %3722 = vrcp.f32 %v453_v2  ;;  %v748_v3 = vsel %vm111_vm0, %v746_v1, 0.0 }
 0x5b1   :  { %749 = vadd.xlane.f32.xlu1 %v748_v3 }
 0x5b4   :  { %v877_v0 = vpop.f32.mrf.mxu2 }
 0x5b6   :  { %v3723_v6 = vpop.eup %3722 }
 0x5b7   :  { %v455_v7 = vmul.f32 %v3723_v6, %v3715_v42  ;;  %v457_v9 = vpop.permute.xlu2 %456 }
 0x5b8   :  { %477 = vmatpush.msra.mxu0 %v457_v9  ;;  %v4285_v9 = vld [vmem:[#allocation7 + $0x102] ss:$0 sm:$0xff] }
 0x5b9   :  { %3435 = vmatmul.msk.f32.vlgmr.msra.gmra.mxu0 %vm144_vm1, %v455_v7 }
 0x5bf   :  { %v652_v21 = vpop.permute.xlu2 %651 }
 0x5c3   :  { %586 = vrot.lane.b32.xlu0 %v4173_v50, %s4038_s16 }
 0x5c8   :  { %v583_v50 = vpop.xlane.xlu1 %582 }
 0x5ca   :  { %794 = vperm.xlu1 %3588, %v95_v4  }
 0x5ce   :  { %v518_v15 = vpop.xlane.xlu0 %517 }
 0x5cf   :  { %3724 = vrcp.f32 %v518_v15 }
 0x5d5   :  { %v3725_v18 = vpop.eup %3724 }
 0x5d6   :  { %v648_v17 = vpop.xlane.xlu0 %647  ;;  %v520_v19 = vmul.f32 %v3725_v18, %v3719_v56  ;;  %v4259_v56 = vld [vmem:[#allocation7 + $0x109] ss:$0 sm:$0xff] }
 0x5d7   :  { %3726 = vrcp.f32 %v648_v17 }
 0x5d8   :  { %3728 = vrcp.f32 %v4042_v24 }
 0x5dd   :  { %v3727_v22 = vpop.eup %3726 }
 0x5de   :  { %v650_v23 = vmul.f32 %v3727_v22, %v3721_v58  ;;  %v3729_v25 = vpop.eup %3728 }
 0x5df   :  { %v738_v26 = vmul.f32 32.0, %v3729_v25  ;;  %vm742_vm4 = vweird.f32 %v3729_v25 }
 0x5e0   :  { %v522_v20 = vpop.permute.xlu1 %521 }
 0x5e1   :  { %542 = vmatpush.msra.mxu1 %v522_v20  ;;  %v739_v27 = vsub.f32 1.0, %v738_v26 }
 0x5e2   :  { %3438 = vmatmul.msk.f32.vlgmr.msra.gmra.mxu1 %vm144_vm1, %v520_v19  ;;  %v4304_v19 = vld [vmem:[%s4904_s4] ss:$0 sm:$0xff] }
 0x5e3   :  { %672 = vmatpush.msrb.mxu1 %v652_v21  ;;  %v740_v28 = vmul.f32 %v3729_v25, %v739_v27  ;;  %v96_v27 = vld [vmem:[%s4902_s2 + $0x8] sm:$0xff] }
 0x5e5   :  { %v741_v29 = vadd.f32 %v3729_v25, %v740_v28 }
 0x5e7   :  { %v4250_v30 = vsel %vm742_vm4, %v3729_v25, %v741_v29 }
 0x5ea   :  { %3444 = vmatmul.msk.f32.vlgmr.msrb.gmra.mxu1 %vm144_vm1, %v650_v23 }
 0x622   :  { %v733_v31 = vpop.xlane.xlu0 %732 }
 0x623   :  { %v744_v32 = vmul.f32 %v4250_v30, %v733_v31 }
 0x624   :  { %v750_v33 = vpop.xlane.xlu1 %749 }
 0x625   :  { %v758_v34 = vmul.f32 %v744_v32, %v744_v32  ;;  %v754_v35 = vmul.f32 %v750_v33, %v4250_v30  ;;  %v756_v51 = vsub.f32 %v4233_v63, %v744_v32  ;;  %v4270_v63 = vld [vmem:[#allocation7 + $0x103] ss:$0 sm:$0xff] }
 0x626   :  { %v4273_v1 = vadd.f32 %v4270_v63, %v877_v0  ;;  %v875_v3 = vadd.f32 %v4270_v63, %v874_v62 }
 0x627   :  { %v760_v36 = vsub.f32 %v754_v35, %v758_v34 }
 0x628   :  { %3453 = vmatpush.xpose.msk.msra.mxu1 %vm144_vm1, %v4273_v1 }
 0x629   :  { %v762_v37 = vadd.f32 1e-05, %v760_v36 }
 0x62b   :  { %3730 = vrsqrt.f32 %v762_v37  ;;  %vm770_vm6 = vweird.f32 %v762_v37 }
 0x62c   :  { %3732 = vrcp.f32 %v583_v50  ;;  %3454 = vmatpush.xpose.msk.msra.mxu1 %vm144_vm1, %v875_v3 }
 0x631   :  { %v3731_v38 = vpop.eup %3730 }
 0x632   :  { %v3733_v39 = vpop.eup %3732  ;;  %v765_v40 = vmul.f32 %v3731_v38, %v762_v37  ;;  %vm771_vm5 = vweird.f32 %v3731_v38  ;;  %v4330_v37 = vpack.i.bf16 %v875_v3, %v4273_v1 }
 0x633   :  { %v585_v42 = vmul.f32 %v3733_v39, %v4217_v53  ;;  %vm772_vm7 = vmor %vm770_vm6, %vm771_vm5  ;;  %v804_v53 = vld [vmem:[#allocation7 + $0x40] sm:$0xff] }
 0x634   :  { %v766_v41 = vmul.f32 %v3731_v38, %v765_v40 }
 0x635   :  { %v587_v43 = vpop.permute.xlu0 %586 }
 0x636   :  { %v767_v46 = vmul.f32 0.5, %v766_v41  ;;  %607 = vmatpush.msrb.mxu0 %v587_v43  ;;  %v479_v6 = vpop.f32.mrf.mxu0 }
 0x637   :  { %3441 = vmatmul.msk.f32.vlgmr.msrb.gmra.mxu0 %vm144_vm1, %v585_v42 }
 0x638   :  { %v768_v45 = vsub.f32 1.5, %v767_v46  ;;  %828 = vmatpush.msra.mxu0 %v807_v44 }
 0x63a   :  { %v769_v49 = vmul.f32 %v3731_v38, %v768_v45  ;;  %829 = vmatpush.msra.mxu0 %v806_v47 }
 0x63c   :  { %v773_v54 = vsel %vm772_vm7, %v3731_v38, %v769_v49  ;;  %830 = vmatpush.msra.mxu0 %v805_v48  ;;  %v4262_v58 = vpop.permute.xlu1 %794  ;;  %v99_v49 = vld [vmem:[#allocation2 + $0x10] sm:$0xff] }
 0x63d   :  { %v784_v55 = vmul.f32 %v773_v54, %v756_v51  ;;  %3451 = vmatmul.msk.f32.gmra.mxu2 %vm111_vm0, %v99_v49 }
 0x63e   :  { %831 = vmatpush.msra.mxu0 %v804_v53 }
 0x63f   :  { %v787_v57 = vmul.f32 %v4257_v52, %v784_v55 }
 0x641   :  { %v790_v59 = vadd.f32 %v4259_v56, %v787_v57  ;;  %v100_v57 = vld [vmem:[#allocation2 + $0x18] sm:$0xff] }
 0x643   :  { %v4266_v61 = vmul.f32 %v4262_v58, %v790_v59 }
 0x645   :  { %3447 = vmatmul.msk.f32.vlgmr.msra.gmra.mxu0 %vm111_vm0, %v4266_v61  ;;  %3452 = vmatmul.msk.f32.gmra.mxu2 %vm111_vm0, %v100_v57 }
 0x65f   :  { %v544_v2 = vpop.f32.mrf.mxu1 }
 0x660   :  { %678 = vrot.lane.b32.xlu0 %v544_v2, %s4024_s14 }
 0x667   :  { %v674_v5 = vpop.f32.mrf.mxu1 }
 0x668   :  { %686 = vrot.lane.b32.xlu1 %v674_v5, %s4039_s17  ;;  %962 = vrot.lane.b32.xlu0 %v4273_v1, %s4029_s26 }
 0x6b4   :  { %v609_v7 = vpop.f32.mrf.mxu0 }
 0x6b5   :  { %682 = vrot.lane.b32.xlu2 %v609_v7, %s4040_s18 }
 0x6bd   :  { %960 = vrot.lane.b32.xlu2 %v875_v3, %s4029_s26 }
 0x6c2   :  { %v833_v4 = vpop.f32.mrf.mxu0 }
 0x6c3   :  { %v4288_v10 = vadd.f32 %v4285_v9, %v833_v4 }
 0x6c5   :  { %3455 = vmatmul.msk.f32.vlgmr.msra.gmra.mxu1 %vm144_vm1, %v4288_v10  ;;  %958 = vrot.lane.b32.xlu1 %v4288_v10, %s4029_s26 }
 0x6d2   :  { %v679_v11 = vpop.permute.xlu0 %678 }
 0x6d3   :  { %v689_v13 = vsel %vm144_vm1, %v479_v6, %v679_v11 }
 0x6da   :  { %v963_v12 = vpop.permute.xlu0 %962  ;;  %v687_v15 = vpop.permute.xlu1 %686 }
 0x6db   :  { %3457 = vmatpush.xpose.msk.msrb.mxu3 %vm144_vm1, %v963_v12 }
 0x70f   :  { %v683_v14 = vpop.permute.xlu2 %682 }
 0x710   :  { %v690_v16 = vsel %vm414_vm2, %v689_v13, %v683_v14 }
 0x711   :  { %v691_v50 = vsel %vm416_vm3, %v690_v16, %v687_v15 }
 0x712   :  { %3446 = vmatmul.msk.f32.gmra.mxu3 %vm111_vm0, %v691_v50 }
 0x717   :  { %v961_v17 = vpop.permute.xlu2 %960 }
 0x718   :  { %3458 = vmatpush.xpose.msk.msrb.mxu3 %vm144_vm1, %v961_v17 }
 0x737   :  { %v959_v18 = vpop.permute.xlu1 %958 }
 0x738   :  { %3459 = vmatmul.msk.f32.vlgmr.msrb.gmra.mxu3 %vm144_vm1, %v959_v18 }
 0x742   :  { %v915_v20 = vpop.f32.mrf.mxu1 }
 0x743   :  { %v916_v21 = vadd.f32 %v4304_v19, %v915_v20 }
 0x745   :  { %v918_v22 = vsel %vm414_vm2, %v916_v21, -inf }
 0x746   :  { %919 = vmax.xlane.f32.xlu0 %v918_v22 }
 0x75a   :  { %1034 = vrot.lane.b32.xlu0 %v4273_v1, %s4035_s11 }
 0x762   :  { %1030 = vrot.lane.b32.xlu0 %v4288_v10, %s4035_s11 }
 0x795   :  { %v724_v23 = vpop.f32.mrf.mxu3 }
 0x796   :  { %v725_v24 = vadd.f32 %v4229_v60, %v724_v23 }
 0x798   :  { %v4314_v25 = vadd.f32 %v725_v24, %v4139_v8 }
 0x79a   :  { %v734_v26 = vsel %vm111_vm0, %v4314_v25, 0.0  ;;  %v747_v60 = vmul.f32 %v4314_v25, %v4314_v25 }
 0x79b   :  { %735 = vadd.xlane.f32.xlu1 %v734_v26 }
 0x79c   :  { %v751_v36 = vsel %vm111_vm0, %v747_v60, 0.0 }
 0x7b4   :  { %799 = vperm.xlu1 %3588, %v96_v27  }
 0x7b9   :  { %v920_v28 = vpop.xlane.xlu0 %919 }
 0x7ba   :  { %v921_v29 = vsub.f32 %v916_v21, %v920_v28 }
 0x7bb   :  { %v987_v31 = vpop.f32.mrf.mxu3 }
 0x7bc   :  { %v922_v32 = vmul.f32 1.442695, %v921_v29  ;;  %v988_v33 = vadd.f32 %v4304_v19, %v987_v31  ;;  %1032 = vrot.lane.b32.xlu1 %v875_v3, %s4035_s11  ;;  %v880_v31 = vpop.f32.mrf.mxu2 }
 0x7be   :  { %3734 = vpow2.f32 %v922_v32  ;;  %v990_v8 = vsel %vm414_vm2, %v988_v33, -inf  ;;  %v4370_v32 = vadd.f32 %v4270_v63, %v880_v31 }
 0x7bf   :  { %991 = vmax.xlane.f32.xlu2 %v990_v8 }
 0x7c4   :  { %v3735_v34 = vpop.eup %3734  ;;  %1104 = vrot.lane.b32.xlu1 %v875_v3, %s4036_s12 }
 0x7c5   :  { %v924_v35 = vsel %vm414_vm2, %v3735_v34, 0.0 }
 0x7c6   :  { %925 = vadd.xlane.f32.xlu0 %v924_v35 }
 0x7c7   :  { %752 = vadd.xlane.f32.xlu2 %v751_v36 }
 0x7cc   :  { %v1035_v38 = vpop.permute.xlu0 %1034 }
 0x7d4   :  { %v1031_v39 = vpop.permute.xlu0 %1030 }
 0x7df   :  { %3590 = vrot.lane.b32.xlu2 %v4330_v37, %s4030_s27 }
 0x7e7   :  { %3595 = vrot.lane.b32.xlu2 %v4330_v37, %s4032_s29 }
 0x7ef   :  { %1106 = vrot.lane.b32.xlu2 %v4273_v1, %s4036_s12 }
 0x80e   :  { %v736_v42 = vpop.xlane.xlu1 %735 }
 0x80f   :  { %v745_v44 = vmul.f32 %v4250_v30, %v736_v42 }
 0x811   :  { %v759_v45 = vmul.f32 %v745_v44, %v745_v44  ;;  %v757_v50 = vsub.f32 %v4314_v25, %v745_v44 }
 0x826   :  { %v4342_v59 = vpop.permute.xlu1 %799 }
 0x82e   :  { %v1033_v12 = vpop.permute.xlu1 %1032 }
 0x832   :  { %v992_v40 = vpop.xlane.xlu2 %991 }
 0x833   :  { %v993_v41 = vsub.f32 %v988_v33, %v992_v40  ;;  %v883_v33 = vpop.f32.mrf.mxu2 }
 0x834   :  { %v4375_v8 = vadd.f32 %v4270_v63, %v883_v33 }
 0x835   :  { %v994_v43 = vmul.f32 1.442695, %v993_v41 }
 0x836   :  { %v1105_v22 = vpop.permute.xlu1 %1104 }
 0x837   :  { %3736 = vpow2.f32 %v994_v43 }
 0x839   :  { %v926_v46 = vpop.xlane.xlu0 %925 }
 0x83a   :  { %v753_v47 = vpop.xlane.xlu2 %752  ;;  %3738 = vrcp.f32 %v926_v46 }
 0x83b   :  { %v755_v48 = vmul.f32 %v753_v47, %v4250_v30 }
 0x83d   :  { %v3737_v51 = vpop.eup %3736  ;;  %v761_v53 = vsub.f32 %v755_v48, %v759_v45 }
 0x83e   :  { %v996_v54 = vsel %vm414_vm2, %v3737_v51, 0.0 }
 0x83f   :  { %v763_v55 = vadd.f32 1e-05, %v761_v53  ;;  %997 = vadd.xlane.f32.xlu0 %v996_v54 }
 0x840   :  { %v3739_v0 = vpop.eup %3738 }
 0x841   :  { %3740 = vrsqrt.f32 %v763_v55  ;;  %v928_v3 = vmul.f32 %v3739_v0, %v3735_v34  ;;  %vm780_vm9 = vweird.f32 %v763_v55 }
 0x842   :  { %v3591_v62 = vpop.permute.xlu2 %3590 }
 0x843   :  { %v3592_v1 = vunpack.i.l.bf16 %v3591_v62  ;;  %v3593_v2 = vunpack.i.h.bf16 %v3591_v62 }
 0x845   :  { %952 = vmatpush.msrb.mxu1 %v3592_v1 }
 0x847   :  { %v3741_v5 = vpop.eup %3740  ;;  %953 = vmatpush.msrb.mxu1 %v3593_v2 }
 0x848   :  { %v775_v6 = vmul.f32 %v3741_v5, %v763_v55  ;;  %3456 = vmatmul.msk.f32.vlgmr.msrb.gmra.mxu1 %vm414_vm2, %v928_v3  ;;  %vm781_vm8 = vweird.f32 %v3741_v5 }
 0x849   :  { %3461 = vmatpush.xpose.msk.msra.mxu1 %vm144_vm1, %v1035_v38  ;;  %vm782_vm10 = vmor %vm780_vm9, %vm781_vm8 }
 0x84a   :  { %v776_v7 = vmul.f32 %v3741_v5, %v775_v6  ;;  %v3596_v4 = vpop.permute.xlu2 %3595 }
 0x84b   :  { %v3597_v11 = vunpack.i.l.bf16 %v3596_v4  ;;  %v3598_v14 = vunpack.i.h.bf16 %v3596_v4 }
 0x84c   :  { %v777_v13 = vmul.f32 0.5, %v776_v7 }
 0x84d   :  { %3462 = vmatpush.xpose.msk.msra.mxu1 %vm144_vm1, %v1033_v12  ;;  %1024 = vmatpush.msrb.mxu0 %v3597_v11 }
 0x84e   :  { %v778_v15 = vsub.f32 1.5, %v777_v13  ;;  %v3677_v13 = vld [vmem:[%s4904_s4 + $0x1] ss:$0 sm:$0xff] }
 0x84f   :  { %1025 = vmatpush.msrb.mxu0 %v3598_v14 }
 0x850   :  { %v779_v16 = vmul.f32 %v3741_v5, %v778_v15  ;;  %3463 = vmatmul.msk.f32.vlgmr.msra.gmra.mxu1 %vm144_vm1, %v1031_v39 }
 0x852   :  { %v1107_v17 = vpop.permute.xlu2 %1106  ;;  %v783_v18 = vsel %vm782_vm10, %v3741_v5, %v779_v16 }
 0x853   :  { %1102 = vrot.lane.b32.xlu0 %v4288_v10, %s4036_s12  ;;  %3465 = vmatpush.xpose.msk.msra.mxu0 %vm144_vm1, %v1107_v17  ;;  %v785_v20 = vmul.f32 %v783_v18, %v757_v50 }
 0x855   :  { %v788_v21 = vmul.f32 %v4257_v52, %v785_v20 }
 0x857   :  { %3466 = vmatpush.xpose.msk.msra.mxu0 %vm144_vm1, %v1105_v22  ;;  %v791_v23 = vadd.f32 %v4259_v56, %v788_v21 }
 0x859   :  { %v4357_v24 = vmul.f32 %v4342_v59, %v791_v23 }
 0x85b   :  { %3448 = vmatmul.msk.f32.gmra.mxu0 %vm111_vm0, %v4357_v24 }
 0x8b2   :  { %v998_v25 = vpop.xlane.xlu0 %997 }
 0x8b3   :  { %3742 = vrcp.f32 %v998_v25 }
 0x8b9   :  { %v3743_v26 = vpop.eup %3742 }
 0x8ba   :  { %v1000_v10 = vmul.f32 %v3743_v26, %v3737_v51 }
 0x8bc   :  { %3460 = vmatmul.msk.f32.vlgmr.msrb.gmra.mxu0 %vm414_vm2, %v1000_v10 }
 0x8c5   :  { %v1103_v27 = vpop.permute.xlu0 %1102  ;;  %v4362_v28 = vpop.f32.mrf.mxu1 }
 0x8c6   :  { %3467 = vmatmul.msk.f32.vlgmr.msra.gmra.mxu0 %vm144_vm1, %v1103_v27 }
 0x8cd   :  { %v1059_v52 = vpop.f32.mrf.mxu1 }
 0x8ce   :  { %v1060_v56 = vadd.f32 %v4304_v19, %v1059_v52 }
 0x8d0   :  { %v1062_v29 = vsel %vm414_vm2, %v1060_v56, -inf }
 0x8d1   :  { %1063 = vmax.xlane.f32.xlu2 %v1062_v29 }
 0x8d8   :  { %v836_v60 = vpop.f32.mrf.mxu0 }
 0x8d9   :  { %v837_v34 = vadd.f32 %v4285_v9, %v836_v60 }
 0x8e9   :  { %3600 = vrot.lane.b32.xlu2 %v4330_v37, %s4034_s10 }
 0x8f1   :  { %1335 = vrot.lane.b32.xlu2 %v4370_v32, %s4035_s11 }
 0x8f9   :  { %1265 = vrot.lane.b32.xlu2 %v4375_v8, %s4029_s26 }
 0x901   :  { %1409 = vrot.lane.b32.xlu2 %v4375_v8, %s4036_s12 }
 0x909   :  { %1405 = vrot.lane.b32.xlu2 %v837_v34, %s4036_s12 }
 0x939   :  { %v1027_v35 = vpop.f32.mrf.mxu0 }
 0x943   :  { %v1131_v36 = vpop.f32.mrf.mxu0 }
 0x944   :  { %v1132_v38 = vadd.f32 %v4304_v19, %v1131_v36  ;;  %v1064_v39 = vpop.xlane.xlu2 %1063  ;;  %v1493_v36 = vld [vmem:[#allocation7 + $0x88] sm:$0xff] }
 0x945   :  { %v1065_v40 = vsub.f32 %v1060_v56, %v1064_v39  ;;  %v1492_v39 = vld [vmem:[#allocation7 + $0x80] sm:$0xff] }
 0x946   :  { %v1134_v63 = vsel %vm414_vm2, %v1132_v38, -inf }
 0x947   :  { %v1066_v41 = vmul.f32 1.442695, %v1065_v40  ;;  %1135 = vmax.xlane.f32.xlu1 %v1134_v63 }
 0x949   :  { %3744 = vpow2.f32 %v1066_v41 }
 0x94c   :  { %v3601_v42 = vpop.permute.xlu2 %3600 }
 0x94d   :  { %v3602_v43 = vunpack.i.l.bf16 %v3601_v42  ;;  %v3603_v46 = vunpack.i.h.bf16 %v3601_v42 }
 0x94f   :  { %v3745_v44 = vpop.eup %3744  ;;  %1096 = vmatpush.msra.mxu3 %v3602_v43 }
 0x950   :  { %v1068_v9 = vsel %vm414_vm2, %v3745_v44, 0.0 }
 0x951   :  { %1069 = vadd.xlane.f32.xlu0 %v1068_v9  ;;  %1097 = vmatpush.msra.mxu3 %v3603_v46 }
 0x953   :  { %3469 = vmatpush.xpose.msk.msrb.mxu3 %vm144_vm1, %v4375_v8 }
 0x954   :  { %v1336_v19 = vpop.permute.xlu2 %1335 }
 0x957   :  { %3470 = vmatpush.xpose.msk.msrb.mxu3 %vm144_vm1, %v4370_v32 }
 0x95c   :  { %v1266_v47 = vpop.permute.xlu2 %1265 }
 0x95d   :  { %3473 = vmatpush.xpose.msk.msra.mxu2 %vm144_vm1, %v1266_v47 }
 0x964   :  { %v1410_v3 = vpop.permute.xlu2 %1409 }
 0x965   :  { %3605 = vrot.lane.b32.xlu0 %v4330_v37, %s4033_s0 }
 0x96c   :  { %v1406_v17 = vpop.permute.xlu2 %1405 }
 0x96d   :  { %1333 = vrot.lane.b32.xlu0 %v837_v34, %s4035_s11 }
 0x975   :  { %1263 = vrot.lane.b32.xlu0 %v4370_v32, %s4029_s26 }
 0x97d   :  { %1407 = vrot.lane.b32.xlu0 %v4370_v32, %s4036_s12 }
 0x9ba   :  { %v1136_v45 = vpop.xlane.xlu1 %1135 }
 0x9bb   :  { %v1137_v48 = vsub.f32 %v1132_v38, %v1136_v45  ;;  %v3614_v38 = vpack.i.bf16 %v4370_v32, %v4375_v8  ;;  %v4440_v45 = vld [vmem:[#allocation7 + $0x104] ss:$0 sm:$0xff] }
 0x9bd   :  { %v1138_v49 = vmul.f32 1.442695, %v1137_v48 }
 0x9bf   :  { %3746 = vpow2.f32 %v1138_v49 }
 0x9c4   :  { %v1070_v51 = vpop.xlane.xlu0 %1069 }
 0x9c5   :  { %v3747_v53 = vpop.eup %3746  ;;  %3748 = vrcp.f32 %v1070_v51 }
 0x9c6   :  { %v1140_v54 = vsel %vm414_vm2, %v3747_v53, 0.0 }
 0x9c7   :  { %1141 = vadd.xlane.f32.xlu1 %v1140_v54 }
 0x9cb   :  { %v3749_v55 = vpop.eup %3748 }
 0x9cc   :  { %v1072_v37 = vmul.f32 %v3749_v55, %v3745_v44 }
 0x9ce   :  { %3464 = vmatmul.msk.f32.vlgmr.msra.gmra.mxu3 %vm414_vm2, %v1072_v37 }
 0x9d6   :  { %3471 = vmatmul.msk.f32.vlgmr.msrb.gmra.mxu3 %vm144_vm1, %v837_v34 }
 0x9d7   :  { %v3606_v57 = vpop.permute.xlu0 %3605 }
 0x9d8   :  { %v3607_v62 = vunpack.i.l.bf16 %v3606_v57  ;;  %v3608_v0 = vunpack.i.h.bf16 %v3606_v57 }
 0x9da   :  { %1168 = vmatpush.msrb.mxu1 %v3607_v62 }
 0x9dc   :  { %1169 = vmatpush.msrb.mxu1 %v3608_v0 }
 0x9df   :  { %v1334_v1 = vpop.permute.xlu0 %1333 }
 0x9e0   :  { %1337 = vrot.lane.b32.xlu1 %v4375_v8, %s4035_s11 }
 0x9e7   :  { %v1264_v2 = vpop.permute.xlu0 %1263 }
 0x9e8   :  { %1261 = vrot.lane.b32.xlu1 %v837_v34, %s4029_s26  ;;  %3474 = vmatpush.xpose.msk.msra.mxu2 %vm144_vm1, %v1264_v2  ;;  %v1495_v34 = vld [vmem:[#allocation7 + $0x98] sm:$0xff] }
 0x9ec   :  { %3481 = vmatpush.xpose.msk.msrb.mxu2 %vm144_vm1, %v1410_v3 }
 0x9ef   :  { %v1408_v6 = vpop.permute.xlu0 %1407 }
 0x9f0   :  { %1175 = vrot.lane.b32.xlu1 %v1027_v35, %s4024_s14  ;;  %3482 = vmatpush.xpose.msk.msrb.mxu2 %vm144_vm1, %v1408_v6  ;;  %v1494_v35 = vld [vmem:[#allocation7 + $0x90] sm:$0xff] }
 0xa3a   :  { %v1142_v5 = vpop.xlane.xlu1 %1141 }
 0xa3b   :  { %3750 = vrcp.f32 %v1142_v5 }
 0xa41   :  { %v3751_v7 = vpop.eup %3750 }
 0xa42   :  { %v1144_v4 = vmul.f32 %v3751_v7, %v3747_v53 }
 0xa44   :  { %3468 = vmatmul.msk.f32.vlgmr.msrb.gmra.mxu1 %vm414_vm2, %v1144_v4 }
 0xa51   :  { %v1099_v11 = vpop.f32.mrf.mxu3 }
 0xa52   :  { %v1338_v12 = vpop.permute.xlu1 %1337  ;;  %1179 = vrot.lane.b32.xlu0 %v1099_v11, %s4040_s18 }
 0xa53   :  { %3477 = vmatpush.xpose.msk.msra.mxu3 %vm144_vm1, %v1338_v12 }
 0xa57   :  { %3478 = vmatpush.xpose.msk.msra.mxu3 %vm144_vm1, %v1336_v19 }
 0xa59   :  { %v1218_v14 = vpop.f32.mrf.mxu3 }
 0xa5a   :  { %v1219_v15 = vadd.f32 %v3677_v13, %v1218_v14  ;;  %v1262_v16 = vpop.permute.xlu1 %1261  ;;  %3479 = vmatmul.msk.f32.vlgmr.msra.gmra.mxu3 %vm144_vm1, %v1334_v1 }
 0xa5b   :  { %3475 = vmatmul.msk.f32.vlgmr.msra.gmra.mxu2 %vm144_vm1, %v1262_v16  ;;  %1516 = vmatpush.msrb.mxu3 %v1495_v34  ;;  %v1590_v34 = vld [vmem:[#allocation7 + $0xb8] sm:$0xff] }
 0xa5c   :  { %v1221_v50 = vsel %vm414_vm2, %v1219_v15, -inf }
 0xa5d   :  { %1222 = vmax.xlane.f32.xlu2 %v1221_v50  ;;  %1517 = vmatpush.msrb.mxu3 %v1494_v35  ;;  %v4460_v35 = vld [vmem:[#allocation7 + $0x10a] ss:$0 sm:$0xff] }
 0xa5f   :  { %1518 = vmatpush.msrb.mxu3 %v1493_v36 }
 0xa61   :  { %1519 = vmatpush.msrb.mxu3 %v1492_v39  ;;  %v1589_v39 = vld [vmem:[#allocation7 + $0xb0] sm:$0xff] }
 0xa62   :  { %v1176_v40 = vpop.permute.xlu1 %1175 }
 0xa63   :  { %3483 = vmatmul.msk.f32.vlgmr.msrb.gmra.mxu2 %vm144_vm1, %v1406_v17  ;;  %v1186_v41 = vsel %vm144_vm1, %v4362_v28, %v1176_v40 }
 0xac1   :  { %v1171_v18 = vpop.f32.mrf.mxu1 }
 0xac2   :  { %1183 = vrot.lane.b32.xlu1 %v1171_v18, %s4039_s17 }
 0xac4   :  { %v1180_v63 = vpop.permute.xlu0 %1179 }
 0xac5   :  { %v1187_v42 = vsel %vm414_vm2, %v1186_v41, %v1180_v63  ;;  %v1588_v63 = vld [vmem:[#allocation7 + $0xa8] sm:$0xff] }
 0xac6   :  { %v4464_v41 = vld [vmem:[#allocation7 + $0x10b] ss:$0 sm:$0xff] }
 0xad0   :  { %v1223_v20 = vpop.xlane.xlu2 %1222 }
 0xad1   :  { %v1224_v25 = vsub.f32 %v1219_v15, %v1223_v20 }
 0xad3   :  { %v1225_v10 = vmul.f32 1.442695, %v1224_v25 }
 0xad5   :  { %3752 = vpow2.f32 %v1225_v10 }
 0xadb   :  { %v4423_v33 = vpop.eup %3752 }
 0xadc   :  { %v1227_v60 = vsel %vm414_vm2, %v4423_v33, 0.0 }
 0xadd   :  { %v1362_v21 = vpop.f32.mrf.mxu3 }
 0xade   :  { %v1363_v22 = vadd.f32 %v3677_v13, %v1362_v21  ;;  %v1290_v23 = vpop.f32.mrf.mxu2 }
 0xadf   :  { %v1291_v52 = vadd.f32 %v3677_v13, %v1290_v23 }
 0xae0   :  { %v1365_v26 = vsel %vm414_vm2, %v1363_v22, -inf }
 0xae1   :  { %1366 = vmax.xlane.f32.xlu0 %v1365_v26  ;;  %v1293_v31 = vsel %vm414_vm2, %v1291_v52, -inf }
 0xae6   :  { %v1434_v27 = vpop.f32.mrf.mxu2 }
 0xae7   :  { %v1435_v56 = vadd.f32 %v3677_v13, %v1434_v27 }
 0xae9   :  { %v1437_v29 = vsel %vm414_vm2, %v1435_v56, -inf }
 0xaea   :  { %1438 = vmax.xlane.f32.xlu2 %v1437_v29 }
 0xaec   :  { %1294 = vmax.xlane.f32.xlu1 %v1293_v31 }
 0xaf2   :  { %1228 = vadd.xlane.f32.xlu2 %v1227_v60 }
 0xb0a   :  { %3615 = vrot.lane.b32.xlu2 %v3614_v38, %s4034_s10 }
 0xb12   :  { %3625 = vrot.lane.b32.xlu2 %v3614_v38, %s4033_s0 }
 0xb34   :  { %v1184_v43 = vpop.permute.xlu1 %1183 }
 0xb35   :  { %v1188_v44 = vsel %vm416_vm3, %v1187_v42, %v1184_v43  ;;  %v1587_v42 = vld [vmem:[#allocation7 + $0xa0] sm:$0xff] }
 0xb36   :  { %3485 = vmatmul.msk.f32.vlgmr.msrb.gmra.mxu3 %vm111_vm0, %v1188_v44 }
 0xb54   :  { %v1367_v46 = vpop.xlane.xlu0 %1366 }
 0xb55   :  { %v1368_v32 = vsub.f32 %v1363_v22, %v1367_v46 }
 0xb57   :  { %v1369_v8 = vmul.f32 1.442695, %v1368_v32 }
 0xb59   :  { %3754 = vpow2.f32 %v1369_v8 }
 0xb5d   :  { %v1439_v0 = vpop.xlane.xlu2 %1438 }
 0xb5f   :  { %v4436_v9 = vpop.eup %3754  ;;  %v1295_v47 = vpop.xlane.xlu1 %1294 }
 0xb60   :  { %v1371_v19 = vsel %vm414_vm2, %v4436_v9, 0.0  ;;  %v1296_v28 = vsub.f32 %v1291_v52, %v1295_v47 }
 0xb61   :  { %1372 = vadd.xlane.f32.xlu1 %v1371_v19 }
 0xb62   :  { %v1297_v51 = vmul.f32 1.442695, %v1296_v28 }
 0xb64   :  { %3756 = vpow2.f32 %v1297_v51 }
 0xb65   :  { %v1229_v15 = vpop.xlane.xlu2 %1228 }
 0xb6a   :  { %v4446_v57 = vpop.eup %3756 }
 0xb6b   :  { %v1299_v62 = vsel %vm414_vm2, %v4446_v57, 0.0 }
 0xb6d   :  { %v3616_v23 = vpop.permute.xlu2 %3615 }
 0xb6e   :  { %v3617_v27 = vunpack.i.l.bf16 %v3616_v23  ;;  %v3618_v29 = vunpack.i.h.bf16 %v3616_v23 }
 0xb75   :  { %v3626_v8 = vpop.permute.xlu2 %3625 }
 0xb76   :  { %v3627_v47 = vunpack.i.l.bf16 %v3626_v8 }
 0xbb9   :  { %v1521_v48 = vpop.f32.mrf.mxu3 }
 0xbba   :  { %v1522_v49 = vadd.f32 %v4440_v45, %v1521_v48  ;;  %v3628_v48 = vunpack.i.h.bf16 %v3626_v8 }
 0xbbc   :  { %v1527_v53 = vadd.f32 %v1522_v49, %v4266_v61  ;;  %v1440_v61 = vsub.f32 %v1435_v56, %v1439_v0  ;;  %v1626_v0 = vld [vmem:[#allocation7 + $0xd0] sm:$0xff] }
 0xbbe   :  { %v1531_v54 = vsel %vm111_vm0, %v1527_v53, 0.0  ;;  %v1539_v55 = vmul.f32 %v1527_v53, %v1527_v53  ;;  %v1441_v1 = vmul.f32 1.442695, %v1440_v61  ;;  %v1625_v61 = vld [vmem:[#allocation7 + $0xc8] sm:$0xff] }
 0xbbf   :  { %1532 = vadd.xlane.f32.xlu0 %v1531_v54  ;;  %v1631_v54 = vld [vmem:[#allocation7 + $0xf8] sm:$0xff] }
 0xbc0   :  { %v1541_v37 = vsel %vm111_vm0, %v1539_v55, 0.0  ;;  %3758 = vpow2.f32 %v1441_v1  ;;  %1649 = vmatpush.msra.mxu2 %v1631_v54  ;;  %v1630_v55 = vld [vmem:[#allocation7 + $0xf0] sm:$0xff]  ;;  %v1624_v1 = vld [vmem:[#allocation7 + $0xc0] sm:$0xff] }
 0xbc1   :  { %1542 = vadd.xlane.f32.xlu1 %v1541_v37  ;;  %v1629_v37 = vld [vmem:[#allocation7 + $0xe8] sm:$0xff] }
 0xbc2   :  { %1650 = vmatpush.msra.mxu2 %v1630_v55 }
 0xbc4   :  { %1651 = vmatpush.msra.mxu2 %v1629_v37 }
 0xbc6   :  { %v4452_v2 = vpop.eup %3758 }
 0xbc7   :  { %v1443_v3 = vsel %vm414_vm2, %v4452_v2, 0.0 }
 0xbc9   :  { %1300 = vadd.xlane.f32.xlu1 %v1299_v62  ;;  %v1627_v62 = vld [vmem:[#allocation7 + $0xd8] sm:$0xff] }
 0xbd3   :  { %3610 = vrot.lane.b32.xlu0 %v3614_v38, %s4030_s27 }
 0xbd4   :  { %v1373_v5 = vpop.xlane.xlu1 %1372 }
 0xbe2   :  { %3620 = vrot.lane.b32.xlu1 %v3614_v38, %s4032_s29 }
 0xbfd   :  { %1444 = vadd.xlane.f32.xlu0 %v1443_v3 }
 0xc32   :  { %v1533_v6 = vpop.xlane.xlu0 %1532 }
 0xc33   :  { %v1537_v7 = vmul.f32 %v1533_v6, %v4250_v30 }
 0xc34   :  { %v1543_v4 = vpop.xlane.xlu1 %1542 }
 0xc35   :  { %v1551_v11 = vmul.f32 %v1537_v7, %v1537_v7  ;;  %v1547_v12 = vmul.f32 %v1543_v4, %v4250_v30  ;;  %v1549_v56 = vsub.f32 %v1527_v53, %v1537_v7 }
 0xc37   :  { %v1553_v13 = vsub.f32 %v1547_v12, %v1551_v11 }
 0xc39   :  { %v1555_v14 = vadd.f32 1e-05, %v1553_v13 }
 0xc3b   :  { %3760 = vrsqrt.f32 %v1555_v14  ;;  %vm1563_vm12 = vweird.f32 %v1555_v14 }
 0xc3c   :  { %3762 = vrcp.f32 %v1229_v15  ;;  %v1301_v60 = vpop.xlane.xlu1 %1300 }
 0xc3d   :  { %3764 = vrcp.f32 %v1373_v5  ;;  %v4475_v5 = vld [vmem:[#allocation7 + $0x105] ss:$0 sm:$0xff] }
 0xc3e   :  { %3766 = vrcp.f32 %v1301_v60  ;;  %v1725_v60 = vld [vmem:[#allocation7 + $0x110] sm:$0xff] }
 0xc41   :  { %v3761_v16 = vpop.eup %3760 }
 0xc42   :  { %v1558_v50 = vmul.f32 %v3761_v16, %v1555_v14  ;;  %v3763_v20 = vpop.eup %3762  ;;  %vm1564_vm11 = vweird.f32 %v3761_v16 }
 0xc43   :  { %v1231_v10 = vmul.f32 %v3763_v20, %v4423_v33  ;;  %vm1565_vm13 = vmor %vm1563_vm12, %vm1564_vm11  ;;  %v3765_v38 = vpop.eup %3764 }
 0xc44   :  { %v1559_v17 = vmul.f32 %v3761_v16, %v1558_v50  ;;  %v1375_v33 = vmul.f32 %v3765_v38, %v4436_v9  ;;  %v3767_v44 = vpop.eup %3766 }
 0xc45   :  { %v3611_v18 = vpop.permute.xlu0 %3610  ;;  %v1303_v9 = vmul.f32 %v3767_v44, %v4446_v57  ;;  %v1628_v57 = vld [vmem:[#allocation7 + $0xe0] sm:$0xff] }
 0xc46   :  { %v1560_v21 = vmul.f32 0.5, %v1559_v17  ;;  %v3612_v22 = vunpack.i.l.bf16 %v3611_v18  ;;  %v3613_v26 = vunpack.i.h.bf16 %v3611_v18  ;;  %1652 = vmatpush.msra.mxu2 %v1628_v57  ;;  %v4485_v18 = vld [vmem:[#allocation7 + $0x106] ss:$0 sm:$0xff] }
 0xc48   :  { %v1561_v25 = vsub.f32 1.5, %v1560_v21  ;;  %1255 = vmatpush.msrb.mxu0 %v3612_v22  ;;  %1653 = vmatpush.msra.mxu2 %v1627_v62 }
 0xc4a   :  { %v1562_v52 = vmul.f32 %v3761_v16, %v1561_v25  ;;  %1256 = vmatpush.msrb.mxu0 %v3613_v26  ;;  %1654 = vmatpush.msra.mxu2 %v1626_v0 }
 0xc4b   :  { %3472 = vmatmul.msk.f32.vlgmr.msrb.gmra.mxu0 %vm414_vm2, %v1231_v10  ;;  %v1728_v10 = vld [vmem:[#allocation7 + $0x128] sm:$0xff] }
 0xc4c   :  { %v1566_v31 = vsel %vm1565_vm13, %v3761_v16, %v1562_v52  ;;  %1399 = vmatpush.msra.mxu0 %v3617_v27  ;;  %1655 = vmatpush.msra.mxu2 %v1625_v61  ;;  %v1727_v27 = vld [vmem:[#allocation7 + $0x120] sm:$0xff] }
 0xc4d   :  { %v1577_v36 = vmul.f32 %v1566_v31, %v1549_v56  ;;  %v1726_v56 = vld [vmem:[#allocation7 + $0x118] sm:$0xff] }
 0xc4e   :  { %1400 = vmatpush.msra.mxu0 %v3618_v29  ;;  %1656 = vmatpush.msra.mxu2 %v1624_v1 }
 0xc4f   :  { %v1580_v40 = vmul.f32 %v4460_v35, %v1577_v36 }
 0xc50   :  { %1611 = vmatpush.msrb.mxu0 %v1590_v34 }
 0xc51   :  { %v1583_v32 = vadd.f32 %v4464_v41, %v1580_v40 }
 0xc52   :  { %1612 = vmatpush.msrb.mxu0 %v1589_v39 }
 0xc53   :  { %3480 = vmatmul.msk.f32.vlgmr.msra.gmra.mxu0 %vm414_vm2, %v1375_v33  ;;  %v1585_v28 = vmul.f32 %v1583_v32, %v4262_v58 }
 0xc54   :  { %v3621_v43 = vpop.permute.xlu1 %3620  ;;  %1613 = vmatpush.msrb.mxu0 %v1588_v63 }
 0xc55   :  { %v3622_v46 = vunpack.i.l.bf16 %v3621_v43  ;;  %v3623_v19 = vunpack.i.h.bf16 %v3621_v43 }
 0xc56   :  { %1614 = vmatpush.msrb.mxu0 %v1587_v42 }
 0xc57   :  { %1327 = vmatpush.msra.mxu1 %v3622_v46 }
 0xc59   :  { %1328 = vmatpush.msra.mxu1 %v3623_v19 }
 0xc5a   :  { %3476 = vmatmul.msk.f32.vlgmr.msra.gmra.mxu1 %vm414_vm2, %v1303_v9 }
 0xc5b   :  { %1471 = vmatpush.msrb.mxu1 %v3627_v47  ;;  %3487 = vmatmul.msk.f32.vlgmr.msrb.gmra.mxu0 %vm111_vm0, %v1585_v28  ;;  %v4496_v47 = vld [vmem:[#allocation7 + $0x10c] ss:$0 sm:$0xff] }
 0xc5d   :  { %1472 = vmatpush.msrb.mxu1 %v3628_v48 }
 0xc5f   :  { %1749 = vmatpush.msra.mxu1 %v1728_v10  ;;  %v4527_v10 = vld [vmem:[#allocation5] sm:$0xff] }
 0xc61   :  { %1750 = vmatpush.msra.mxu1 %v1727_v27 }
 0xc63   :  { %1751 = vmatpush.msra.mxu1 %v1726_v56 }
 0xc65   :  { %1752 = vmatpush.msra.mxu1 %v1725_v60 }
 0xc70   :  { %v1445_v49 = vpop.xlane.xlu0 %1444 }
 0xc71   :  { %3768 = vrcp.f32 %v1445_v49  ;;  %v4498_v49 = vld [vmem:[#allocation7 + $0x10d] ss:$0 sm:$0xff] }
 0xc77   :  { %v3769_v51 = vpop.eup %3768 }
 0xc78   :  { %v1447_v53 = vmul.f32 %v3769_v51, %v4452_v2 }
 0xc7a   :  { %3484 = vmatmul.msk.f32.vlgmr.msrb.gmra.mxu1 %vm414_vm2, %v1447_v53 }
 0xcc8   :  { %v1258_v3 = vpop.f32.mrf.mxu0 }
 0xcd0   :  { %v1402_v2 = vpop.f32.mrf.mxu0 }
 0xcd1   :  { %1482 = vrot.lane.b32.xlu1 %v1402_v2, %s4040_s18 }
 0xcd7   :  { %v1330_v6 = vpop.f32.mrf.mxu1 }
 0xcd8   :  { %1478 = vrot.lane.b32.xlu2 %v1330_v6, %s4024_s14  ;;  %v1616_v7 = vpop.f32.mrf.mxu0 }
 0xcd9   :  { %v1617_v4 = vadd.f32 %v4475_v5, %v1616_v7 }
 0xcdb   :  { %v1622_v11 = vmax.f32 %v1617_v4, 0.0 }
 0xcdd   :  { %3489 = vmatmul.msk.f32.vlgmr.msra.gmra.mxu2 %vm1634_vm14, %v1622_v11 }
 0xcf7   :  { %v1474_v12 = vpop.f32.mrf.mxu1 }
 0xcf8   :  { %1486 = vrot.lane.b32.xlu2 %v1474_v12, %s4039_s17 }
 0xd32   :  { %v1479_v13 = vpop.permute.xlu2 %1478 }
 0xd33   :  { %v1489_v15 = vsel %vm144_vm1, %v1258_v3, %v1479_v13 }
 0xd43   :  { %v1483_v14 = vpop.permute.xlu1 %1482 }
 0xd44   :  { %v1490_v16 = vsel %vm414_vm2, %v1489_v15, %v1483_v14 }
 0xd52   :  { %v1487_v50 = vpop.permute.xlu2 %1486 }
 0xd53   :  { %v1491_v17 = vsel %vm416_vm3, %v1490_v16, %v1487_v50  ;;  %v4511_v50 = vld [vmem:[#allocation7 + $0x210] ss:$0 sm:$0xff] }
 0xd54   :  { %3486 = vmatmul.msk.f32.gmra.mxu3 %vm111_vm0, %v1491_v17 }
 0xd60   :  { %v1658_v20 = vpop.f32.mrf.mxu2 }
 0xd61   :  { %v1659_v21 = vadd.f32 %v4485_v18, %v1658_v20 }
 0xd63   :  { %v1664_v22 = vadd.f32 %v1659_v21, %v1585_v28 }
 0xd65   :  { %v1668_v23 = vsel %vm111_vm0, %v1664_v22, 0.0  ;;  %v1676_v25 = vmul.f32 %v1664_v22, %v1664_v22 }
 0xd66   :  { %1669 = vadd.xlane.f32.xlu1 %v1668_v23 }
 0xd67   :  { %v1678_v26 = vsel %vm111_vm0, %v1676_v25, 0.0 }
 0xd68   :  { %1679 = vadd.xlane.f32.xlu2 %v1678_v26 }
 0xdd7   :  { %v1524_v52 = vpop.f32.mrf.mxu3 }
 0xdd8   :  { %v1525_v29 = vadd.f32 %v4440_v45, %v1524_v52 }
 0xdd9   :  { %v1670_v31 = vpop.xlane.xlu1 %1669 }
 0xdda   :  { %v1528_v34 = vadd.f32 %v1525_v29, %v4357_v24  ;;  %v1674_v36 = vmul.f32 %v1670_v31, %v4250_v30 }
 0xddb   :  { %v1680_v38 = vpop.xlane.xlu2 %1679 }
 0xddc   :  { %v1688_v39 = vmul.f32 %v1674_v36, %v1674_v36  ;;  %v1684_v33 = vmul.f32 %v1680_v38, %v4250_v30  ;;  %v1534_v40 = vsel %vm111_vm0, %v1528_v34, 0.0  ;;  %v1540_v43 = vmul.f32 %v1528_v34, %v1528_v34 }
 0xddd   :  { %1535 = vadd.xlane.f32.xlu0 %v1534_v40  ;;  %v1686_v9 = vsub.f32 %v1664_v22, %v1674_v36 }
 0xdde   :  { %v1690_v63 = vsub.f32 %v1684_v33, %v1688_v39  ;;  %v1544_v45 = vsel %vm111_vm0, %v1540_v43, 0.0 }
 0xde0   :  { %v1692_v42 = vadd.f32 1e-05, %v1690_v63 }
 0xde2   :  { %3770 = vrsqrt.f32 %v1692_v42  ;;  %vm1700_vm4 = vweird.f32 %v1692_v42 }
 0xde5   :  { %1545 = vadd.xlane.f32.xlu0 %v1544_v45 }
 0xde8   :  { %v3771_v44 = vpop.eup %3770 }
 0xde9   :  { %v1695_v24 = vmul.f32 %v3771_v44, %v1692_v42  ;;  %vm1701_vm15 = vweird.f32 %v3771_v44 }
 0xdea   :  { %vm1702_vm5 = vmor %vm1700_vm4, %vm1701_vm15 }
 0xdeb   :  { %v1696_v46 = vmul.f32 %v3771_v44, %v1695_v24 }
 0xded   :  { %v1697_v32 = vmul.f32 0.5, %v1696_v46 }
 0xdef   :  { %v1698_v8 = vsub.f32 1.5, %v1697_v32 }
 0xdf1   :  { %v1699_v19 = vmul.f32 %v3771_v44, %v1698_v8 }
 0xdf3   :  { %v1703_v28 = vsel %vm1702_vm5, %v3771_v44, %v1699_v19 }
 0xdf4   :  { %v1714_v48 = vmul.f32 %v1703_v28, %v1686_v9 }
 0xdf6   :  { %v1717_v51 = vmul.f32 %v4496_v47, %v1714_v48 }
 0xdf8   :  { %v1720_v53 = vadd.f32 %v4498_v49, %v1717_v51 }
 0xdfa   :  { %v4503_v54 = vmul.f32 %v1720_v53, %v4262_v58 }
 0xdfc   :  { %3491 = vmatmul.msk.f32.vlgmr.msra.gmra.mxu1 %vm111_vm0, %v4503_v54 }
 0xe50   :  { %v1536_v55 = vpop.xlane.xlu0 %1535 }
 0xe51   :  { %v1538_v37 = vmul.f32 %v1536_v55, %v4250_v30 }
 0xe53   :  { %v1552_v62 = vmul.f32 %v1538_v37, %v1538_v37  ;;  %v1550_v12 = vsub.f32 %v1528_v34, %v1538_v37 }
 0xe58   :  { %v1546_v57 = vpop.xlane.xlu0 %1545 }
 0xe59   :  { %v1548_v0 = vmul.f32 %v1546_v57, %v4250_v30 }
 0xe5b   :  { %v1554_v61 = vsub.f32 %v1548_v0, %v1552_v62 }
 0xe5d   :  { %v1556_v1 = vadd.f32 1e-05, %v1554_v61 }
 0xe5f   :  { %3772 = vrsqrt.f32 %v1556_v1  ;;  %vm1573_vm7 = vweird.f32 %v1556_v1 }
 0xe65   :  { %v3773_v3 = vpop.eup %3772 }
 0xe66   :  { %v1568_v2 = vmul.f32 %v3773_v3, %v1556_v1  ;;  %vm1574_vm6 = vweird.f32 %v3773_v3 }
 0xe67   :  { %vm1575_vm8 = vmor %vm1573_vm7, %vm1574_vm6 }
 0xe68   :  { %v1569_v6 = vmul.f32 %v3773_v3, %v1568_v2 }
 0xe6a   :  { %v1570_v7 = vmul.f32 0.5, %v1569_v6 }
 0xe6c   :  { %v1571_v4 = vsub.f32 1.5, %v1570_v7 }
 0xe6e   :  { %v1572_v11 = vmul.f32 %v3773_v3, %v1571_v4 }
 0xe70   :  { %v1576_v13 = vsel %vm1575_vm8, %v3773_v3, %v1572_v11 }
 0xe71   :  { %v1578_v14 = vmul.f32 %v1576_v13, %v1550_v12 }
 0xe73   :  { %v1581_v15 = vmul.f32 %v4460_v35, %v1578_v14 }
 0xe75   :  { %v1584_v16 = vadd.f32 %v4464_v41, %v1581_v15 }
 0xe77   :  { %v1586_v17 = vmul.f32 %v1584_v16, %v4342_v59 }
 0xe79   :  { %3488 = vmatmul.msk.f32.gmra.mxu0 %vm111_vm0, %v1586_v17  ;;  %v1754_v20 = vpop.f32.mrf.mxu1 }
 0xe7a   :  { %v4516_v21 = vadd.f32 %v4511_v50, %v1754_v20 }
 0xe7c   :  { %1798 = vrot.lane.b32.xlu1 %v4516_v21, %s4028_s25  ;;  %1761 = vrot.lane.b32.xlu0 %v4516_v21, %s4030_s27 }
 0xeee   :  { %v1799_v22 = vpop.permute.xlu1 %1798  ;;  %v1762_v35 = vpop.permute.xlu0 %1761 }
 0xeef   :  { %3493 = vmatpush.xpose.msk.msra.mxu3 %vm144_vm1, %v1762_v35  ;;  %1819 = vmatpush.msra.mxu0 %v1799_v22 }
 0xef2   :  { %3494 = vmatmul.msk.f32.vlgmr.msra.gmra.mxu3 %vm144_vm1, %v4516_v21 }
 0xef6   :  { %v1619_v41 = vpop.f32.mrf.mxu0 }
 0xef7   :  { %v1620_v23 = vadd.f32 %v4475_v5, %v1619_v41 }
 0xef9   :  { %v1623_v25 = vmax.f32 %v1620_v23, 0.0 }
 0xefb   :  { %3490 = vmatmul.msk.f32.gmra.mxu2 %vm1634_vm14, %v1623_v25 }
 0xf75   :  { %v1784_v26 = vpop.f32.mrf.mxu3 }
 0xf76   :  { %v1785_v27 = vadd.f32 %v4527_v10, %v1784_v26 }
 0xf78   :  { %v1787_v52 = vsel %vm144_vm1, %v1785_v27, -inf }
 0xf79   :  { %1788 = vmax.xlane.f32.xlu1 %v1787_v52 }
 0xf7e   :  { %v1661_v56 = vpop.f32.mrf.mxu2 }
 0xf7f   :  { %v1662_v29 = vadd.f32 %v4485_v18, %v1661_v56 }
 0xf81   :  { %v1665_v31 = vadd.f32 %v1662_v29, %v1586_v17 }
 0xf83   :  { %v1671_v60 = vsel %vm111_vm0, %v1665_v31, 0.0  ;;  %v1677_v34 = vmul.f32 %v1665_v31, %v1665_v31 }
 0xf84   :  { %1672 = vadd.xlane.f32.xlu2 %v1671_v60 }
 0xf85   :  { %v1681_v5 = vsel %vm111_vm0, %v1677_v34, 0.0 }
 0xf86   :  { %1682 = vadd.xlane.f32.xlu0 %v1681_v5 }
 0xf92   :  { %1891 = vrot.lane.b32.xlu1 %v4516_v21, %s4034_s10 }
 0xf9a   :  { %1889 = vrot.lane.b32.xlu0 %v4516_v21, %s4035_s11 }
 0xf9c   :  { %1826 = vrot.lane.b32.xlu2 %v4516_v21, %s4032_s29 }
 0xfa4   :  { %1824 = vrot.lane.b32.xlu2 %v4516_v21, %s4029_s26 }
 0xfac   :  { %1956 = vrot.lane.b32.xlu2 %v4516_v21, %s4033_s0 }
 0xfec   :  { %v1789_v18 = vpop.xlane.xlu1 %1788 }
 0xfed   :  { %v1790_v36 = vsub.f32 %v1785_v27, %v1789_v18 }
 0xfef   :  { %v1791_v38 = vmul.f32 1.442695, %v1790_v36 }
 0xff1   :  { %3774 = vpow2.f32 %v1791_v38 }
 0xff7   :  { %v3775_v39 = vpop.eup %3774  ;;  %v1673_v33 = vpop.xlane.xlu2 %1672 }
 0xff8   :  { %v1675_v40 = vmul.f32 %v1673_v33, %v4250_v30  ;;  %v1793_v63 = vsel %vm144_vm1, %v3775_v39, 0.0 }
 0xff9   :  { %1794 = vadd.xlane.f32.xlu1 %v1793_v63  ;;  %v1683_v42 = vpop.xlane.xlu0 %1682 }
 0xffa   :  { %v1689_v43 = vmul.f32 %v1675_v40, %v1675_v40  ;;  %v1685_v45 = vmul.f32 %v1683_v42, %v4250_v30  ;;  %v1687_v37 = vsub.f32 %v1665_v31, %v1675_v40 }
 0xffc   :  { %v1691_v44 = vsub.f32 %v1685_v45, %v1689_v43 }
 0xffe   :  { %v1693_v24 = vadd.f32 1e-05, %v1691_v44 }
 0xfff   :  { %v1827_v46 = vpop.permute.xlu2 %1826 }
0x1000   :  { %3776 = vrsqrt.f32 %v1693_v24  ;;  %3496 = vmatpush.xpose.msk.msrb.mxu1 %vm144_vm1, %v1827_v46  ;;  %vm1710_vm10 = vweird.f32 %v1693_v24 }
0x1004   :  { %v1892_v32 = vpop.permute.xlu1 %1891 }
0x1005   :  { %3499 = vmatpush.xpose.msk.msrb.mxu0 %vm144_vm1, %v1892_v32 }
0x1006   :  { %v3777_v8 = vpop.eup %3776 }
0x1007   :  { %v1705_v19 = vmul.f32 %v3777_v8, %v1693_v24  ;;  %v1825_v9 = vpop.permute.xlu2 %1824  ;;  %vm1711_vm9 = vweird.f32 %v3777_v8 }
0x1008   :  { %vm1712_vm11 = vmor %vm1710_vm10, %vm1711_vm9 }
0x1009   :  { %v1706_v28 = vmul.f32 %v3777_v8, %v1705_v19 }
0x100b   :  { %v1707_v48 = vmul.f32 0.5, %v1706_v28 }
0x100c   :  { %v1890_v7 = vpop.permute.xlu0 %1889 }
0x100d   :  { %v1708_v51 = vsub.f32 1.5, %v1707_v48 }
0x100f   :  { %v1709_v53 = vmul.f32 %v3777_v8, %v1708_v51  ;;  %v1957_v55 = vpop.permute.xlu2 %1956  ;;  %v3861_v51 = vld [vmem:[#allocation5 + $0x8] sm:$0xff] }
0x1010   :  { %3502 = vmatpush.xpose.msk.msra.mxu1 %vm144_vm1, %v1957_v55 }
0x1011   :  { %v1713_v57 = vsel %vm1712_vm11, %v3777_v8, %v1709_v53 }
0x1012   :  { %1954 = vrot.lane.b32.xlu1 %v4516_v21, %s4036_s12  ;;  %v1715_v62 = vmul.f32 %v1713_v57, %v1687_v37 }
0x1014   :  { %v1718_v0 = vmul.f32 %v4496_v47, %v1715_v62 }
0x1016   :  { %v1721_v61 = vadd.f32 %v4498_v49, %v1718_v0  ;;  %v2311_v0 = vld [vmem:[#allocation7 + $0x148] sm:$0xff] }
0x1018   :  { %v4555_v1 = vmul.f32 %v1721_v61, %v4342_v59  ;;  %v2310_v61 = vld [vmem:[#allocation7 + $0x140] sm:$0xff] }
0x101a   :  { %3492 = vmatmul.msk.f32.gmra.mxu1 %vm111_vm0, %v4555_v1 }
0x1022   :  { %3497 = vmatmul.msk.f32.vlgmr.msrb.gmra.mxu1 %vm144_vm1, %v1825_v9 }
0x106c   :  { %v1795_v3 = vpop.xlane.xlu1 %1794 }
0x106d   :  { %3778 = vrcp.f32 %v1795_v3  ;;  %v2309_v3 = vld [vmem:[#allocation7 + $0x138] sm:$0xff] }
0x1073   :  { %v3779_v2 = vpop.eup %3778 }
0x1074   :  { %v1797_v6 = vmul.f32 %v3779_v2, %v3775_v39  ;;  %v2308_v2 = vld [vmem:[#allocation7 + $0x130] sm:$0xff] }
0x1076   :  { %3495 = vmatmul.msk.f32.vlgmr.msra.gmra.mxu0 %vm144_vm1, %v1797_v6 }
0x107e   :  { %3500 = vmatmul.msk.f32.vlgmr.msrb.gmra.mxu0 %vm144_vm1, %v1890_v7 }
0x1084   :  { %v1955_v47 = vpop.permute.xlu1 %1954 }
0x1085   :  { %3503 = vmatmul.msk.f32.vlgmr.msra.gmra.mxu1 %vm144_vm1, %v1955_v47 }
0x1097   :  { %v1757_v49 = vpop.f32.mrf.mxu1 }
0x1098   :  { %v4574_v25 = vadd.f32 %v4511_v50, %v1757_v49 }
0x109f   :  { %v1849_v4 = vpop.f32.mrf.mxu1 }
0x10a0   :  { %v1850_v11 = vadd.f32 %v4527_v10, %v1849_v4 }
0x10a2   :  { %v1852_v12 = vsel %vm144_vm1, %v1850_v11, -inf }
0x10a3   :  { %1853 = vmax.xlane.f32.xlu2 %v1852_v12 }
0x10f3   :  { %v4565_v13 = vpop.f32.mrf.mxu0 }
0x10fb   :  { %v1914_v14 = vpop.f32.mrf.mxu0 }
0x10fc   :  { %v1915_v15 = vadd.f32 %v4527_v10, %v1914_v14 }
0x10fe   :  { %v1917_v16 = vsel %vm144_vm1, %v1915_v15, -inf }
0x10ff   :  { %1918 = vmax.xlane.f32.xlu1 %v1917_v16 }
0x1102   :  { %v1979_v17 = vpop.f32.mrf.mxu1 }
0x1103   :  { %v1980_v20 = vadd.f32 %v4527_v10, %v1979_v17 }
0x1105   :  { %v1982_v22 = vsel %vm144_vm1, %v1980_v20, -inf }
0x1106   :  { %1983 = vmax.xlane.f32.xlu0 %v1982_v22 }
0x1116   :  { %v1854_v35 = vpop.xlane.xlu2 %1853 }
0x1117   :  { %v1855_v41 = vsub.f32 %v1850_v11, %v1854_v35 }
0x1119   :  { %v1856_v23 = vmul.f32 1.442695, %v1855_v41 }
0x111a   :  { %1993 = vrot.lane.b32.xlu0 %v4516_v21, %s4037_s15 }
0x111b   :  { %3780 = vpow2.f32 %v1856_v23 }
0x1121   :  { %v3781_v26 = vpop.eup %3780 }
0x1122   :  { %2035 = vrot.lane.b32.xlu0 %v4574_v25, %s4030_s27  ;;  %v1858_v27 = vsel %vm144_vm1, %v3781_v26, 0.0 }
0x1123   :  { %1859 = vadd.xlane.f32.xlu2 %v1858_v27 }
0x1172   :  { %v1919_v10 = vpop.xlane.xlu1 %1918 }
0x1173   :  { %v1920_v52 = vsub.f32 %v1915_v15, %v1919_v10 }
0x1175   :  { %v1921_v56 = vmul.f32 1.442695, %v1920_v52 }
0x1177   :  { %3782 = vpow2.f32 %v1921_v56 }
0x1179   :  { %v1984_v29 = vpop.xlane.xlu0 %1983 }
0x117a   :  { %v1985_v31 = vsub.f32 %v1980_v20, %v1984_v29 }
0x117c   :  { %v1986_v60 = vmul.f32 1.442695, %v1985_v31 }
0x117d   :  { %v3783_v34 = vpop.eup %3782 }
0x117e   :  { %3784 = vpow2.f32 %v1986_v60  ;;  %v1923_v5 = vsel %vm144_vm1, %v3783_v34, 0.0 }
0x117f   :  { %1924 = vadd.xlane.f32.xlu1 %v1923_v5 }
0x1184   :  { %v3785_v50 = vpop.eup %3784 }
0x1185   :  { %v1988_v18 = vsel %vm144_vm1, %v3785_v50, 0.0 }
0x1186   :  { %1989 = vadd.xlane.f32.xlu2 %v1988_v18 }
0x118c   :  { %v1994_v36 = vpop.permute.xlu0 %1993 }
0x1194   :  { %v2036_v38 = vpop.permute.xlu0 %2035 }
0x1195   :  { %3505 = vmatpush.xpose.msk.msra.mxu0 %vm144_vm1, %v2036_v38 }
0x1196   :  { %v1860_v39 = vpop.xlane.xlu2 %1859 }
0x1198   :  { %1863 = vrot.lane.b32.xlu1 %v4516_v21, %s4031_s28  ;;  %3506 = vmatmul.msk.f32.vlgmr.msra.gmra.mxu0 %vm144_vm1, %v4574_v25 }
0x119e   :  { %1928 = vrot.lane.b32.xlu2 %v4516_v21, %s4038_s16 }
0x11a0   :  { %2163 = vrot.lane.b32.xlu1 %v4574_v25, %s4035_s11 }
0x11a6   :  { %2165 = vrot.lane.b32.xlu2 %v4574_v25, %s4034_s10 }
0x11f2   :  { %v1925_v33 = vpop.xlane.xlu1 %1924 }
0x11f3   :  { %3786 = vrcp.f32 %v1925_v33 }
0x11f4   :  { %3788 = vrcp.f32 %v1860_v39 }
0x11f9   :  { %v1990_v40 = vpop.xlane.xlu2 %1989  ;;  %v3787_v63 = vpop.eup %3786 }
0x11fa   :  { %v1927_v42 = vmul.f32 %v3787_v63, %v3783_v34  ;;  %v3789_v45 = vpop.eup %3788  ;;  %3790 = vrcp.f32 %v1990_v40 }
0x11fb   :  { %v1862_v44 = vmul.f32 %v3789_v45, %v3781_v26  ;;  %v4624_v26 = vld [vmem:[#allocation7 + $0x211] ss:$0 sm:$0xff]  ;;  %v2439_v45 = vld [vmem:[#allocation7 + $0x178] sm:$0xff] }
0x1200   :  { %v3791_v46 = vpop.eup %3790 }
0x1201   :  { %v1929_v43 = vpop.permute.xlu2 %1928  ;;  %v1992_v32 = vmul.f32 %v3791_v46, %v3785_v50  ;;  %v3864_v46 = vld [vmem:[#allocation2 + $0x10] sm:$0xff] }
0x1202   :  { %1949 = vmatpush.msrb.mxu2 %v1929_v43  ;;  %v2440_v43 = vld [vmem:[#allocation7 + $0x180] sm:$0xff] }
0x1203   :  { %3501 = vmatmul.msk.f32.vlgmr.msrb.gmra.mxu2 %vm144_vm1, %v1927_v42  ;;  %v2441_v42 = vld [vmem:[#allocation7 + $0x188] sm:$0xff] }
0x1209   :  { %v2166_v21 = vpop.permute.xlu2 %2165 }
0x120a   :  { %v1864_v24 = vpop.permute.xlu1 %1863  ;;  %3511 = vmatpush.xpose.msk.msrb.mxu0 %vm144_vm1, %v2166_v21  ;;  %v2438_v21 = vld [vmem:[#allocation7 + $0x170] sm:$0xff] }
0x120b   :  { %1884 = vmatpush.msrb.mxu3 %v1864_v24  ;;  %v3863_v24 = vld [vmem:[#allocation2 + $0x8] sm:$0xff] }
0x120c   :  { %3498 = vmatmul.msk.f32.vlgmr.msrb.gmra.mxu3 %vm144_vm1, %v1862_v44  ;;  %v3862_v44 = vld [vmem:[#allocation2] sm:$0xff] }
0x120d   :  { %2014 = vmatpush.msra.mxu3 %v1994_v36 }
0x120e   :  { %2332 = vmatpush.msra.mxu0 %v2311_v0  ;;  %v2406_v0 = vld [vmem:[#allocation7 + $0x168] sm:$0xff] }
0x1210   :  { %2333 = vmatpush.msra.mxu0 %v2310_v61  ;;  %v2405_v61 = vld [vmem:[#allocation7 + $0x160] sm:$0xff] }
0x1212   :  { %v2164_v8 = vpop.permute.xlu1 %2163  ;;  %2334 = vmatpush.msra.mxu0 %v2309_v3 }
0x1213   :  { %3512 = vmatmul.msk.f32.vlgmr.msrb.gmra.mxu0 %vm144_vm1, %v2164_v8 }
0x1214   :  { %3504 = vmatmul.msk.f32.vlgmr.msra.gmra.mxu3 %vm144_vm1, %v1992_v32  ;;  %2335 = vmatpush.msra.mxu0 %v2308_v2  ;;  %v2404_v2 = vld [vmem:[#allocation7 + $0x158] sm:$0xff] }
0x1215   :  { %v2058_v48 = vpop.f32.mrf.mxu0 }
0x1216   :  { %v2059_v53 = vadd.f32 %v3861_v51, %v2058_v48 }
0x1218   :  { %v2061_v55 = vsel %vm144_vm1, %v2059_v53, -inf }
0x1286   :  { %v1951_v19 = vpop.f32.mrf.mxu2 }
0x1287   :  { %2024 = vrot.lane.b32.xlu2 %v1951_v19, %s4040_s18 }
0x128f   :  { %v1886_v9 = vpop.f32.mrf.mxu3  ;;  %2098 = vrot.lane.b32.xlu2 %v4574_v25, %s4029_s26 }
0x1290   :  { %2020 = vrot.lane.b32.xlu0 %v1886_v9, %s4024_s14  ;;  %v2188_v37 = vpop.f32.mrf.mxu0 }
0x1291   :  { %v2189_v57 = vadd.f32 %v3861_v51, %v2188_v37 }
0x1293   :  { %v2191_v62 = vsel %vm144_vm1, %v2189_v57, -inf }
0x1297   :  { %v2016_v28 = vpop.f32.mrf.mxu3 }
0x1298   :  { %2100 = vrot.lane.b32.xlu0 %v4574_v25, %s4032_s29  ;;  %2028 = vrot.lane.b32.xlu1 %v2016_v28, %s4039_s17 }
0x12a0   :  { %2228 = vrot.lane.b32.xlu0 %v4574_v25, %s4036_s12  ;;  %2230 = vrot.lane.b32.xlu1 %v4574_v25, %s4033_s0 }
0x12b8   :  { %2062 = vmax.xlane.f32.xlu2 %v2061_v55  ;;  %v3865_v55 = vld [vmem:[#allocation2 + $0x18] sm:$0xff] }
0x12ca   :  { %2192 = vmax.xlane.f32.xlu1 %v2191_v62 }
0x12e1   :  { %v2025_v7 = vpop.permute.xlu2 %2024 }
0x12e9   :  { %v2099_v14 = vpop.permute.xlu2 %2098 }
0x1302   :  { %v2021_v6 = vpop.permute.xlu0 %2020 }
0x1303   :  { %v2031_v47 = vsel %vm144_vm1, %v4565_v13, %v2021_v6 }
0x1304   :  { %v2032_v4 = vsel %vm414_vm2, %v2031_v47, %v2025_v7 }
0x130a   :  { %v2029_v49 = vpop.permute.xlu1 %2028  ;;  %v2101_v11 = vpop.permute.xlu0 %2100 }
0x130b   :  { %v2033_v12 = vsel %vm416_vm3, %v2032_v4, %v2029_v49  ;;  %3508 = vmatpush.xpose.msk.msrb.mxu1 %vm144_vm1, %v2101_v11 }
0x130c   :  { %3517 = vmatmul.msk.f32.vlgmr.msra.gmra.mxu0 %vm111_vm0, %v2033_v12  ;;  %v2403_v12 = vld [vmem:[#allocation7 + $0x150] sm:$0xff] }
0x130e   :  { %3509 = vmatmul.msk.f32.vlgmr.msrb.gmra.mxu1 %vm144_vm1, %v2099_v14 }
0x1312   :  { %v2231_v15 = vpop.permute.xlu1 %2230  ;;  %v2229_v16 = vpop.permute.xlu0 %2228 }
0x1313   :  { %3514 = vmatpush.xpose.msk.msra.mxu1 %vm144_vm1, %v2231_v15 }
0x1316   :  { %3515 = vmatmul.msk.f32.vlgmr.msra.gmra.mxu1 %vm144_vm1, %v2229_v16 }
0x1317   :  { %2456 = vmatpush.msrb.mxu1 %v2441_v42 }
0x1319   :  { %2457 = vmatpush.msrb.mxu1 %v2440_v43 }
0x131b   :  { %2458 = vmatpush.msrb.mxu1 %v2439_v45 }
0x131d   :  { %2459 = vmatpush.msrb.mxu1 %v2438_v21 }
0x131e   :  { %3521 = vmatmul.msk.f32.vlgmr.msrb.gmra.mxu1 %vm111_vm0, %v3862_v44 }
0x1326   :  { %3522 = vmatmul.msk.f32.gmra.mxu1 %vm111_vm0, %v3863_v24  ;;  %v4685_v24 = vld [vmem:[#allocation7 + $0x212] ss:$0 sm:$0xff] }
0x132b   :  { %v2063_v13 = vpop.xlane.xlu2 %2062 }
0x132c   :  { %v2064_v17 = vsub.f32 %v2059_v53, %v2063_v13 }
0x132e   :  { %v2065_v20 = vmul.f32 1.442695, %v2064_v17  ;;  %3523 = vmatmul.msk.f32.gmra.mxu1 %vm111_vm0, %v3864_v46 }
0x1330   :  { %3792 = vpow2.f32 %v2065_v20 }
0x1336   :  { %v3793_v22 = vpop.eup %3792  ;;  %3524 = vmatmul.msk.f32.gmra.mxu1 %vm111_vm0, %v3865_v55  ;;  %v4710_v55 = vld [vmem:[%s4904_s4] ss:$0 sm:$0xff] }
0x1337   :  { %v2067_v35 = vsel %vm144_vm1, %v3793_v22, 0.0 }
0x1338   :  { %2068 = vadd.xlane.f32.xlu1 %v2067_v35 }
0x133d   :  { %v2193_v41 = vpop.xlane.xlu1 %2192 }
0x133e   :  { %v2194_v23 = vsub.f32 %v2189_v57, %v2193_v41 }
0x1340   :  { %v2195_v27 = vmul.f32 1.442695, %v2194_v23 }
0x1342   :  { %3794 = vpow2.f32 %v2195_v27 }
0x1348   :  { %v3795_v34 = vpop.eup %3794 }
0x1349   :  { %v2197_v50 = vsel %vm144_vm1, %v3795_v34, 0.0 }
0x1351   :  { %2202 = vrot.lane.b32.xlu1 %v4574_v25, %s4038_s16 }
0x1359   :  { %2137 = vrot.lane.b32.xlu1 %v4574_v25, %s4031_s28 }
0x1389   :  { %v2337_v10 = vpop.f32.mrf.mxu0 }
0x138a   :  { %v2338_v52 = vadd.f32 %v4624_v26, %v2337_v10 }
0x138b   :  { %v2123_v5 = vpop.f32.mrf.mxu1 }
0x138c   :  { %v4628_v56 = vadd.f32 %v2338_v52, %v4503_v54  ;;  %v2124_v18 = vadd.f32 %v3861_v51, %v2123_v5  ;;  %v4655_v52 = vld [vmem:[#allocation7 + $0x219] ss:$0 sm:$0xff] }
0x138e   :  { %v2347_v29 = vsel %vm111_vm0, %v4628_v56, 0.0  ;;  %v2355_v31 = vmul.f32 %v4628_v56, %v4628_v56  ;;  %v2126_v54 = vsel %vm144_vm1, %v2124_v18, -inf }
0x138f   :  { %2348 = vadd.xlane.f32.xlu0 %v2347_v29 }
0x1390   :  { %v2357_v60 = vsel %vm111_vm0, %v2355_v31, 0.0 }
0x1391   :  { %2358 = vadd.xlane.f32.xlu2 %v2357_v60 }
0x1393   :  { %v2253_v36 = vpop.f32.mrf.mxu1 }
0x1394   :  { %v4637_v38 = vadd.f32 %v3861_v51, %v2253_v36 }
0x1396   :  { %v2256_v39 = vsel %vm144_vm1, %v4637_v38, -inf }
0x1397   :  { %2198 = vadd.xlane.f32.xlu0 %v2197_v50 }
0x139b   :  { %v2461_v50 = vpop.f32.mrf.mxu1 }
0x139f   :  { %2127 = vmax.xlane.f32.xlu0 %v2126_v54 }
0x13a3   :  { %v2464_v54 = vpop.f32.mrf.mxu1 }
0x13a7   :  { %2257 = vmax.xlane.f32.xlu0 %v2256_v39 }
0x13a9   :  { %2072 = vrot.lane.b32.xlu2 %v4574_v25, %s4028_s25 }
0x13ab   :  { %v2069_v33 = vpop.xlane.xlu1 %2068 }
0x13ac   :  { %3796 = vrcp.f32 %v2069_v33 }
0x13b2   :  { %v3797_v51 = vpop.eup %3796 }
0x13b3   :  { %v2071_v57 = vmul.f32 %v3797_v51, %v3793_v22  ;;  %v4652_v22 = vld [vmem:[#allocation7 + $0x218] ss:$0 sm:$0xff] }
0x13c3   :  { %v2203_v40 = vpop.permute.xlu1 %2202 }
0x13cb   :  { %v2138_v63 = vpop.permute.xlu1 %2137 }
0x13cc   :  { %2158 = vmatpush.msrb.mxu3 %v2138_v63 }
0x1402   :  { %v2349_v32 = vpop.xlane.xlu0 %2348 }
0x1403   :  { %v2353_v8 = vmul.f32 %v2349_v32, %v4250_v30 }
0x1404   :  { %v2359_v19 = vpop.xlane.xlu2 %2358 }
0x1405   :  { %v2367_v9 = vmul.f32 %v2353_v8, %v2353_v8  ;;  %v2363_v28 = vmul.f32 %v2359_v19, %v4250_v30  ;;  %v2365_v20 = vsub.f32 %v4628_v56, %v2353_v8 }
0x1407   :  { %v2369_v48 = vsub.f32 %v2363_v28, %v2367_v9 }
0x1409   :  { %v2371_v53 = vadd.f32 1e-05, %v2369_v48 }
0x140a   :  { %v2199_v37 = vpop.xlane.xlu0 %2198 }
0x140b   :  { %3798 = vrsqrt.f32 %v2371_v53  ;;  %vm2379_vm13 = vweird.f32 %v2371_v53 }
0x140c   :  { %3800 = vrcp.f32 %v2199_v37  ;;  %v2073_v62 = vpop.permute.xlu2 %2072 }
0x140d   :  { %2093 = vmatpush.msra.mxu2 %v2073_v62 }
0x140e   :  { %3507 = vmatmul.msk.f32.vlgmr.msra.gmra.mxu2 %vm144_vm1, %v2071_v57 }
0x140f   :  { %2223 = vmatpush.msrb.mxu2 %v2203_v40 }
0x1411   :  { %2427 = vmatpush.msra.mxu2 %v2406_v0  ;;  %v3799_v3 = vpop.eup %3798 }
0x1412   :  { %v3801_v6 = vpop.eup %3800  ;;  %v2374_v7 = vmul.f32 %v3799_v3, %v2371_v53  ;;  %v2128_v47 = vpop.xlane.xlu0 %2127  ;;  %vm2380_vm12 = vweird.f32 %v3799_v3 }
0x1413   :  { %2428 = vmatpush.msra.mxu2 %v2405_v61  ;;  %v2129_v49 = vsub.f32 %v2124_v18, %v2128_v47  ;;  %v2201_v11 = vmul.f32 %v3801_v6, %v3795_v34  ;;  %vm2381_vm15 = vmor %vm2379_vm13, %vm2380_vm12  ;;  %v4668_v18 = vld [vmem:[#allocation7 + $0x213] ss:$0 sm:$0xff] }
0x1414   :  { %v2375_v4 = vmul.f32 %v3799_v3, %v2374_v7  ;;  %v4671_v36 = vadd.f32 %v4668_v18, %v2464_v54 }
0x1415   :  { %2429 = vmatpush.msra.mxu2 %v2404_v2  ;;  %v2130_v14 = vmul.f32 1.442695, %v2129_v49 }
0x1416   :  { %v2376_v15 = vmul.f32 0.5, %v2375_v4  ;;  %3513 = vmatmul.msk.f32.vlgmr.msrb.gmra.mxu2 %vm144_vm1, %v2201_v11 }
0x1417   :  { %3802 = vpow2.f32 %v2130_v14  ;;  %2430 = vmatpush.msra.mxu2 %v2403_v12 }
0x1418   :  { %v2377_v16 = vsub.f32 1.5, %v2376_v15 }
0x141a   :  { %v2378_v13 = vmul.f32 %v3799_v3, %v2377_v16  ;;  %v2258_v17 = vpop.xlane.xlu0 %2257 }
0x141b   :  { %v2259_v35 = vsub.f32 %v4637_v38, %v2258_v17  ;;  %v4676_v38 = vadd.f32 %v4668_v18, %v2461_v50 }
0x141c   :  { %v2382_v41 = vsel %vm2381_vm15, %v3799_v3, %v2378_v13 }
0x141d   :  { %v3803_v23 = vpop.eup %3802  ;;  %v2393_v27 = vmul.f32 %v2382_v41, %v2365_v20  ;;  %v2260_v10 = vmul.f32 1.442695, %v2259_v35  ;;  %v4680_v39 = vpack.i.bf16 %v4676_v38, %v4671_v36 }
0x141e   :  { %v2132_v29 = vsel %vm144_vm1, %v3803_v23, 0.0 }
0x141f   :  { %v2396_v31 = vmul.f32 %v4652_v22, %v2393_v27  ;;  %3804 = vpow2.f32 %v2260_v10  ;;  %2133 = vadd.xlane.f32.xlu0 %v2132_v29 }
0x1421   :  { %v2399_v60 = vadd.f32 %v4655_v52, %v2396_v31 }
0x1423   :  { %v4661_v56 = vmul.f32 %v2399_v60, %v4262_v58 }
0x1425   :  { %v3805_v34 = vpop.eup %3804  ;;  %3519 = vmatmul.msk.f32.vlgmr.msra.gmra.mxu2 %vm111_vm0, %v4661_v56 }
0x1426   :  { %v2262_v5 = vsel %vm144_vm1, %v3805_v34, 0.0 }
0x1427   :  { %2263 = vadd.xlane.f32.xlu2 %v2262_v5 }
0x1433   :  { %2267 = vrot.lane.b32.xlu0 %v4574_v25, %s4037_s15 }
0x143f   :  { %2546 = vrot.lane.b32.xlu2 %v4671_v36, %s4029_s26 }
0x1447   :  { %3630 = vrot.lane.b32.xlu2 %v4680_v39, %s4030_s27 }
0x1491   :  { %v2095_v33 = vpop.f32.mrf.mxu2 }
0x1492   :  { %v2134_v25 = vpop.xlane.xlu0 %2133 }
0x1493   :  { %3806 = vrcp.f32 %v2134_v25 }
0x1499   :  { %v3807_v40 = vpop.eup %3806  ;;  %v2225_v43 = vpop.f32.mrf.mxu2 }
0x149a   :  { %v2136_v63 = vmul.f32 %v3807_v40, %v3803_v23  ;;  %v2264_v42 = vpop.xlane.xlu2 %2263 }
0x149b   :  { %3808 = vrcp.f32 %v2264_v42 }
0x149c   :  { %3510 = vmatmul.msk.f32.vlgmr.msrb.gmra.mxu3 %vm144_vm1, %v2136_v63 }
0x14a1   :  { %v3809_v45 = vpop.eup %3808 }
0x14a2   :  { %v2266_v21 = vmul.f32 %v3809_v45, %v3805_v34  ;;  %v2547_v8 = vpop.permute.xlu2 %2546 }
0x14a3   :  { %3529 = vmatpush.xpose.msk.msrb.mxu0 %vm144_vm1, %v2547_v8 }
0x14a5   :  { %v2268_v44 = vpop.permute.xlu0 %2267 }
0x14a6   :  { %2288 = vmatpush.msra.mxu3 %v2268_v44 }
0x14a7   :  { %3516 = vmatmul.msk.f32.vlgmr.msra.gmra.mxu3 %vm144_vm1, %v2266_v21 }
0x14a8   :  { %v2432_v46 = vpop.f32.mrf.mxu2  ;;  %3525 = vmatpush.xpose.msk.msrb.mxu3 %vm144_vm1, %v4671_v36 }
0x14a9   :  { %v4691_v32 = vadd.f32 %v4685_v24, %v2432_v46 }
0x14aa   :  { %v3631_v19 = vpop.permute.xlu2 %3630 }
0x14ab   :  { %2542 = vrot.lane.b32.xlu2 %v4691_v32, %s4029_s26  ;;  %v3633_v9 = vunpack.i.h.bf16 %v3631_v19  ;;  %v3632_v28 = vunpack.i.l.bf16 %v3631_v19 }
0x14ac   :  { %3526 = vmatpush.xpose.msk.msrb.mxu3 %vm144_vm1, %v4676_v38 }
0x14af   :  { %3527 = vmatmul.msk.f32.vlgmr.msrb.gmra.mxu3 %vm144_vm1, %v4691_v32 }
0x14b0   :  { %2536 = vmatpush.msra.mxu3 %v3632_v28 }
0x14b2   :  { %2537 = vmatpush.msra.mxu3 %v3633_v9 }
0x14b3   :  { %2616 = vrot.lane.b32.xlu2 %v4676_v38, %s4035_s11 }
0x14bb   :  { %2614 = vrot.lane.b32.xlu2 %v4691_v32, %s4035_s11 }
0x1505   :  { %v2543_v14 = vpop.permute.xlu2 %2542 }
0x150d   :  { %v2617_v29 = vpop.permute.xlu2 %2616 }
0x1515   :  { %v2615_v60 = vpop.permute.xlu2 %2614 }
0x151f   :  { %v2160_v48 = vpop.f32.mrf.mxu3 }
0x1520   :  { %2294 = vrot.lane.b32.xlu1 %v2160_v48, %s4024_s14 }
0x1528   :  { %2298 = vrot.lane.b32.xlu1 %v2225_v43, %s4040_s18 }
0x152a   :  { %v2290_v51 = vpop.f32.mrf.mxu3 }
0x1530   :  { %2302 = vrot.lane.b32.xlu1 %v2290_v51, %s4039_s17 }
0x1532   :  { %v2499_v53 = vpop.f32.mrf.mxu3 }
0x1533   :  { %v2500_v37 = vadd.f32 %v4710_v55, %v2499_v53 }
0x1535   :  { %v2502_v57 = vsel %vm414_vm2, %v2500_v37, -inf }
0x1536   :  { %2503 = vmax.xlane.f32.xlu0 %v2502_v57 }
0x154a   :  { %2544 = vrot.lane.b32.xlu0 %v4676_v38, %s4029_s26 }
0x1592   :  { %v2295_v62 = vpop.permute.xlu1 %2294 }
0x1593   :  { %v2305_v61 = vsel %vm144_vm1, %v2095_v33, %v2295_v62 }
0x159a   :  { %v2299_v0 = vpop.permute.xlu1 %2298 }
0x159b   :  { %v2306_v3 = vsel %vm414_vm2, %v2305_v61, %v2299_v0 }
0x15a2   :  { %v2303_v2 = vpop.permute.xlu1 %2302 }
0x15a3   :  { %v2307_v6 = vsel %vm416_vm3, %v2306_v3, %v2303_v2  ;;  %v2467_v3 = vpop.f32.mrf.mxu1 }
0x15a4   :  { %3518 = vmatmul.msk.f32.gmra.mxu0 %vm111_vm0, %v2307_v6 }
0x15a9   :  { %v2504_v7 = vpop.xlane.xlu0 %2503 }
0x15aa   :  { %v2505_v47 = vsub.f32 %v2500_v37, %v2504_v7 }
0x15ac   :  { %v2506_v49 = vmul.f32 1.442695, %v2505_v47 }
0x15ae   :  { %3810 = vpow2.f32 %v2506_v49 }
0x15b4   :  { %v3811_v4 = vpop.eup %3810 }
0x15b5   :  { %v2508_v11 = vsel %vm414_vm2, %v3811_v4, 0.0 }
0x15b6   :  { %2509 = vadd.xlane.f32.xlu1 %v2508_v11 }
0x15bc   :  { %v2545_v12 = vpop.permute.xlu0 %2544 }
0x15bd   :  { %3530 = vmatpush.xpose.msk.msrb.mxu0 %vm144_vm1, %v2545_v12 }
0x15c0   :  { %3531 = vmatmul.msk.f32.vlgmr.msrb.gmra.mxu0 %vm144_vm1, %v2543_v14 }
0x15cf   :  { %2618 = vrot.lane.b32.xlu1 %v4671_v36, %s4035_s11 }
0x1621   :  { %v2340_v15 = vpop.f32.mrf.mxu0 }
0x1622   :  { %v2341_v16 = vadd.f32 %v4624_v26, %v2340_v15 }
0x1624   :  { %v2344_v13 = vadd.f32 %v2341_v16, %v4555_v1 }
0x1626   :  { %v2350_v17 = vsel %vm111_vm0, %v2344_v13, 0.0  ;;  %v2356_v20 = vmul.f32 %v2344_v13, %v2344_v13 }
0x1627   :  { %2351 = vadd.xlane.f32.xlu0 %v2350_v17 }
0x1628   :  { %v2360_v35 = vsel %vm111_vm0, %v2356_v20, 0.0 }
0x1629   :  { %2361 = vadd.xlane.f32.xlu2 %v2360_v35  ;;  %v2510_v41 = vpop.xlane.xlu1 %2509 }
0x162a   :  { %3812 = vrcp.f32 %v2510_v41 }
0x1630   :  { %v3813_v23 = vpop.eup %3812 }
0x1631   :  { %v2512_v27 = vmul.f32 %v3813_v23, %v3811_v4 }
0x1633   :  { %2773 = vst.msk [vmem:[#allocation11] sm:$0xff] %vm414_vm2, %v2512_v27  ;;  %3528 = vmatmul.msk.f32.vlgmr.msra.gmra.mxu3 %vm414_vm2, %v2512_v27 }
0x163d   :  { %v2571_v10 = vpop.f32.mrf.mxu0 }
0x163e   :  { %v2572_v26 = vadd.f32 %v4710_v55, %v2571_v10 }
0x1640   :  { %v2574_v1 = vsel %vm414_vm2, %v2572_v26, -inf }
0x1641   :  { %v2619_v31 = vpop.permute.xlu1 %2618  ;;  %2575 = vmax.xlane.f32.xlu1 %v2574_v1 }
0x1642   :  { %3533 = vmatpush.xpose.msk.msrb.mxu3 %vm144_vm1, %v2619_v31 }
0x1646   :  { %3534 = vmatpush.xpose.msk.msrb.mxu3 %vm144_vm1, %v2617_v29 }
0x1649   :  { %3535 = vmatmul.msk.f32.vlgmr.msrb.gmra.mxu3 %vm144_vm1, %v2615_v60 }
0x165a   :  { %2690 = vrot.lane.b32.xlu1 %v4671_v36, %s4036_s12 }
0x169a   :  { %v2352_v34 = vpop.xlane.xlu0 %2351 }
0x169b   :  { %v2354_v5 = vmul.f32 %v2352_v34, %v4250_v30 }
0x169c   :  { %v2362_v50 = vpop.xlane.xlu2 %2361 }
0x169d   :  { %v2368_v54 = vmul.f32 %v2354_v5, %v2354_v5  ;;  %v2364_v25 = vmul.f32 %v2362_v50, %v4250_v30  ;;  %v2366_v46 = vsub.f32 %v2344_v13, %v2354_v5 }
0x169f   :  { %v2370_v33 = vsub.f32 %v2364_v25, %v2368_v54 }
0x16a1   :  { %v2372_v40 = vadd.f32 1e-05, %v2370_v33 }
0x16a3   :  { %3814 = vrsqrt.f32 %v2372_v40  ;;  %vm2389_vm5 = vweird.f32 %v2372_v40 }
0x16a9   :  { %v3815_v63 = vpop.eup %3814 }
0x16aa   :  { %v2384_v42 = vmul.f32 %v3815_v63, %v2372_v40  ;;  %vm2390_vm4 = vweird.f32 %v3815_v63 }
0x16ab   :  { %vm2391_vm6 = vmor %vm2389_vm5, %vm2390_vm4 }
0x16ac   :  { %v2385_v43 = vmul.f32 %v3815_v63, %v2384_v42 }
0x16ae   :  { %v2386_v45 = vmul.f32 0.5, %v2385_v43 }
0x16b0   :  { %v2387_v21 = vsub.f32 1.5, %v2386_v45  ;;  %v3867_v45 = vld [vmem:[%s4904_s4 + $0x1] ss:$0 sm:$0xff]  ;;  %s4043_s4 = smov [#allocation11]  }
0x16b2   :  { %v2388_v44 = vmul.f32 %v3815_v63, %v2387_v21 }
0x16b4   :  { %v2392_v36 = vsel %vm2391_vm6, %v3815_v63, %v2388_v44  ;;  %v2576_v8 = vpop.xlane.xlu1 %2575 }
0x16b5   :  { %v2577_v19 = vsub.f32 %v2572_v26, %v2576_v8  ;;  %v2394_v9 = vmul.f32 %v2392_v36, %v2366_v46 }
0x16b6   :  { %v4748_v62 = vpop.f32.mrf.mxu3 }
0x16b7   :  { %v2578_v28 = vmul.f32 1.442695, %v2577_v19  ;;  %v2397_v48 = vmul.f32 %v4652_v22, %v2394_v9 }
0x16b9   :  { %3816 = vpow2.f32 %v2578_v28  ;;  %v2400_v51 = vadd.f32 %v4655_v52, %v2397_v48  ;;  %v2470_v52 = vpop.f32.mrf.mxu1 }
0x16ba   :  { %v4755_v2 = vadd.f32 %v4668_v18, %v2470_v52 }
0x16bb   :  { %v4743_v53 = vmul.f32 %v2400_v51, %v4342_v59 }
0x16bc   :  { %2853 = vrot.lane.b32.xlu1 %v4755_v2, %s4029_s26 }
0x16bd   :  { %3520 = vmatmul.msk.f32.gmra.mxu2 %vm111_vm0, %v4743_v53 }
0x16bf   :  { %v3817_v37 = vpop.eup %3816 }
0x16c0   :  { %v2580_v57 = vsel %vm414_vm2, %v3817_v37, 0.0 }
0x16c1   :  { %2581 = vadd.xlane.f32.xlu2 %v2580_v57 }
0x16cc   :  { %v2643_v0 = vpop.f32.mrf.mxu3  ;;  %v2691_v12 = vpop.permute.xlu1 %2690 }
0x16cd   :  { %v2644_v61 = vadd.f32 %v4710_v55, %v2643_v0 }
0x16cf   :  { %v2646_v22 = vsel %vm414_vm2, %v2644_v61, -inf }
0x16d0   :  { %2647 = vmax.xlane.f32.xlu0 %v2646_v22 }
0x16d9   :  { %2688 = vrot.lane.b32.xlu2 %v4676_v38, %s4036_s12  ;;  %v4768_v38 = vadd.f32 %v4668_v18, %v2467_v3 }
0x16e1   :  { %2925 = vrot.lane.b32.xlu2 %v4755_v2, %s4035_s11 }
0x16e4   :  { %3635 = vrot.lane.b32.xlu0 %v4680_v39, %s4032_s29 }
0x16ec   :  { %2686 = vrot.lane.b32.xlu0 %v4691_v32, %s4036_s12 }
0x16f4   :  { %3640 = vrot.lane.b32.xlu0 %v4680_v39, %s4034_s10 }
0x16fc   :  { %2851 = vrot.lane.b32.xlu0 %v4768_v38, %s4029_s26 }
0x1704   :  { %2997 = vrot.lane.b32.xlu0 %v4755_v2, %s4036_s12 }
0x172e   :  { %v2854_v16 = vpop.permute.xlu1 %2853 }
0x172f   :  { %3545 = vmatpush.xpose.msk.msra.mxu1 %vm144_vm1, %v2854_v16 }
0x1734   :  { %v2582_v6 = vpop.xlane.xlu2 %2581 }
0x1735   :  { %3818 = vrcp.f32 %v2582_v6 }
0x173b   :  { %v3819_v7 = vpop.eup %3818 }
0x173c   :  { %v2584_v47 = vmul.f32 %v3819_v7, %v3817_v37  ;;  %v2689_v35 = vpop.permute.xlu2 %2688 }
0x173e   :  { %2775 = vst.msk [vmem:[#allocation11 + $0x8] sm:$0xff] %vm414_vm2, %v2584_v47 }
0x1740   :  { %v2435_v49 = vpop.f32.mrf.mxu2 }
0x1741   :  { %v2436_v32 = vadd.f32 %v4685_v24, %v2435_v49 }
0x1743   :  { %2921 = vrot.lane.b32.xlu0 %v2436_v32, %s4035_s11  ;;  %2849 = vrot.lane.b32.xlu1 %v2436_v32, %s4029_s26  ;;  %v2648_v18 = vpop.xlane.xlu0 %2647  ;;  %s3397_s26 = sshll.u32 %s4043_s4, 4  ;;  %s3398_s26 = int_to_ptr.vmem [resolvable:$true] %s3397_s26 }
0x1744   :  { %v2649_v4 = vsub.f32 %v2644_v61, %v2648_v18  ;;  %v2926_v1 = vpop.permute.xlu2 %2925 }
0x1746   :  { %v2650_v11 = vmul.f32 1.442695, %v2649_v4 }
0x1748   :  { %3820 = vpow2.f32 %v2650_v11 }
0x174b   :  { %2923 = vrot.lane.b32.xlu1 %v4768_v38, %s4035_s11  ;;  %s3386_s11 = sshll.u32 %s4907_s7, 4  ;;  %s3387_s11 = int_to_ptr.hbm [resolvable:$true] %s3386_s11 }
0x174e   :  { %v3821_v14 = vpop.eup %3820 }
0x174f   :  { %v2652_v15 = vsel %vm414_vm2, %v3821_v14, 0.0 }
0x1750   :  { %2653 = vadd.xlane.f32.xlu2 %v2652_v15 }
0x1753   :  { %2993 = vrot.lane.b32.xlu1 %v2436_v32, %s4036_s12 }
0x1756   :  { %v3636_v24 = vpop.permute.xlu0 %3635 }
0x1757   :  { %v3637_v13 = vunpack.i.l.bf16 %v3636_v24  ;;  %v3638_v17 = vunpack.i.h.bf16 %v3636_v24 }
0x1759   :  { %2608 = vmatpush.msrb.mxu2 %v3637_v13 }
0x175b   :  { %2609 = vmatpush.msrb.mxu2 %v3638_v17 }
0x175c   :  { %3532 = vmatmul.msk.f32.vlgmr.msrb.gmra.mxu2 %vm414_vm2, %v2584_v47 }
0x175d   :  { %3537 = vmatpush.xpose.msk.msra.mxu2 %vm144_vm1, %v2691_v12  ;;  %v3654_v12 = vpack.i.bf16 %v4768_v38, %v4755_v2 }
0x175e   :  { %v2687_v20 = vpop.permute.xlu0 %2686 }
0x1761   :  { %3538 = vmatpush.xpose.msk.msra.mxu2 %vm144_vm1, %v2689_v35 }
0x1764   :  { %3539 = vmatmul.msk.f32.vlgmr.msra.gmra.mxu2 %vm144_vm1, %v2687_v20 }
0x1766   :  { %v3641_v41 = vpop.permute.xlu0 %3640 }
0x1767   :  { %v3642_v23 = vunpack.i.l.bf16 %v3641_v41  ;;  %v3643_v27 = vunpack.i.h.bf16 %v3641_v41 }
0x1768   :  { %2995 = vrot.lane.b32.xlu2 %v4768_v38, %s4036_s12 }
0x1769   :  { %2680 = vmatpush.msra.mxu0 %v3642_v23 }
0x176b   :  { %2681 = vmatpush.msra.mxu0 %v3643_v27 }
0x176d   :  { %3541 = vmatpush.xpose.msk.msrb.mxu0 %vm144_vm1, %v4755_v2 }
0x176e   :  { %v2852_v10 = vpop.permute.xlu0 %2851 }
0x176f   :  { %3546 = vmatpush.xpose.msk.msra.mxu1 %vm144_vm1, %v2852_v10 }
0x1771   :  { %3542 = vmatpush.xpose.msk.msrb.mxu0 %vm144_vm1, %v4768_v38 }
0x1776   :  { %v2998_v29 = vpop.permute.xlu0 %2997 }
0x1777   :  { %3553 = vmatpush.xpose.msk.msrb.mxu1 %vm144_vm1, %v2998_v29 }
0x17b5   :  { %v2850_v26 = vpop.permute.xlu1 %2849  ;;  %v2922_v25 = vpop.permute.xlu0 %2921 }
0x17b6   :  { %3547 = vmatmul.msk.f32.vlgmr.msra.gmra.mxu1 %vm144_vm1, %v2850_v26 }
0x17bd   :  { %v2924_v60 = vpop.permute.xlu1 %2923 }
0x17c3   :  { %v2654_v31 = vpop.xlane.xlu2 %2653 }
0x17c4   :  { %3822 = vrcp.f32 %v2654_v31 }
0x17c5   :  { %v2994_v54 = vpop.permute.xlu1 %2993 }
0x17ca   :  { %v3823_v34 = vpop.eup %3822 }
0x17cb   :  { %v2656_v5 = vmul.f32 %v3823_v34, %v3821_v14  ;;  %v2996_v50 = vpop.permute.xlu2 %2995 }
0x17cc   :  { %3554 = vmatpush.xpose.msk.msrb.mxu1 %vm144_vm1, %v2996_v50 }
0x17cd   :  { %2777 = vst.msk [vmem:[#allocation11 + $0x10] sm:$0xff] %vm414_vm2, %v2656_v5  ;;  %3536 = vmatmul.msk.f32.vlgmr.msra.gmra.mxu0 %vm414_vm2, %v2656_v5 }
0x17ce   :  { %3549 = vmatpush.xpose.msk.msra.mxu0 %vm144_vm1, %v2926_v1 }
0x17cf   :  { %3555 = vmatmul.msk.f32.vlgmr.msrb.gmra.mxu1 %vm144_vm1, %v2994_v54 }
0x17d2   :  { %3550 = vmatpush.xpose.msk.msra.mxu0 %vm144_vm1, %v2924_v60 }
0x17d5   :  { %3543 = vmatmul.msk.f32.vlgmr.msrb.gmra.mxu0 %vm144_vm1, %v2436_v32 }
0x17dd   :  { %3551 = vmatmul.msk.f32.vlgmr.msra.gmra.mxu0 %vm144_vm1, %v2922_v25 }
0x17df   :  { %v4804_v33 = vpop.f32.mrf.mxu2 }
0x17e7   :  { %v2715_v40 = vpop.f32.mrf.mxu2 }
0x17e8   :  { %v2716_v63 = vadd.f32 %v4710_v55, %v2715_v40 }
0x17ea   :  { %v2718_v42 = vsel %vm414_vm2, %v2716_v63, -inf }
0x17eb   :  { %2719 = vmax.xlane.f32.xlu2 %v2718_v42 }
0x1833   :  { %v2878_v43 = vpop.f32.mrf.mxu1 }
0x1834   :  { %v2879_v21 = vadd.f32 %v3867_v45, %v2878_v43 }
0x1836   :  { %v2881_v44 = vsel %vm414_vm2, %v2879_v21, -inf }
0x1837   :  { %2882 = vmax.xlane.f32.xlu1 %v2881_v44 }
0x184a   :  { %v2683_v46 = vpop.f32.mrf.mxu0 }
0x184c   :  { %v3022_v36 = vpop.f32.mrf.mxu1 }
0x184d   :  { %v3023_v8 = vadd.f32 %v3867_v45, %v3022_v36 }
0x184f   :  { %v3025_v19 = vsel %vm414_vm2, %v3023_v8, -inf }
0x1850   :  { %3026 = vmax.xlane.f32.xlu0 %v3025_v19 }
0x1852   :  { %v2806_v9 = vpop.f32.mrf.mxu0 }
0x1853   :  { %v2807_v55 = vadd.f32 %v3867_v45, %v2806_v9 }
0x1855   :  { %v2809_v28 = vsel %vm414_vm2, %v2807_v55, -inf }
0x1858   :  { %2810 = vmax.xlane.f32.xlu0 %v2809_v28  ;;  %v3091_v28 = vld [vmem:[#allocation7 + $0x1a8] sm:$0xff] }
0x1859   :  { %3112 = vmatpush.msrb.mxu0 %v3091_v28 }
0x185a   :  { %v2950_v48 = vpop.f32.mrf.mxu0 }
0x185b   :  { %v2951_v51 = vadd.f32 %v3867_v45, %v2950_v48  ;;  %v3090_v48 = vld [vmem:[#allocation7 + $0x1a0] sm:$0xff] }
0x185c   :  { %3113 = vmatpush.msrb.mxu0 %v3090_v48 }
0x185d   :  { %v2953_v37 = vsel %vm414_vm2, %v2951_v51, -inf }
0x185e   :  { %2954 = vmax.xlane.f32.xlu2 %v2953_v37  ;;  %v2720_v57 = vpop.xlane.xlu2 %2719 }
0x185f   :  { %v2721_v0 = vsub.f32 %v2716_v63, %v2720_v57 }
0x1861   :  { %v2722_v61 = vmul.f32 1.442695, %v2721_v0 }
0x1863   :  { %3824 = vpow2.f32 %v2722_v61  ;;  %v3088_v61 = vld [vmem:[#allocation7 + $0x190] sm:$0xff] }
0x1869   :  { %v3825_v22 = vpop.eup %3824 }
0x186a   :  { %v2724_v3 = vsel %vm414_vm2, %v3825_v22, 0.0 }
0x186b   :  { %2725 = vadd.xlane.f32.xlu1 %v2724_v3 }
0x1876   :  { %3645 = vrot.lane.b32.xlu2 %v4680_v39, %s4033_s0 }
0x18aa   :  { %v2883_v52 = vpop.xlane.xlu1 %2882 }
0x18ab   :  { %v2884_v6 = vsub.f32 %v2879_v21, %v2883_v52 }
0x18ad   :  { %v2885_v7 = vmul.f32 1.442695, %v2884_v6 }
0x18af   :  { %3826 = vpow2.f32 %v2885_v7 }
0x18b5   :  { %v3827_v47 = vpop.eup %3826 }
0x18b6   :  { %v2887_v49 = vsel %vm414_vm2, %v3827_v47, 0.0 }
0x18b7   :  { %2888 = vadd.xlane.f32.xlu1 %v2887_v49 }
0x18c3   :  { %v3027_v32 = vpop.xlane.xlu0 %3026 }
0x18c4   :  { %v3028_v27 = vsub.f32 %v3023_v8, %v3027_v32 }
0x18c6   :  { %v3029_v10 = vmul.f32 1.442695, %v3028_v27  ;;  %v3183_v27 = vld [vmem:[#allocation7 + $0x1b0] sm:$0xff] }
0x18cb   :  { %v2811_v18 = vpop.xlane.xlu0 %2810 }
0x18cc   :  { %v2812_v4 = vsub.f32 %v2807_v55, %v2811_v18 }
0x18ce   :  { %v2813_v11 = vmul.f32 1.442695, %v2812_v4 }
0x18d0   :  { %3828 = vpow2.f32 %v2813_v11  ;;  %3655 = vrot.lane.b32.xlu1 %v3654_v12, %s4032_s29  ;;  %v3691_v11 = vld [vmem:[#allocation7 + $0x214] ss:$0 sm:$0xff]  ;;  %s3399_s29 = sshll.u32 %s4908_s8, 4  ;;  %s3400_s29 = int_to_ptr.hbm [resolvable:$true] %s3399_s29 }
0x18d1   :  { %v2955_v14 = vpop.xlane.xlu2 %2954 }
0x18d2   :  { %v2956_v39 = vsub.f32 %v2951_v51, %v2955_v14  ;;  %v3089_v51 = vld [vmem:[#allocation7 + $0x198] sm:$0xff] }
0x18d3   :  { %3114 = vmatpush.msrb.mxu0 %v3089_v51 }
0x18d4   :  { %v2957_v15 = vmul.f32 1.442695, %v2956_v39 }
0x18d5   :  { %3115 = vmatpush.msrb.mxu0 %v3088_v61  ;;  %v3222_v61 = vld [vmem:[#allocation7 + $0x1e0] sm:$0xff] }
0x18d6   :  { %v3829_v16 = vpop.eup %3828  ;;  %3830 = vpow2.f32 %v2957_v15 }
0x18d7   :  { %v2815_v24 = vsel %vm414_vm2, %v3829_v16, 0.0 }
0x18d8   :  { %2816 = vadd.xlane.f32.xlu0 %v2815_v24  ;;  %3660 = vrot.lane.b32.xlu1 %v3654_v12, %s4034_s10 }
0x18d9   :  { %v3646_v13 = vpop.permute.xlu2 %3645 }
0x18da   :  { %v3647_v17 = vunpack.i.l.bf16 %v3646_v13  ;;  %v3648_v35 = vunpack.i.h.bf16 %v3646_v13 }
0x18dc   :  { %v3831_v20 = vpop.eup %3830  ;;  %2752 = vmatpush.msra.mxu3 %v3647_v17 }
0x18dd   :  { %v2959_v2 = vsel %vm414_vm2, %v3831_v20, 0.0 }
0x18de   :  { %v2726_v38 = vpop.xlane.xlu1 %2725  ;;  %2960 = vadd.xlane.f32.xlu2 %v2959_v2  ;;  %2753 = vmatpush.msra.mxu3 %v3648_v35 }
0x18df   :  { %3832 = vrcp.f32 %v2726_v38  ;;  %v3186_v38 = vld [vmem:[#allocation7 + $0x1c8] sm:$0xff] }
0x18e0   :  { %3665 = vrot.lane.b32.xlu1 %v3654_v12, %s4033_s0  ;;  %3834 = vpow2.f32 %v3029_v10 }
0x18e5   :  { %v3833_v41 = vpop.eup %3832 }
0x18e6   :  { %v2728_v23 = vmul.f32 %v3833_v41, %v3825_v22  ;;  %v3835_v29 = vpop.eup %3834  ;;  %v3184_v41 = vld [vmem:[#allocation7 + $0x1b8] sm:$0xff] }
0x18e7   :  { %v3031_v26 = vsel %vm414_vm2, %v3835_v29, 0.0 }
0x18e8   :  { %2779 = vst.msk [vmem:[#allocation11 + $0x18] sm:$0xff] %vm414_vm2, %v2728_v23  ;;  %2759 = vrot.lane.b32.xlu1 %v4804_v33, %s4024_s14  ;;  %3540 = vmatmul.msk.f32.vlgmr.msra.gmra.mxu3 %vm414_vm2, %v2728_v23 }
0x18ec   :  { %3650 = vrot.lane.b32.xlu0 %v3654_v12, %s4030_s27 }
0x18f0   :  { %2763 = vrot.lane.b32.xlu1 %v2683_v46, %s4040_s18 }
0x1916   :  { %3032 = vadd.xlane.f32.xlu0 %v3031_v26 }
0x192a   :  { %v2889_v1 = vpop.xlane.xlu1 %2888 }
0x192b   :  { %3836 = vrcp.f32 %v2889_v1 }
0x1931   :  { %v3837_v31 = vpop.eup %3836 }
0x1932   :  { %v2891_v60 = vmul.f32 %v3837_v31, %v3827_v47 }
0x1934   :  { %3083 = vst.msk [vmem:[#allocation11 + $0x28] sm:$0xff] %vm414_vm2, %v2891_v60 }
0x1942   :  { %v3656_v34 = vpop.permute.xlu1 %3655 }
0x1943   :  { %v3657_v5 = vunpack.i.l.bf16 %v3656_v34  ;;  %v3658_v50 = vunpack.i.h.bf16 %v3656_v34 }
0x1945   :  { %2915 = vmatpush.msrb.mxu3 %v3657_v5 }
0x1947   :  { %2916 = vmatpush.msrb.mxu3 %v3658_v50 }
0x1948   :  { %3548 = vmatmul.msk.f32.vlgmr.msrb.gmra.mxu3 %vm414_vm2, %v2891_v60 }
0x194a   :  { %v3661_v54 = vpop.permute.xlu1 %3660 }
0x194b   :  { %v2817_v25 = vpop.xlane.xlu0 %2816  ;;  %v3662_v19 = vunpack.i.l.bf16 %v3661_v54  ;;  %v3663_v9 = vunpack.i.h.bf16 %v3661_v54 }
0x194c   :  { %3838 = vrcp.f32 %v2817_v25 }
0x1951   :  { %v2961_v33 = vpop.xlane.xlu2 %2960 }
0x1952   :  { %v3839_v40 = vpop.eup %3838  ;;  %3840 = vrcp.f32 %v2961_v33  ;;  %v3666_v63 = vpop.permute.xlu1 %3665 }
0x1953   :  { %v2819_v42 = vmul.f32 %v3839_v40, %v3829_v16  ;;  %v3667_v43 = vunpack.i.l.bf16 %v3666_v63  ;;  %v3668_v45 = vunpack.i.h.bf16 %v3666_v63  ;;  %v3692_v63 = vld [vmem:[#allocation7 + $0x21a] ss:$0 sm:$0xff] }
0x1955   :  { %3081 = vst.msk [vmem:[#allocation11 + $0x20] sm:$0xff] %vm414_vm2, %v2819_v42  ;;  %3059 = vmatpush.msra.mxu3 %v3667_v43 }
0x1957   :  { %3060 = vmatpush.msra.mxu3 %v3668_v45  ;;  %v3693_v45 = vld [vmem:[#allocation7 + $0x21b] ss:$0 sm:$0xff] }
0x1958   :  { %v3841_v21 = vpop.eup %3840 }
0x1959   :  { %v2963_v44 = vmul.f32 %v3841_v21, %v3831_v20 }
0x195a   :  { %v2760_v22 = vpop.permute.xlu1 %2759 }
0x195b   :  { %3085 = vst.msk [vmem:[#allocation11 + $0x30] sm:$0xff] %vm414_vm2, %v2963_v44  ;;  %v2770_v52 = vsel %vm144_vm1, %v4748_v62, %v2760_v22  ;;  %v3221_v22 = vld [vmem:[#allocation7 + $0x1d8] sm:$0xff] }
0x195e   :  { %v3651_v46 = vpop.permute.xlu0 %3650 }
0x195f   :  { %v3652_v36 = vunpack.i.l.bf16 %v3651_v46  ;;  %v3653_v8 = vunpack.i.h.bf16 %v3651_v46 }
0x1961   :  { %2843 = vmatpush.msrb.mxu2 %v3652_v36  ;;  %v3227_v36 = vld [vmem:[#allocation7 + $0x208] sm:$0xff] }
0x1962   :  { %v2764_v3 = vpop.permute.xlu1 %2763  ;;  %3244 = vmatpush.msra.mxu1 %v3227_v36 }
0x1963   :  { %2844 = vmatpush.msrb.mxu2 %v3653_v8  ;;  %v2771_v6 = vsel %vm414_vm2, %v2770_v52, %v2764_v3  ;;  %v3226_v8 = vld [vmem:[#allocation7 + $0x200] sm:$0xff]  ;;  %v3220_v3 = vld [vmem:[#allocation7 + $0x1d0] sm:$0xff] }
0x1964   :  { %3544 = vmatmul.msk.f32.vlgmr.msrb.gmra.mxu2 %vm414_vm2, %v2819_v42  ;;  %3245 = vmatpush.msra.mxu1 %v3226_v8  ;;  %v3694_v52 = vld [vmem:[#allocation7 + $0x215] ss:$0 sm:$0xff] }
0x1965   :  { %2987 = vmatpush.msra.mxu2 %v3662_v19  ;;  %v3225_v19 = vld [vmem:[#allocation7 + $0x1f8] sm:$0xff] }
0x1966   :  { %3246 = vmatpush.msra.mxu1 %v3225_v19 }
0x1967   :  { %2988 = vmatpush.msra.mxu2 %v3663_v9  ;;  %v3224_v9 = vld [vmem:[#allocation7 + $0x1f0] sm:$0xff] }
0x1968   :  { %3247 = vmatpush.msra.mxu1 %v3224_v9 }
0x1969   :  { %3207 = vmatpush.msrb.mxu2 %v3186_v38 }
0x196b   :  { %v2755_v55 = vpop.f32.mrf.mxu3 }
0x196c   :  { %3552 = vmatmul.msk.f32.vlgmr.msra.gmra.mxu2 %vm414_vm2, %v2963_v44  ;;  %2767 = vrot.lane.b32.xlu2 %v2755_v55, %s4039_s17  ;;  %v3223_v55 = vld [vmem:[#allocation7 + $0x1e8] sm:$0xff] }
0x196d   :  { %3248 = vmatpush.msra.mxu1 %v3223_v55  ;;  %v3696_v55 = vld [vmem:[#allocation7 + $0x21c] ss:$0 sm:$0xff] }
0x196f   :  { %3249 = vmatpush.msra.mxu1 %v3222_v61 }
0x1971   :  { %3250 = vmatpush.msra.mxu1 %v3221_v22 }
0x1973   :  { %3251 = vmatpush.msra.mxu1 %v3220_v3 }
0x1989   :  { %v3033_v37 = vpop.xlane.xlu0 %3032 }
0x198a   :  { %3842 = vrcp.f32 %v3033_v37 }
0x1990   :  { %v3843_v57 = vpop.eup %3842 }
0x1991   :  { %v3035_v0 = vmul.f32 %v3843_v57, %v3835_v29 }
0x1993   :  { %3087 = vst.msk [vmem:[#allocation11 + $0x38] sm:$0xff] %vm414_vm2, %v3035_v0  ;;  %3556 = vmatmul.msk.f32.vlgmr.msra.gmra.mxu3 %vm414_vm2, %v3035_v0 }
0x1994   :  { %3405 = dma.vmem_to_hbm [thread:$0]  %s3398_s26, 1024, %s3400_s29, [#allocation12], %s4023_s13, %s4023_s13, %s4024_s14  }
0x19c6   :  { %v2768_v7 = vpop.permute.xlu2 %2767 }
0x19c7   :  { %v2772_v47 = vsel %vm416_vm3, %v2771_v6, %v2768_v7 }
0x19c8   :  { %3557 = vmatmul.msk.f32.vlgmr.msrb.gmra.mxu0 %vm111_vm0, %v2772_v47 }
0x19cb   :  { %v2918_v49 = vpop.f32.mrf.mxu3 }
0x19cc   :  { %3066 = vrot.lane.b32.xlu1 %v2918_v49, %s4024_s14 }
0x19e7   :  { %v2846_v32 = vpop.f32.mrf.mxu2 }
0x19ef   :  { %v2990_v18 = vpop.f32.mrf.mxu2 }
0x19f0   :  { %3070 = vrot.lane.b32.xlu0 %v2990_v18, %s4040_s18 }
0x1a16   :  { %v3062_v4 = vpop.f32.mrf.mxu3 }
0x1a17   :  { %3074 = vrot.lane.b32.xlu1 %v3062_v4, %s4039_s17 }
0x1a3e   :  { %v3067_v24 = vpop.permute.xlu1 %3066 }
0x1a3f   :  { %v3077_v17 = vsel %vm144_vm1, %v2846_v32, %v3067_v24 }
0x1a45   :  { %v3117_v12 = vpop.f32.mrf.mxu0 }
0x1a46   :  { %v3118_v62 = vadd.f32 %v3691_v11, %v3117_v12 }
0x1a48   :  { %v3123_v14 = vadd.f32 %v3118_v62, %v4661_v56  ;;  %v3185_v56 = vld [vmem:[#allocation7 + $0x1c0] sm:$0xff] }
0x1a49   :  { %3208 = vmatpush.msrb.mxu2 %v3185_v56  ;;  %v3695_v56 = vld [vmem:[#allocation7 + $0x216] ss:$0 sm:$0xff] }
0x1a4a   :  { %v3127_v39 = vsel %vm111_vm0, %v3123_v14, 0.0  ;;  %v3135_v15 = vmul.f32 %v3123_v14, %v3123_v14 }
0x1a4b   :  { %3128 = vadd.xlane.f32.xlu1 %v3127_v39  ;;  %3209 = vmatpush.msrb.mxu2 %v3184_v41 }
0x1a4c   :  { %v3137_v16 = vsel %vm111_vm0, %v3135_v15, 0.0 }
0x1a4d   :  { %3138 = vadd.xlane.f32.xlu2 %v3137_v16  ;;  %3210 = vmatpush.msrb.mxu2 %v3183_v27 }
0x1a62   :  { %v3071_v13 = vpop.permute.xlu0 %3070 }
0x1a63   :  { %v3078_v20 = vsel %vm414_vm2, %v3077_v17, %v3071_v13 }
0x1a89   :  { %v3075_v35 = vpop.permute.xlu1 %3074 }
0x1a8a   :  { %v3079_v2 = vsel %vm416_vm3, %v3078_v20, %v3075_v35 }
0x1a8b   :  { %3558 = vmatmul.msk.f32.gmra.mxu0 %vm111_vm0, %v3079_v2 }
0x1abe   :  { %v3129_v23 = vpop.xlane.xlu1 %3128 }
0x1abf   :  { %v3133_v10 = vmul.f32 %v3129_v23, %v4250_v30 }
0x1ac0   :  { %v3139_v29 = vpop.xlane.xlu2 %3138 }
0x1ac1   :  { %v3147_v26 = vmul.f32 %v3133_v10, %v3133_v10  ;;  %v3143_v1 = vmul.f32 %v3139_v29, %v4250_v30  ;;  %v3145_v40 = vsub.f32 %v3123_v14, %v3133_v10 }
0x1ac3   :  { %v3149_v31 = vsub.f32 %v3143_v1, %v3147_v26 }
0x1ac5   :  { %v3151_v60 = vadd.f32 1e-05, %v3149_v31 }
0x1ac7   :  { %3844 = vrsqrt.f32 %v3151_v60  ;;  %vm3159_vm2 = vweird.f32 %v3151_v60 }
0x1acd   :  { %v3845_v34 = vpop.eup %3844 }
0x1ace   :  { %v3154_v5 = vmul.f32 %v3845_v34, %v3151_v60  ;;  %vm3160_vm1 = vweird.f32 %v3845_v34 }
0x1acf   :  { %vm3161_vm3 = vmor %vm3159_vm2, %vm3160_vm1 }
0x1ad0   :  { %v3155_v50 = vmul.f32 %v3845_v34, %v3154_v5  ;;  %v3321_v5 = vld [vmem:[#allocation8 + $0x10] sm:$0xff] }
0x1ad2   :  { %v3156_v54 = vmul.f32 0.5, %v3155_v50  ;;  %v3320_v50 = vld [vmem:[#allocation8 + $0x8] sm:$0xff] }
0x1ad4   :  { %v3157_v25 = vsub.f32 1.5, %v3156_v54 }
0x1ad6   :  { %v3158_v33 = vmul.f32 %v3845_v34, %v3157_v25  ;;  %v3319_v25 = vld [vmem:[#allocation8] sm:$0xff] }
0x1ad8   :  { %v3162_v42 = vsel %vm3161_vm3, %v3845_v34, %v3158_v33  ;;  %v3322_v34 = vld [vmem:[#allocation8 + $0x18] sm:$0xff] }
0x1ad9   :  { %v3173_v43 = vmul.f32 %v3162_v42, %v3145_v40  ;;  %3341 = vmatpush.msrb.mxu3 %v3322_v34 }
0x1adb   :  { %v3176_v21 = vmul.f32 %v3692_v63, %v3173_v43  ;;  %3342 = vmatpush.msrb.mxu3 %v3321_v5 }
0x1add   :  { %v3179_v44 = vadd.f32 %v3693_v45, %v3176_v21  ;;  %3343 = vmatpush.msrb.mxu3 %v3320_v50 }
0x1adf   :  { %v3181_v46 = vmul.f32 %v3179_v44, %v4262_v58  ;;  %3344 = vmatpush.msrb.mxu3 %v3319_v25 }
0x1ae1   :  { %3559 = vmatmul.msk.f32.vlgmr.msrb.gmra.mxu2 %vm111_vm0, %v3181_v46 }
0x1b08   :  { %v3120_v28 = vpop.f32.mrf.mxu0 }
0x1b09   :  { %v3121_v48 = vadd.f32 %v3691_v11, %v3120_v28 }
0x1b0b   :  { %v3124_v51 = vadd.f32 %v3121_v48, %v4743_v53 }
0x1b0d   :  { %v3130_v37 = vsel %vm111_vm0, %v3124_v51, 0.0  ;;  %v3136_v57 = vmul.f32 %v3124_v51, %v3124_v51 }
0x1b0e   :  { %3131 = vadd.xlane.f32.xlu0 %v3130_v37 }
0x1b0f   :  { %v3140_v0 = vsel %vm111_vm0, %v3136_v57, 0.0 }
0x1b10   :  { %3141 = vadd.xlane.f32.xlu2 %v3140_v0 }
0x1b64   :  { %v3212_v6 = vpop.f32.mrf.mxu2 }
0x1b65   :  { %v3213_v7 = vadd.f32 %v3694_v52, %v3212_v6 }
0x1b67   :  { %v3218_v47 = vmax.f32 %v3213_v7, 0.0 }
0x1b69   :  { %3561 = vmatmul.msk.f32.vlgmr.msra.gmra.mxu1 %vm1634_vm14, %v3218_v47 }
0x1b81   :  { %v3132_v53 = vpop.xlane.xlu0 %3131 }
0x1b82   :  { %v3134_v49 = vmul.f32 %v3132_v53, %v4250_v30 }
0x1b83   :  { %v3142_v32 = vpop.xlane.xlu2 %3141 }
0x1b84   :  { %v3148_v18 = vmul.f32 %v3134_v49, %v3134_v49  ;;  %v3144_v4 = vmul.f32 %v3142_v32, %v4250_v30  ;;  %v3146_v13 = vsub.f32 %v3124_v51, %v3134_v49  ;;  %v3697_v51 = vld [vmem:[#allocation7 + $0x21d] ss:$0 sm:$0xff] }
0x1b86   :  { %v3150_v11 = vsub.f32 %v3144_v4, %v3148_v18 }
0x1b88   :  { %v3152_v12 = vadd.f32 1e-05, %v3150_v11 }
0x1b8a   :  { %3846 = vrsqrt.f32 %v3152_v12  ;;  %vm3169_vm8 = vweird.f32 %v3152_v12 }
0x1b90   :  { %v3847_v62 = vpop.eup %3846 }
0x1b91   :  { %v3164_v14 = vmul.f32 %v3847_v62, %v3152_v12  ;;  %vm3170_vm7 = vweird.f32 %v3847_v62 }
0x1b92   :  { %vm3171_vm9 = vmor %vm3169_vm8, %vm3170_vm7 }
0x1b93   :  { %v3165_v39 = vmul.f32 %v3847_v62, %v3164_v14 }
0x1b95   :  { %v3166_v15 = vmul.f32 0.5, %v3165_v39 }
0x1b97   :  { %v3167_v16 = vsub.f32 1.5, %v3166_v15 }
0x1b99   :  { %v3168_v24 = vmul.f32 %v3847_v62, %v3167_v16 }
0x1b9b   :  { %v3172_v17 = vsel %vm3171_vm9, %v3847_v62, %v3168_v24 }
0x1b9c   :  { %v3174_v20 = vmul.f32 %v3172_v17, %v3146_v13 }
0x1b9e   :  { %v3177_v35 = vmul.f32 %v3692_v63, %v3174_v20 }
0x1ba0   :  { %v3180_v2 = vadd.f32 %v3693_v45, %v3177_v35 }
0x1ba2   :  { %v3182_v38 = vmul.f32 %v3180_v2, %v4342_v59 }
0x1ba4   :  { %3560 = vmatmul.msk.f32.gmra.mxu2 %vm111_vm0, %v3182_v38 }
0x1be6   :  { %v3253_v41 = vpop.f32.mrf.mxu1 }
0x1be7   :  { %v3254_v23 = vadd.f32 %v3695_v56, %v3253_v41 }
0x1be9   :  { %v3259_v27 = vadd.f32 %v3254_v23, %v3181_v46 }
0x1beb   :  { %v3263_v10 = vsel %vm111_vm0, %v3259_v27, 0.0  ;;  %v3271_v29 = vmul.f32 %v3259_v27, %v3259_v27 }
0x1bec   :  { %3264 = vadd.xlane.f32.xlu1 %v3263_v10 }
0x1bed   :  { %v3273_v26 = vsel %vm111_vm0, %v3271_v29, 0.0 }
0x1bee   :  { %3274 = vadd.xlane.f32.xlu2 %v3273_v26 }
0x1c27   :  { %v3215_v1 = vpop.f32.mrf.mxu2 }
0x1c28   :  { %v3216_v31 = vadd.f32 %v3694_v52, %v3215_v1 }
0x1c2a   :  { %v3219_v60 = vmax.f32 %v3216_v31, 0.0 }
0x1c2c   :  { %3562 = vmatmul.msk.f32.gmra.mxu1 %vm1634_vm14, %v3219_v60 }
0x1c5f   :  { %v3265_v54 = vpop.xlane.xlu1 %3264 }
0x1c60   :  { %v3269_v33 = vmul.f32 %v3265_v54, %v4250_v30 }
0x1c61   :  { %v3275_v40 = vpop.xlane.xlu2 %3274 }
0x1c62   :  { %v3283_v63 = vmul.f32 %v3269_v33, %v3269_v33  ;;  %v3279_v42 = vmul.f32 %v3275_v40, %v4250_v30  ;;  %v3281_v9 = vsub.f32 %v3259_v27, %v3269_v33 }
0x1c64   :  { %v3285_v43 = vsub.f32 %v3279_v42, %v3283_v63 }
0x1c66   :  { %v3287_v45 = vadd.f32 1e-05, %v3285_v43 }
0x1c68   :  { %3848 = vrsqrt.f32 %v3287_v45  ;;  %vm3295_vm11 = vweird.f32 %v3287_v45 }
0x1c6e   :  { %v3849_v21 = vpop.eup %3848 }
0x1c6f   :  { %v3290_v44 = vmul.f32 %v3849_v21, %v3287_v45  ;;  %vm3296_vm10 = vweird.f32 %v3849_v21 }
0x1c70   :  { %vm3297_vm12 = vmor %vm3295_vm11, %vm3296_vm10 }
0x1c71   :  { %v3291_v46 = vmul.f32 %v3849_v21, %v3290_v44 }
0x1c73   :  { %v3292_v36 = vmul.f32 0.5, %v3291_v46 }
0x1c75   :  { %v3293_v8 = vsub.f32 1.5, %v3292_v36 }
0x1c77   :  { %v3294_v19 = vmul.f32 %v3849_v21, %v3293_v8 }
0x1c79   :  { %v3298_v28 = vsel %vm3297_vm12, %v3849_v21, %v3294_v19 }
0x1c7a   :  { %v3309_v48 = vmul.f32 %v3298_v28, %v3281_v9 }
0x1c7c   :  { %v3312_v37 = vmul.f32 %v3696_v55, %v3309_v48 }
0x1c7e   :  { %v3315_v57 = vadd.f32 %v3697_v51, %v3312_v37 }
0x1c80   :  { %v3317_v0 = vmul.f32 %v3315_v57, %v4262_v58 }
0x1c82   :  { %3563 = vmatmul.msk.f32.vlgmr.msrb.gmra.mxu3 %vm111_vm0, %v3317_v0 }
0x1ca9   :  { %v3256_v61 = vpop.f32.mrf.mxu1 }
0x1caa   :  { %v3257_v22 = vadd.f32 %v3695_v56, %v3256_v61 }
0x1cac   :  { %v3260_v3 = vadd.f32 %v3257_v22, %v3182_v38 }
0x1cae   :  { %v3266_v52 = vsel %vm111_vm0, %v3260_v3, 0.0  ;;  %v3272_v6 = vmul.f32 %v3260_v3, %v3260_v3 }
0x1caf   :  { %3267 = vadd.xlane.f32.xlu0 %v3266_v52 }
0x1cb0   :  { %v3276_v7 = vsel %vm111_vm0, %v3272_v6, 0.0 }
0x1cb1   :  { %3277 = vadd.xlane.f32.xlu1 %v3276_v7 }
0x1d05   :  { %v3346_v47 = vpop.f32.mrf.mxu3 }
0x1d06   :  { %v3352_v53 = vsel %vm1634_vm14, %v3346_v47, -inf }
0x1d07   :  { %3353 = vmax.xlane.f32.xlu2 %v3352_v53 }
0x1d22   :  { %v3268_v49 = vpop.xlane.xlu0 %3267 }
0x1d23   :  { %v3270_v32 = vmul.f32 %v3268_v49, %v4250_v30 }
0x1d24   :  { %v3278_v58 = vpop.xlane.xlu1 %3277 }
0x1d25   :  { %v3284_v18 = vmul.f32 %v3270_v32, %v3270_v32  ;;  %v3280_v4 = vmul.f32 %v3278_v58, %v4250_v30  ;;  %v3282_v13 = vsub.f32 %v3260_v3, %v3270_v32 }
0x1d27   :  { %v3286_v11 = vsub.f32 %v3280_v4, %v3284_v18 }
0x1d29   :  { %v3288_v12 = vadd.f32 1e-05, %v3286_v11 }
0x1d2b   :  { %3850 = vrsqrt.f32 %v3288_v12  ;;  %vm3305_vm15 = vweird.f32 %v3288_v12 }
0x1d31   :  { %v3851_v62 = vpop.eup %3850 }
0x1d32   :  { %v3300_v14 = vmul.f32 %v3851_v62, %v3288_v12  ;;  %vm3306_vm13 = vweird.f32 %v3851_v62 }
0x1d33   :  { %vm3307_vm4 = vmor %vm3305_vm15, %vm3306_vm13 }
0x1d34   :  { %v3301_v39 = vmul.f32 %v3851_v62, %v3300_v14 }
0x1d36   :  { %v3302_v15 = vmul.f32 0.5, %v3301_v39 }
0x1d38   :  { %v3303_v16 = vsub.f32 1.5, %v3302_v15 }
0x1d3a   :  { %v3304_v24 = vmul.f32 %v3851_v62, %v3303_v16 }
0x1d3c   :  { %v3308_v17 = vsel %vm3307_vm4, %v3851_v62, %v3304_v24 }
0x1d3d   :  { %v3310_v20 = vmul.f32 %v3308_v17, %v3282_v13 }
0x1d3f   :  { %v3313_v35 = vmul.f32 %v3696_v55, %v3310_v20 }
0x1d41   :  { %v3316_v2 = vadd.f32 %v3697_v51, %v3313_v35 }
0x1d43   :  { %v3318_v38 = vmul.f32 %v3316_v2, %v4342_v59 }
0x1d45   :  { %3564 = vmatmul.msk.f32.gmra.mxu3 %vm111_vm0, %v3318_v38 }
0x1d7a   :  { %v3354_v30 = vpop.xlane.xlu2 %3353 }
0x1d7b   :  { %v3358_v56 = vsub.f32 %v3346_v47, %v3354_v30 }
0x1d7d   :  { %v3360_v41 = vmul.f32 1.442695, %v3358_v56 }
0x1d7f   :  { %3852 = vpow2.f32 %v3360_v41 }
0x1d85   :  { %v3853_v23 = vpop.eup %3852 }
0x1d86   :  { %v3364_v27 = vsel %vm1634_vm14, %v3853_v23, 0.0 }
0x1d87   :  { %3365 = vadd.xlane.f32.xlu1 %v3364_v27 }
0x1dc8   :  { %v3349_v10 = vpop.f32.mrf.mxu3 }
0x1dc9   :  { %v3355_v29 = vsel %vm1634_vm14, %v3349_v10, -inf }
0x1dca   :  { %3356 = vmax.xlane.f32.xlu0 %v3355_v29 }
0x1dfa   :  { %v3366_v26 = vpop.xlane.xlu1 %3365 }
0x1dfb   :  { %3854 = vlog2.f32 %v3366_v26 }
0x1e01   :  { %v3855_v1 = vpop.eup %3854 }
0x1e02   :  { %v3371_v31 = vmul.f32 0.6931472, %v3855_v1 }
0x1e04   :  { %v3374_v60 = vadd.f32 %v3371_v31, %v3354_v30 }
0x1e06   :  { %v3376_v59 = vsub.f32 %v3346_v47, %v3374_v60 }
0x1e08   :  { %3378 = vst.msk [vmem:[#allocation10] sm:$0xff] %vm1634_vm14, %v3376_v59 }
0x1e3d   :  { %v3357_v34 = vpop.xlane.xlu0 %3356 }
0x1e3e   :  { %v3359_v5 = vsub.f32 %v3349_v10, %v3357_v34 }
0x1e40   :  { %v3362_v50 = vmul.f32 1.442695, %v3359_v5 }
0x1e42   :  { %3856 = vpow2.f32 %v3362_v50 }
0x1e48   :  { %v3857_v54 = vpop.eup %3856 }
0x1e49   :  { %v3367_v25 = vsel %vm1634_vm14, %v3857_v54, 0.0 }
0x1e4a   :  { %3368 = vadd.xlane.f32.xlu2 %v3367_v25 }
0x1ebd   :  { %v3369_v33 = vpop.xlane.xlu2 %3368 }
0x1ebe   :  { %3858 = vlog2.f32 %v3369_v33 }
0x1ec4   :  { %v3859_v40 = vpop.eup %3858 }
0x1ec5   :  { %v3373_v63 = vmul.f32 0.6931472, %v3859_v40 }
0x1ec7   :  { %v3375_v42 = vadd.f32 %v3373_v63, %v3357_v34 }
0x1ec9   :  { %v3377_v43 = vsub.f32 %v3349_v10, %v3375_v42 }
0x1ecb   :  { %3379 = vst.msk [vmem:[#allocation10 + $0x8] sm:$0xff] %vm1634_vm14, %v3377_v43 }
0x1ecc   :  { %3392 = dma.vmem_to_hbm [thread:$0]  %s3385_s9, 256, %s3387_s11, [#allocation4], %s4023_s13, %s4023_s13, %s4024_s14  }
0x1ecd   :  { %4018 = dma.done.wait [#allocation4], 256  }
0x1ece   :  { %4019 = vsyncadd [#allocation4], 4294967040 }
0x1ecf   :  { %4020 = dma.done.wait [#allocation12], 1024  }
0x1ed0   :  { %4021 = vsyncadd [#allocation12], 4294966272 }
0x1ed1   :  { %3414 = vsyncpa [#allocation3], 1 }
0x1ed2   :  { %3415 = vsyncpa [#allocation6], 1 }
0x1ed3   :  { %3416 = vsyncpa [#allocation9], 1 }
0x1ed4   :  { %3417 = vsyncpa [#allocation4], 1 }
0x1ed5   :  { %3418 = vsyncpa [#allocation12], 1 }

</bundles_post_ra>
